<compile_context>
chip_gen: v5e
topology: v5e:2x2
jax: 0.10.0
libtpu: 0.0.40
codegen_flags: <defaults>
</compile_context>

<pallas_src>
import functools

import jax
import jax.numpy as jnp
from jax.experimental import pallas as pl
from jax.experimental.pallas import tpu as pltpu

N_FEATURES = 100
H0, H1, H2 = 256, 512, 1024
N_OUT = 784

K_PAD = 128     # padded input-feature dim (100 -> 128)
OUT_PAD = 896   # padded output-feature dim (784 -> 7*128)


def _leaky_relu(x, slope=0.2):
    return jnp.where(x >= 0, x, slope * x)


def generator_kernel(x_ref,
                     w0_ref, b0_ref,
                     w1_ref, b1_ref,
                     w2_ref, b2_ref,
                     w3_ref, b3_ref,
                     out_ref):
    # hidden0: Linear(100->256, padded to 128->256) + LeakyReLU(0.2)
    h = jnp.dot(x_ref[...].astype(jnp.bfloat16), w0_ref[...],
                preferred_element_type=jnp.float32) + b0_ref[...]
    h = _leaky_relu(h)

    # hidden1: Linear(256, 512) + LeakyReLU(0.2)
    h = jnp.dot(h.astype(jnp.bfloat16), w1_ref[...],
                preferred_element_type=jnp.float32) + b1_ref[...]
    h = _leaky_relu(h)

    # hidden2: Linear(512, 1024) + LeakyReLU(0.2)
    h = jnp.dot(h.astype(jnp.bfloat16), w2_ref[...],
                preferred_element_type=jnp.float32) + b2_ref[...]
    h = _leaky_relu(h)

    # out: Linear(1024, 784 padded to 896) + Tanh
    y = jnp.dot(h.astype(jnp.bfloat16), w3_ref[...],
                preferred_element_type=jnp.float32) + b3_ref[...]
    out_ref[...] = jnp.tanh(y).astype(out_ref.dtype)


def prepare_params(params):
    """One-time prep: pre-transposed weights -> bf16 + lane-dense padding.

    Weights stay resident in VMEM inside the kernel, so casting them here
    halves both the HBM->VMEM DMA and the resident VMEM footprint.
    Biases stay f32 (added after the f32-accumulating matmul).
    """
    return {
        "w0": jnp.pad(params["w0"].astype(jnp.bfloat16),
                      ((0, K_PAD - N_FEATURES), (0, 0))),
        "b0": params["b0"].astype(jnp.float32),
        "w1": params["w1"].astype(jnp.bfloat16),
        "b1": params["b1"].astype(jnp.float32),
        "w2": params["w2"].astype(jnp.bfloat16),
        "b2": params["b2"].astype(jnp.float32),
        "w3": jnp.pad(params["w3"].astype(jnp.bfloat16),
                      ((0, 0), (0, OUT_PAD - N_OUT))),
        "b3": jnp.pad(params["b3"].astype(jnp.float32),
                      ((0, 0), (0, OUT_PAD - N_OUT))),
    }


def _pick_tile(B, tb):
    """Batch tile: big enough to amortize grid-step overhead, small enough that
    the grid has >= 2 steps when possible (keeps both v7x TensorCores busy)."""
    if B >= 2 * tb:
        return tb
    if B > 8:
        return max(8, ((pl.cdiv(B, 2) + 7) // 8) * 8)
    return 8


@functools.partial(jax.jit, static_argnames=("tb",))
def generator_forward(x, prepped, *, tb=512):
    """x: (B, 100) float32. prepped: output of prepare_params()."""
    B = x.shape[0]
    TB = _pick_tile(B, tb)
    B_pad = pl.cdiv(B, TB) * TB

    # Lane-pad features 100->128 and round batch up; fuses under jit.
    x_p = jnp.pad(x.astype(jnp.float32),
                  ((0, B_pad - B), (0, K_PAD - N_FEATURES)))

    w0, b0 = prepped["w0"], prepped["b0"]
    w1, b1 = prepped["w1"], prepped["b1"]
    w2, b2 = prepped["w2"], prepped["b2"]
    w3, b3 = prepped["w3"], prepped["b3"]

    # Weights/biases: full block, constant block index -> resident in VMEM.
    def resident(shape):
        nd = len(shape)
        return pl.BlockSpec(shape, lambda i, nd=nd: (0,) * nd)

    weight_bytes = (2 * (w0.size + w1.size + w2.size + w3.size) +
                    4 * (b0.size + b1.size + b2.size + b3.size))
    cost = pl.CostEstimate(
        flops=2 * B_pad * (K_PAD * H0 + H0 * H1 + H1 * H2 + H2 * OUT_PAD),
        transcendentals=B_pad * OUT_PAD,
        bytes_accessed=weight_bytes + 4 * (x_p.size + B_pad * OUT_PAD),
    )

    out = pl.pallas_call(
        generator_kernel,
        out_shape=jax.ShapeDtypeStruct((B_pad, OUT_PAD), jnp.float32),
        grid=(B_pad // TB,),
        in_specs=[
            pl.BlockSpec((TB, K_PAD), lambda i: (i, 0)),
            resident(w0.shape), resident(b0.shape),
            resident(w1.shape), resident(b1.shape),
            resident(w2.shape), resident(b2.shape),
            resident(w3.shape), resident(b3.shape),
        ],
        out_specs=pl.BlockSpec((TB, OUT_PAD), lambda i: (i, 0)),
        compiler_params=pltpu.CompilerParams(
            dimension_semantics=("parallel",),
            vmem_limit_bytes=48 << 20,   # < 64 MiB physical VMEM on v7x
        ),
        cost_estimate=cost,
    )(x_p, w0, b0, w1, b1, w2, b2, w3, b3)

    return out[:B, :N_OUT]


def init_params(key):
    """PyTorch nn.Linear default init: U(-1/sqrt(fan_in), 1/sqrt(fan_in)).
    Weights stored pre-transposed (in_features, out_features); biases (1, out)."""
    dims = [(N_FEATURES, H0), (H0, H1), (H1, H2), (H2, N_OUT)]
    params = {}
    for i, (fan_in, fan_out) in enumerate(dims):
        key, kw, kb = jax.random.split(key, 3)
        bound = 1.0 / (fan_in ** 0.5)
        params[f"w{i}"] = jax.random.uniform(
            kw, (fan_in, fan_out), jnp.float32, -bound, bound)
        params[f"b{i}"] = jax.random.uniform(
            kb, (1, fan_out), jnp.float32, -bound, bound)
    return params


def reference_forward(x, params):
    h = x
    for i in range(3):
        h = h @ params[f"w{i}"] + params[f"b{i}"]
        h = jnp.where(h >= 0, h, 0.2 * h)
    y = h @ params["w3"] + params["b3"]
    return jnp.tanh(y)


if __name__ == "__main__":
    key = jax.random.PRNGKey(0)
    key, kx1, kx2 = jax.random.split(key, 3)
    params = init_params(key)
    prepped = prepare_params(params)

    # Tolerance loosened vs. the f32 version: matmul operands are bf16 on the
    # MXU while the reference is pure f32 (tanh output error ~1e-3).
    TOL = 2e-2

    # Small batch (single grid step).
    B1 = 8
    x1 = jax.random.normal(kx1, (B1, N_FEATURES), jnp.float32)
    out1 = jax.block_until_ready(generator_forward(x1, prepped))
    ref1 = reference_forward(x1, params)
    assert out1.shape == (B1, N_OUT), out1.shape
    assert jnp.allclose(out1, ref1, atol=TOL, rtol=0), \
        float(jnp.max(jnp.abs(out1 - ref1)))

    # Mid-size batch exercising a multi-step grid + batch padding/slicing.
    B2 = 48
    x2 = jax.random.normal(kx2, (B2, N_FEATURES), jnp.float32)
    out2 = jax.block_until_ready(generator_forward(x2, prepped))
    ref2 = reference_forward(x2, params)
    assert out2.shape == (B2, N_OUT), out2.shape
    assert jnp.allclose(out2, ref2, atol=TOL, rtol=0), \
        float(jnp.max(jnp.abs(out2 - ref2)))

    print("KERNEL_OK")
</pallas_src>

<mosaic_0001>
module attributes {stable_mosaic.version = 11 : i64} {
  func.func @generator_kernel(%arg0: i32, %arg1: memref<8x128xf32, #tpu.memory_space<vmem>>, %arg2: memref<128x256xbf16, #tpu.memory_space<vmem>>, %arg3: memref<1x256xf32, #tpu.memory_space<vmem>>, %arg4: memref<256x512xbf16, #tpu.memory_space<vmem>>, %arg5: memref<1x512xf32, #tpu.memory_space<vmem>>, %arg6: memref<512x1024xbf16, #tpu.memory_space<vmem>>, %arg7: memref<1x1024xf32, #tpu.memory_space<vmem>>, %arg8: memref<1024x896xbf16, #tpu.memory_space<vmem>>, %arg9: memref<1x896xf32, #tpu.memory_space<vmem>>, %arg10: memref<8x896xf32, #tpu.memory_space<vmem>>) attributes {dimension_semantics = [#tpu.dimension_semantics<parallel>], iteration_bounds = array<i64: 1>, scalar_prefetch = 0 : i64, scratch_operands = 0 : i64, tpu.core_type = #tpu.core_type<tc>, window_params = [{transform_indices = @transform_0, window_bounds = array<i64: 8, 128>}, {pipeline_mode = #tpu.pipeline_mode<synchronous>, transform_indices = @transform_1, window_bounds = array<i64: 128, 256>}, {pipeline_mode = #tpu.pipeline_mode<synchronous>, transform_indices = @transform_2, window_bounds = array<i64: 1, 256>}, {pipeline_mode = #tpu.pipeline_mode<synchronous>, transform_indices = @transform_3, window_bounds = array<i64: 256, 512>}, {pipeline_mode = #tpu.pipeline_mode<synchronous>, transform_indices = @transform_4, window_bounds = array<i64: 1, 512>}, {pipeline_mode = #tpu.pipeline_mode<synchronous>, transform_indices = @transform_5, window_bounds = array<i64: 512, 1024>}, {pipeline_mode = #tpu.pipeline_mode<synchronous>, transform_indices = @transform_6, window_bounds = array<i64: 1, 1024>}, {pipeline_mode = #tpu.pipeline_mode<synchronous>, transform_indices = @transform_7, window_bounds = array<i64: 1024, 896>}, {pipeline_mode = #tpu.pipeline_mode<synchronous>, transform_indices = @transform_8, window_bounds = array<i64: 1, 896>}, {transform_indices = @transform_9, window_bounds = array<i64: 8, 896>}]} {
    %c0 = arith.constant 0 : index
    %c0_0 = arith.constant 0 : index
    %0 = vector.load %arg1[%c0, %c0_0] : memref<8x128xf32, #tpu.memory_space<vmem>>, vector<8x128xf32>
    %1 = arith.truncf %0 : vector<8x128xf32> to vector<8x128xbf16>
    %c0_1 = arith.constant 0 : index
    %c0_2 = arith.constant 0 : index
    %2 = vector.load %arg2[%c0_1, %c0_2] : memref<128x256xbf16, #tpu.memory_space<vmem>>, vector<128x256xbf16>
    %cst = arith.constant dense<0.000000e+00> : vector<8x256xf32>
    %3 = tpu.matmul %1, %2, %cst {dimension_numbers = #tpu.dot_dimension_numbers<[1], [0], [0], [1], [0, 0, 1, 1], [], []>} : vector<8x128xbf16>, vector<128x256xbf16>, vector<8x256xf32> -> vector<8x256xf32>
    %c0_3 = arith.constant 0 : index
    %c0_4 = arith.constant 0 : index
    %4 = vector.load %arg3[%c0_3, %c0_4] : memref<1x256xf32, #tpu.memory_space<vmem>>, vector<1x256xf32>
    %5 = vector.broadcast %4 : vector<1x256xf32> to vector<8x256xf32>
    %6 = arith.addf %3, %5 : vector<8x256xf32>
    %cst_5 = arith.constant 0.000000e+00 : f32
    %7 = vector.broadcast %cst_5 : f32 to vector<8x256xf32>
    %8 = arith.cmpf oge, %6, %7 : vector<8x256xf32>
    %cst_6 = arith.constant 2.000000e-01 : f32
    %9 = vector.broadcast %cst_6 : f32 to vector<8x256xf32>
    %10 = arith.mulf %9, %6 : vector<8x256xf32>
    %11 = arith.select %8, %6, %10 : vector<8x256xi1>, vector<8x256xf32>
    %12 = arith.truncf %11 : vector<8x256xf32> to vector<8x256xbf16>
    %c0_7 = arith.constant 0 : index
    %c0_8 = arith.constant 0 : index
    %13 = vector.load %arg4[%c0_7, %c0_8] : memref<256x512xbf16, #tpu.memory_space<vmem>>, vector<256x512xbf16>
    %cst_9 = arith.constant dense<0.000000e+00> : vector<8x512xf32>
    %14 = tpu.matmul %12, %13, %cst_9 {dimension_numbers = #tpu.dot_dimension_numbers<[1], [0], [0], [1], [0, 0, 1, 1], [], []>} : vector<8x256xbf16>, vector<256x512xbf16>, vector<8x512xf32> -> vector<8x512xf32>
    %c0_10 = arith.constant 0 : index
    %c0_11 = arith.constant 0 : index
    %15 = vector.load %arg5[%c0_10, %c0_11] : memref<1x512xf32, #tpu.memory_space<vmem>>, vector<1x512xf32>
    %16 = vector.broadcast %15 : vector<1x512xf32> to vector<8x512xf32>
    %17 = arith.addf %14, %16 : vector<8x512xf32>
    %cst_12 = arith.constant 0.000000e+00 : f32
    %18 = vector.broadcast %cst_12 : f32 to vector<8x512xf32>
    %19 = arith.cmpf oge, %17, %18 : vector<8x512xf32>
    %cst_13 = arith.constant 2.000000e-01 : f32
    %20 = vector.broadcast %cst_13 : f32 to vector<8x512xf32>
    %21 = arith.mulf %20, %17 : vector<8x512xf32>
    %22 = arith.select %19, %17, %21 : vector<8x512xi1>, vector<8x512xf32>
    %23 = arith.truncf %22 : vector<8x512xf32> to vector<8x512xbf16>
    %c0_14 = arith.constant 0 : index
    %c0_15 = arith.constant 0 : index
    %24 = vector.load %arg6[%c0_14, %c0_15] : memref<512x1024xbf16, #tpu.memory_space<vmem>>, vector<512x1024xbf16>
    %cst_16 = arith.constant dense<0.000000e+00> : vector<8x1024xf32>
    %25 = tpu.matmul %23, %24, %cst_16 {dimension_numbers = #tpu.dot_dimension_numbers<[1], [0], [0], [1], [0, 0, 1, 1], [], []>} : vector<8x512xbf16>, vector<512x1024xbf16>, vector<8x1024xf32> -> vector<8x1024xf32>
    %c0_17 = arith.constant 0 : index
    %c0_18 = arith.constant 0 : index
    %26 = vector.load %arg7[%c0_17, %c0_18] : memref<1x1024xf32, #tpu.memory_space<vmem>>, vector<1x1024xf32>
    %27 = vector.broadcast %26 : vector<1x1024xf32> to vector<8x1024xf32>
    %28 = arith.addf %25, %27 : vector<8x1024xf32>
    %cst_19 = arith.constant 0.000000e+00 : f32
    %29 = vector.broadcast %cst_19 : f32 to vector<8x1024xf32>
    %30 = arith.cmpf oge, %28, %29 : vector<8x1024xf32>
    %cst_20 = arith.constant 2.000000e-01 : f32
    %31 = vector.broadcast %cst_20 : f32 to vector<8x1024xf32>
    %32 = arith.mulf %31, %28 : vector<8x1024xf32>
    %33 = arith.select %30, %28, %32 : vector<8x1024xi1>, vector<8x1024xf32>
    %34 = arith.truncf %33 : vector<8x1024xf32> to vector<8x1024xbf16>
    %c0_21 = arith.constant 0 : index
    %c0_22 = arith.constant 0 : index
    %35 = vector.load %arg8[%c0_21, %c0_22] : memref<1024x896xbf16, #tpu.memory_space<vmem>>, vector<1024x896xbf16>
    %cst_23 = arith.constant dense<0.000000e+00> : vector<8x896xf32>
    %36 = tpu.matmul %34, %35, %cst_23 {dimension_numbers = #tpu.dot_dimension_numbers<[1], [0], [0], [1], [0, 0, 1, 1], [], []>} : vector<8x1024xbf16>, vector<1024x896xbf16>, vector<8x896xf32> -> vector<8x896xf32>
    %c0_24 = arith.constant 0 : index
    %c0_25 = arith.constant 0 : index
    %37 = vector.load %arg9[%c0_24, %c0_25] : memref<1x896xf32, #tpu.memory_space<vmem>>, vector<1x896xf32>
    %38 = vector.broadcast %37 : vector<1x896xf32> to vector<8x896xf32>
    %39 = arith.addf %36, %38 : vector<8x896xf32>
    %40 = math.tanh %39 : vector<8x896xf32>
    %c0_26 = arith.constant 0 : index
    %c0_27 = arith.constant 0 : index
    %41 = vector.load %arg10[%c0_26, %c0_27] : memref<8x896xf32, #tpu.memory_space<vmem>>, vector<8x896xf32>
    tpu.vector_store %arg10[%c0_26, %c0_27], %40 {strides = array<i32>} : memref<8x896xf32, #tpu.memory_space<vmem>>, vector<8x896xf32>,
    return
  }
  func.func @transform_0(%arg0: i32) -> (i32, i32) {
    %c0_i32 = arith.constant 0 : i32
    %c0_i32_0 = arith.constant 0 : i32
    return %arg0, %c0_i32 : i32, i32
  }
  func.func @transform_1(%arg0: i32) -> (i32, i32) {
    %c0_i32 = arith.constant 0 : i32
    %c0_i32_0 = arith.constant 0 : i32
    %c0_i32_1 = arith.constant 0 : i32
    return %c0_i32, %c0_i32_0 : i32, i32
  }
  func.func @transform_2(%arg0: i32) -> (i32, i32) {
    %c0_i32 = arith.constant 0 : i32
    %c0_i32_0 = arith.constant 0 : i32
    %c0_i32_1 = arith.constant 0 : i32
    return %c0_i32, %c0_i32_0 : i32, i32
  }
  func.func @transform_3(%arg0: i32) -> (i32, i32) {
    %c0_i32 = arith.constant 0 : i32
    %c0_i32_0 = arith.constant 0 : i32
    %c0_i32_1 = arith.constant 0 : i32
    return %c0_i32, %c0_i32_0 : i32, i32
  }
  func.func @transform_4(%arg0: i32) -> (i32, i32) {
    %c0_i32 = arith.constant 0 : i32
    %c0_i32_0 = arith.constant 0 : i32
    %c0_i32_1 = arith.constant 0 : i32
    return %c0_i32, %c0_i32_0 : i32, i32
  }
  func.func @transform_5(%arg0: i32) -> (i32, i32) {
    %c0_i32 = arith.constant 0 : i32
    %c0_i32_0 = arith.constant 0 : i32
    %c0_i32_1 = arith.constant 0 : i32
    return %c0_i32, %c0_i32_0 : i32, i32
  }
  func.func @transform_6(%arg0: i32) -> (i32, i32) {
    %c0_i32 = arith.constant 0 : i32
    %c0_i32_0 = arith.constant 0 : i32
    %c0_i32_1 = arith.constant 0 : i32
    return %c0_i32, %c0_i32_0 : i32, i32
  }
  func.func @transform_7(%arg0: i32) -> (i32, i32) {
    %c0_i32 = arith.constant 0 : i32
    %c0_i32_0 = arith.constant 0 : i32
    %c0_i32_1 = arith.constant 0 : i32
    return %c0_i32, %c0_i32_0 : i32, i32
  }
  func.func @transform_8(%arg0: i32) -> (i32, i32) {
    %c0_i32 = arith.constant 0 : i32
    %c0_i32_0 = arith.constant 0 : i32
    %c0_i32_1 = arith.constant 0 : i32
    return %c0_i32, %c0_i32_0 : i32, i32
  }
  func.func @transform_9(%arg0: i32) -> (i32, i32) {
    %c0_i32 = arith.constant 0 : i32
    %c0_i32_0 = arith.constant 0 : i32
    return %arg0, %c0_i32 : i32, i32
  }
}

</mosaic_0001>

<bundles_post_ra>
// kernel: generator_forward.1
= control target key start
LH: loop header
LB: loop body
LE: loop exit
PB: predicated region body
PF: predicated region fallthrough
CT: control target
= control target key end

     0   :  { %14 = vsyncpa [#allocation3], 0  ;;  %s10952_s0 = inlined_call_operand.vmem [shape: f32[8,128], index: 0, kind: input, shape index: {}]   ;;  %s10953_s1 = inlined_call_operand.hbm [shape: bf16[128,256], index: 1, kind: input, shape index: {}]   ;;  %s10954_s2 = inlined_call_operand.hbm [shape: f32[1,256], index: 2, kind: input, shape index: {}]   ;;  %s10955_s3 = inlined_call_operand.hbm [shape: bf16[256,512], index: 3, kind: input, shape index: {}]   ;;  %s10956_s4 = inlined_call_operand.hbm [shape: f32[1,512], index: 4, kind: input, shape index: {}]   ;;  %s10957_s5 = inlined_call_operand.hbm [shape: bf16[512,1024], index: 5, kind: input, shape index: {}]   ;;  %s10958_s6 = inlined_call_operand.hbm [shape: f32[1,1024], index: 6, kind: input, shape index: {}]   ;;  %s10959_s7 = inlined_call_operand.hbm [shape: bf16[1024,896], index: 7, kind: input, shape index: {}]   ;;  %s10960_s8 = inlined_call_operand.hbm [shape: f32[1,896], index: 8, kind: input, shape index: {}]   ;;  %s10961_s9 = inlined_call_operand.hbm [shape: f32[8,896], index: 9, kind: output, shape index: {}]  }
   0x1   :  { %15 = vsyncpa [#allocation6], 0 }
   0x2   :  { %16 = vsyncpa [#allocation9], 0 }
   0x3   :  { %17 = vsyncpa [#allocation12], 0 }
   0x4   :  { %18 = vsyncpa [#allocation15], 0  ;;  %s40_s11 = sshll.u32 %s10954_s2, 4  ;;  %s41_s11 = int_to_ptr.hbm [resolvable:$true] %s40_s11 }
   0x5   :  { %19 = vsyncpa [#allocation4], 0  ;;  %s10581_s12 = smov [#allocation5]   ;;  %s64_s16 = sshll.u32 %s10956_s4, 4  ;;  %s65_s16 = int_to_ptr.hbm [resolvable:$true] %s64_s16 }
   0x6   :  { %s42_s13 = sshll.u32 %s10581_s12, 4  ;;  %s10582_s17 = smov [#allocation8]   ;;  %s43_s13 = int_to_ptr.vmem [resolvable:$true] %s42_s13 }
   0x7   :  { %45 = dma.hbm_to_vmem [thread:$0]  %s41_s11, 32, %s43_s13, [#allocation6]  }
   0x8   :  { %s66_s18 = sshll.u32 %s10582_s17, 4  ;;  %s88_s21 = sshll.u32 %s10958_s6, 4  ;;  %s67_s18 = int_to_ptr.vmem [resolvable:$true] %s66_s18  ;;  %s89_s21 = int_to_ptr.hbm [resolvable:$true] %s88_s21 }
   0x9   :  { %69 = dma.hbm_to_vmem [thread:$0]  %s65_s16, 64, %s67_s18, [#allocation9]  }
   0xa   :  { %s26_s23 = sshll.u32 %s10953_s1, 4  ;;  %s10583_s24 = smov [#allocation11]   ;;  %s27_s23 = int_to_ptr.hbm [resolvable:$true] %s26_s23 }
   0xb   :  { %s90_s25 = sshll.u32 %s10583_s24, 4  ;;  %s10584_s4 = smov [#allocation2]   ;;  %s91_s25 = int_to_ptr.vmem [resolvable:$true] %s90_s25 }
   0xc   :  { %93 = dma.hbm_to_vmem [thread:$0]  %s89_s21, 128, %s91_s25, [#allocation12]  }
   0xd   :  { %s28_s26 = sshll.u32 %s10584_s4, 4  ;;  %s10585_s27 = smov 128   ;;  %s29_s26 = int_to_ptr.vmem [resolvable:$true] %s28_s26 }
   0xe   :  { %s10586_s28 = smov 8   ;;  %s50_s30 = sshll.u32 %s10955_s3, 4  ;;  %s51_s30 = int_to_ptr.hbm [resolvable:$true] %s50_s30 }
   0xf   :  { %34 = dma.hbm_to_vmem [thread:$0]  %s27_s23, 2048, %s29_s26, [#allocation3], %s10585_s27, %s10585_s27, %s10586_s28  }
  0x10   :  { %s10587_s10 = smov [#allocation7]   ;;  %s74_s13 = sshll.u32 %s10957_s5, 4  ;;  %s75_s13 = int_to_ptr.hbm [resolvable:$true] %s74_s13 }
  0x11   :  { %s52_s11 = sshll.u32 %s10587_s10, 4  ;;  %s10588_s14 = smov 256   ;;  %s53_s11 = int_to_ptr.vmem [resolvable:$true] %s52_s11 }
  0x12   :  { %s10589_s15 = smov 16   ;;  %s10590_s16 = smov [#allocation10]  }
  0x13   :  { %58 = dma.hbm_to_vmem [thread:$0]  %s51_s30, 8192, %s53_s11, [#allocation6], %s10588_s14, %s10588_s14, %s10589_s15  }
  0x14   :  { %s76_s17 = sshll.u32 %s10590_s16, 4  ;;  %s10591_s18 = smov 512   ;;  %s77_s17 = int_to_ptr.vmem [resolvable:$true] %s76_s17 }
  0x15   :  { %s10592_s19 = smov 32   ;;  %s98_s21 = sshll.u32 %s10959_s7, 4  ;;  %s99_s21 = int_to_ptr.hbm [resolvable:$true] %s98_s21 }
  0x16   :  { %82 = dma.hbm_to_vmem [thread:$0]  %s75_s13, 32768, %s77_s17, [#allocation9], %s10591_s18, %s10591_s18, %s10592_s19  }
  0x17   :  { %s10593_s2 = smov [#allocation13]   ;;  %s112_s24 = sshll.u32 %s10960_s8, 4  ;;  %s113_s24 = int_to_ptr.hbm [resolvable:$true] %s112_s24 }
  0x18   :  { %s100_s22 = sshll.u32 %s10593_s2, 4  ;;  %s10594_s25 = smov 448   ;;  %s101_s22 = int_to_ptr.vmem [resolvable:$true] %s100_s22 }
  0x19   :  { %s10595_s4 = smov 28   ;;  %s10596_s26 = smov [#allocation14]  }
  0x1a   :  { %106 = dma.hbm_to_vmem [thread:$0]  %s99_s21, 57344, %s101_s22, [#allocation12], %s10594_s25, %s10594_s25, %s10595_s4  }
  0x1b   :  { %s114_s27 = sshll.u32 %s10596_s26, 4  ;;  %s115_s27 = int_to_ptr.vmem [resolvable:$true] %s114_s27 }
  0x1c   :  { %117 = dma.hbm_to_vmem [thread:$0]  %s113_s24, 112, %s115_s27, [#allocation15]  }
  0x1d   :  { %10569 = dma.done.wait [#allocation3], 2048  }
  0x1e   :  { %10570 = vsyncadd [#allocation3], 4294965248 }
  0x1f   :  { %10571 = dma.done.wait [#allocation6], 8224  }
  0x20   :  { %10572 = vsyncadd [#allocation6], 4294959072 }
  0x21   :  { %10573 = dma.done.wait [#allocation9], 32832  }
  0x22   :  { %10574 = vsyncadd [#allocation9], 4294934464 }
  0x23   :  { %10575 = dma.done.wait [#allocation12], 57472  }
  0x24   :  { %10576 = vsyncadd [#allocation12], 4294909824 }
  0x25   :  { %10577 = dma.done.wait [#allocation15], 112  }
  0x26   :  { %10578 = vsyncadd [#allocation15], 4294967184  ;;  %v6457_v0 = vld [vmem:[#allocation2 + $0x70] sm:$0xf]  ;;  %v9550_v1 = vld [vmem:[#allocation2 + $0x74] sm:$0xf0] }
  0x27   :  { %v9549_v2 = vld [vmem:[#allocation2 + $0x74] sm:$0xf]  ;;  %v6458_v3 = vor.u32 %v9550_v1, %v6457_v0  ;;  %v6459_v4 = vld [vmem:[#allocation2 + $0x78] sm:$0xf0]  ;;  %v6449_v5 = vld [vmem:[#allocation2 + $0x60] sm:$0xf] }
  0x28   :  { %v9548_v6 = vld [vmem:[#allocation2 + $0x64] sm:$0xf0]  ;;  %v6462_v7 = vor.u32 %v9549_v2, %v6459_v4  ;;  %v9547_v8 = vld [vmem:[#allocation2 + $0x64] sm:$0xf]  ;;  %v6451_v9 = vld [vmem:[#allocation2 + $0x68] sm:$0xf0] }
  0x29   :  { %254 = vmatpush.bf16.msra.mxu0 %v6458_v3  ;;  %v6450_v10 = vor.u32 %v9548_v6, %v6449_v5  ;;  %v6454_v11 = vor.u32 %v9547_v8, %v6451_v9  ;;  %v6441_v12 = vld [vmem:[#allocation2 + $0x50] sm:$0xf]  ;;  %v9546_v13 = vld [vmem:[#allocation2 + $0x54] sm:$0xf0]  ;;  %v9545_v14 = vld [vmem:[#allocation2 + $0x54] sm:$0xf] }
  0x2a   :  { %267 = vmatpush.bf16.msra.mxu1 %v6462_v7  ;;  %v6443_v15 = vld [vmem:[#allocation2 + $0x58] sm:$0xf0]  ;;  %v6442_v16 = vor.u32 %v9546_v13, %v6441_v12  ;;  %v6433_v18 = vld [vmem:[#allocation2 + $0x40] sm:$0xf]  ;;  %v9544_v19 = vld [vmem:[#allocation2 + $0x44] sm:$0xf0] }
  0x2b   :  { %v6446_v17 = vor.u32 %v9545_v14, %v6443_v15  ;;  %v9543_v20 = vld [vmem:[#allocation2 + $0x44] sm:$0xf]  ;;  %v6435_v21 = vld [vmem:[#allocation2 + $0x48] sm:$0xf0]  ;;  %v6434_v22 = vor.u32 %v9544_v19, %v6433_v18  ;;  %v9581_v24 = vld [vmem:[#allocation7 + $0xec] sm:$0xf0] }
  0x2c   :  { %v6577_v23 = vld [vmem:[#allocation7 + $0xe0] sm:$0xf]  ;;  %v6438_v26 = vor.u32 %v9543_v20, %v6435_v21  ;;  %v6425_v27 = vld [vmem:[#allocation2 + $0x30] sm:$0xf]  ;;  %v9542_v28 = vld [vmem:[#allocation2 + $0x34] sm:$0xf0] }
  0x2d   :  { %255 = vmatpush.bf16.msra.mxu0 %v6450_v10  ;;  %v6705_v25 = vld [vmem:[#allocation7 + $0x1e0] sm:$0xf]  ;;  %v6578_v29 = vor.u32 %v9581_v24, %v6577_v23  ;;  %v9613_v30 = vld [vmem:[#allocation7 + $0x1ec] sm:$0xf0]  ;;  %v6427_v32 = vld [vmem:[#allocation2 + $0x38] sm:$0xf0]  ;;  %v6426_v38 = vor.u32 %v9542_v28, %v6425_v27 }
  0x2e   :  { %268 = vmatpush.bf16.msra.mxu1 %v6454_v11  ;;  %v9541_v31 = vld [vmem:[#allocation2 + $0x34] sm:$0xf]  ;;  %v6706_v33 = vor.u32 %v9613_v30, %v6705_v25  ;;  %v6561_v34 = vld [vmem:[#allocation7 + $0xc0] sm:$0xf]  ;;  %v9540_v40 = vld [vmem:[#allocation2 + $0x24] sm:$0xf0] }
  0x2f   :  { %682 = vmatpush.bf16.msra.mxu2 %v6578_v29  ;;  %v9577_v35 = vld [vmem:[#allocation7 + $0xcc] sm:$0xf0]  ;;  %v6689_v36 = vld [vmem:[#allocation7 + $0x1c0] sm:$0xf]  ;;  %v6430_v43 = vor.u32 %v9541_v31, %v6427_v32  ;;  %v6419_v47 = vld [vmem:[#allocation2 + $0x28] sm:$0xf0] }
  0x30   :  { %v9609_v37 = vld [vmem:[#allocation7 + $0x1cc] sm:$0xf0]  ;;  %v6417_v39 = vld [vmem:[#allocation2 + $0x20] sm:$0xf]  ;;  %695 = vmatpush.bf16.msra.mxu3 %v6706_v33  ;;  %v6562_v41 = vor.u32 %v9577_v35, %v6561_v34  ;;  %v9539_v44 = vld [vmem:[#allocation2 + $0x24] sm:$0xf] }
  0x31   :  { %256 = vmatpush.bf16.msra.mxu0 %v6442_v16  ;;  %v6690_v42 = vor.u32 %v9609_v37, %v6689_v36  ;;  %v6545_v45 = vld [vmem:[#allocation7 + $0xa0] sm:$0xf]  ;;  %v9573_v46 = vld [vmem:[#allocation7 + $0xac] sm:$0xf0]  ;;  %v6418_v51 = vor.u32 %v9540_v40, %v6417_v39  ;;  %v6422_v56 = vor.u32 %v9539_v44, %v6419_v47  ;;  %v9538_v57 = vld [vmem:[#allocation2 + $0x14] sm:$0xf0] }
  0x32   :  { %269 = vmatpush.bf16.msra.mxu1 %v6446_v17  ;;  %v6673_v48 = vld [vmem:[#allocation7 + $0x1a0] sm:$0xf]  ;;  %v9605_v49 = vld [vmem:[#allocation7 + $0x1ac] sm:$0xf0]  ;;  %v6546_v50 = vor.u32 %v9573_v46, %v6545_v45  ;;  %v6411_v61 = vld [vmem:[#allocation2 + $0x18] sm:$0xf0] }
  0x33   :  { %683 = vmatpush.bf16.msra.mxu2 %v6562_v41  ;;  %v6409_v52 = vld [vmem:[#allocation2 + $0x10] sm:$0xf]  ;;  %v6674_v53 = vor.u32 %v9605_v49, %v6673_v48  ;;  %v6529_v54 = vld [vmem:[#allocation7 + $0x80] sm:$0xf]  ;;  %v9537_v60 = vld [vmem:[#allocation2 + $0x14] sm:$0xf] }
  0x34   :  { %696 = vmatpush.bf16.msra.mxu3 %v6690_v42  ;;  %v9569_v55 = vld [vmem:[#allocation7 + $0x8c] sm:$0xf0]  ;;  %v6657_v58 = vld [vmem:[#allocation7 + $0x180] sm:$0xf]  ;;  %v6410_v0 = vor.u32 %v9538_v57, %v6409_v52  ;;  %v9536_v1 = vld [vmem:[#allocation2 + $0x4] sm:$0xf0]  ;;  %v6414_v5 = vor.u32 %v9537_v60, %v6411_v61 }
  0x35   :  { %257 = vmatpush.bf16.msra.mxu0 %v6434_v22  ;;  %v9601_v59 = vld [vmem:[#allocation7 + $0x18c] sm:$0xf0]  ;;  %v6401_v62 = vld [vmem:[#allocation2] sm:$0xf]  ;;  %v6530_v63 = vor.u32 %v9569_v55, %v6529_v54  ;;  %v9535_v6 = vld [vmem:[#allocation2 + $0x4] sm:$0xf] }
  0x36   :  { %270 = vmatpush.bf16.msra.mxu1 %v6438_v26  ;;  %v6658_v2 = vor.u32 %v9601_v59, %v6657_v58  ;;  %v6513_v3 = vld [vmem:[#allocation7 + $0x60] sm:$0xf]  ;;  %v9565_v4 = vld [vmem:[#allocation7 + $0x6c] sm:$0xf0]  ;;  %v6403_v9 = vld [vmem:[#allocation2 + $0x8] sm:$0xf0]  ;;  %v6402_v15 = vor.u32 %v9536_v1, %v6401_v62 }
  0x37   :  { %684 = vmatpush.bf16.msra.mxu2 %v6546_v50  ;;  %v6641_v7 = vld [vmem:[#allocation7 + $0x160] sm:$0xf]  ;;  %v9597_v8 = vld [vmem:[#allocation7 + $0x16c] sm:$0xf0]  ;;  %v9579_v10 = vld [vmem:[#allocation7 + $0xe4] sm:$0xf]  ;;  %v6514_v14 = vor.u32 %v9565_v4, %v6513_v3  ;;  %v6406_v20 = vor.u32 %v9535_v6, %v6403_v9 }
  0x38   :  { %697 = vmatpush.bf16.msra.mxu3 %v6674_v53  ;;  %v6579_v11 = vld [vmem:[#allocation7 + $0xf0] sm:$0xf0]  ;;  %v9611_v12 = vld [vmem:[#allocation7 + $0x1e4] sm:$0xf]  ;;  %v6642_v17 = vor.u32 %v9597_v8, %v6641_v7  ;;  %v6497_v18 = vld [vmem:[#allocation7 + $0x40] sm:$0xf] }
  0x39   :  { %258 = vmatpush.bf16.msra.mxu0 %v6426_v38  ;;  %v6707_v13 = vld [vmem:[#allocation7 + $0x1f0] sm:$0xf0]  ;;  %v150_v16 = vld [vmem:[%s10952_s0] sm:$0xff]  ;;  %v9561_v19 = vld [vmem:[#allocation7 + $0x4c] sm:$0xf0]  ;;  %v6582_v21 = vor.u32 %v9579_v10, %v6579_v11  ;;  %s10597_s0 = smov [#allocation16]  }
  0x3a   :  { %271 = vmatpush.bf16.msra.mxu1 %v6430_v43  ;;  %v6625_v22 = vld [vmem:[#allocation7 + $0x140] sm:$0xf]  ;;  %v9593_v23 = vld [vmem:[#allocation7 + $0x14c] sm:$0xf0]  ;;  %v6710_v24 = vor.u32 %v9611_v12, %v6707_v13  ;;  %v9575_v25 = vld [vmem:[#allocation7 + $0xc4] sm:$0xf]  ;;  %v151_v27 = vpack.c.bf16 %v150_v16, %v150_v16  ;;  %v6498_v30 = vor.u32 %v9561_v19, %v6497_v18 }
  0x3b   :  { %685 = vmatpush.bf16.msra.mxu2 %v6530_v63  ;;  %v6563_v26 = vld [vmem:[#allocation7 + $0xd0] sm:$0xf0]  ;;  %v9607_v28 = vld [vmem:[#allocation7 + $0x1c4] sm:$0xf]  ;;  %v6626_v31 = vor.u32 %v9593_v23, %v6625_v22  ;;  %v6481_v32 = vld [vmem:[#allocation7 + $0x20] sm:$0xf] }
  0x3c   :  { %698 = vmatpush.bf16.msra.mxu3 %v6658_v2  ;;  %v6691_v29 = vld [vmem:[#allocation7 + $0x1d0] sm:$0xf0]  ;;  %v9557_v33 = vld [vmem:[#allocation7 + $0x2c] sm:$0xf0]  ;;  %v6566_v34 = vor.u32 %v9575_v25, %v6563_v26  ;;  %v6609_v35 = vld [vmem:[#allocation7 + $0x120] sm:$0xf] }
  0x3d   :  { %259 = vmatpush.bf16.msra.mxu0 %v6418_v51  ;;  %v9589_v36 = vld [vmem:[#allocation7 + $0x12c] sm:$0xf0]  ;;  %v6694_v37 = vor.u32 %v9607_v28, %v6691_v29  ;;  %v9571_v38 = vld [vmem:[#allocation7 + $0xa4] sm:$0xf]  ;;  %v6547_v39 = vld [vmem:[#allocation7 + $0xb0] sm:$0xf0]  ;;  %v6482_v42 = vor.u32 %v9557_v33, %v6481_v32 }
  0x3e   :  { %272 = vmatpush.bf16.msra.mxu1 %v6422_v56  ;;  %v9603_v40 = vld [vmem:[#allocation7 + $0x1a4] sm:$0xf]  ;;  %v6675_v41 = vld [vmem:[#allocation7 + $0x1b0] sm:$0xf0]  ;;  %v6610_v44 = vor.u32 %v9589_v36, %v6609_v35  ;;  %v6465_v45 = vld [vmem:[#allocation7] sm:$0xf]  ;;  %v6550_v48 = vor.u32 %v9571_v38, %v6547_v39 }
  0x3f   :  { %686 = vmatpush.bf16.msra.mxu2 %v6514_v14  ;;  %v9567_v43 = vld [vmem:[#allocation7 + $0x84] sm:$0xf]  ;;  %v9553_v46 = vld [vmem:[#allocation7 + $0xc] sm:$0xf0]  ;;  %v6593_v47 = vld [vmem:[#allocation7 + $0x100] sm:$0xf]  ;;  %v6678_v52 = vor.u32 %v9603_v40, %v6675_v41 }
  0x40   :  { %699 = vmatpush.bf16.msra.mxu3 %v6642_v17  ;;  %v9585_v49 = vld [vmem:[#allocation7 + $0x10c] sm:$0xf0]  ;;  %v6585_v50 = vld [vmem:[#allocation7 + $0xe8] sm:$0xf]  ;;  %v9582_v51 = vld [vmem:[#allocation7 + $0xf4] sm:$0xf0]  ;;  %v6466_v58 = vor.u32 %v9553_v46, %v6465_v45 }
  0x41   :  { %260 = vmatpush.bf16.msra.mxu0 %v6410_v0  ;;  %v6531_v53 = vld [vmem:[#allocation7 + $0x90] sm:$0xf0]  ;;  %v6713_v54 = vld [vmem:[#allocation7 + $0x1e8] sm:$0xf]  ;;  %v9614_v55 = vld [vmem:[#allocation7 + $0x1f4] sm:$0xf0]  ;;  %v6594_v59 = vor.u32 %v9585_v49, %v6593_v47  ;;  %v6586_v60 = vor.u32 %v9582_v51, %v6585_v50 }
  0x42   :  { %273 = vmatpush.bf16.msra.mxu1 %v6414_v5  ;;  %v9599_v56 = vld [vmem:[#allocation7 + $0x184] sm:$0xf]  ;;  %v6659_v57 = vld [vmem:[#allocation7 + $0x190] sm:$0xf0]  ;;  %v6534_v61 = vor.u32 %v9567_v43, %v6531_v53  ;;  %v6714_v63 = vor.u32 %v9614_v55, %v6713_v54  ;;  %v6569_v0 = vld [vmem:[#allocation7 + $0xc8] sm:$0xf] }
  0x43   :  { %687 = vmatpush.bf16.msra.mxu2 %v6498_v30  ;;  %v9563_v62 = vld [vmem:[#allocation7 + $0x64] sm:$0xf]  ;;  %v9578_v1 = vld [vmem:[#allocation7 + $0xd4] sm:$0xf0]  ;;  %v6662_v2 = vor.u32 %v9599_v56, %v6659_v57  ;;  %v6515_v3 = vld [vmem:[#allocation7 + $0x70] sm:$0xf0] }
  0x44   :  { %700 = vmatpush.bf16.msra.mxu3 %v6626_v31  ;;  %v6697_v4 = vld [vmem:[#allocation7 + $0x1c8] sm:$0xf]  ;;  %v9610_v5 = vld [vmem:[#allocation7 + $0x1d4] sm:$0xf0]  ;;  %v9595_v6 = vld [vmem:[#allocation7 + $0x164] sm:$0xf]  ;;  %v6570_v8 = vor.u32 %v9578_v1, %v6569_v0  ;;  %v6518_v9 = vor.u32 %v9563_v62, %v6515_v3 }
  0x45   :  { %261 = vmatpush.bf16.msra.mxu0 %v6402_v15  ;;  %v6643_v7 = vld [vmem:[#allocation7 + $0x170] sm:$0xf0]  ;;  %v6698_v10 = vor.u32 %v9610_v5, %v6697_v4  ;;  %v9559_v12 = vld [vmem:[#allocation7 + $0x44] sm:$0xf]  ;;  %v9580_v28 = vld [vmem:[#allocation7 + $0xec] sm:$0xf] }
  0x46   :  { %274 = vmatpush.bf16.msra.mxu1 %v6406_v20  ;;  %v6646_v11 = vor.u32 %v9595_v6, %v6643_v7  ;;  %v6499_v13 = vld [vmem:[#allocation7 + $0x50] sm:$0xf0]  ;;  %v9591_v14 = vld [vmem:[#allocation7 + $0x144] sm:$0xf]  ;;  %v6587_v29 = vld [vmem:[#allocation7 + $0xf8] sm:$0xf0] }
  0x47   :  { %688 = vmatpush.bf16.msra.mxu2 %v6482_v42  ;;  %v6627_v15 = vld [vmem:[#allocation7 + $0x150] sm:$0xf0]  ;;  %v6502_v16 = vor.u32 %v9559_v12, %v6499_v13  ;;  %v9555_v18 = vld [vmem:[#allocation7 + $0x24] sm:$0xf]  ;;  %v9612_v30 = vld [vmem:[#allocation7 + $0x1ec] sm:$0xf] }
  0x48   :  { %262 = vmatmul.bf16.vlgmr.msra.gmra.mxu0 %v151_v27  ;;  %701 = vmatpush.bf16.msra.mxu3 %v6610_v44  ;;  %v6630_v17 = vor.u32 %v9591_v14, %v6627_v15  ;;  %v6483_v19 = vld [vmem:[#allocation7 + $0x30] sm:$0xf0]  ;;  %v9587_v20 = vld [vmem:[#allocation7 + $0x124] sm:$0xf]  ;;  %v6715_v31 = vld [vmem:[#allocation7 + $0x1f8] sm:$0xf0] }
  0x49   :  { %708 = vmatpush.bf16.msrb.mxu0 %v6582_v21  ;;  %275 = vmatmul.bf16.vlgmr.msra.gmra.mxu1 %v151_v27  ;;  %v6611_v21 = vld [vmem:[#allocation7 + $0x130] sm:$0xf0]  ;;  %v6486_v22 = vor.u32 %v9555_v18, %v6483_v19  ;;  %v9583_v26 = vld [vmem:[#allocation7 + $0x104] sm:$0xf]  ;;  %v6718_v35 = vor.u32 %v9612_v30, %v6715_v31  ;;  %v9576_v36 = vld [vmem:[#allocation7 + $0xcc] sm:$0xf] }
  0x4a   :  { %721 = vmatpush.bf16.msrb.mxu1 %v6710_v24  ;;  %v6614_v23 = vor.u32 %v9587_v20, %v6611_v21  ;;  %v9551_v24 = vld [vmem:[#allocation7 + $0x4] sm:$0xf]  ;;  %v6467_v25 = vld [vmem:[#allocation7 + $0x10] sm:$0xf0]  ;;  %v9608_v38 = vld [vmem:[#allocation7 + $0x1cc] sm:$0xf] }
  0x4b   :  { %689 = vmatpush.bf16.msra.mxu2 %v6466_v58  ;;  %v6595_v27 = vld [vmem:[#allocation7 + $0x110] sm:$0xf0]  ;;  %v6470_v32 = vor.u32 %v9551_v24, %v6467_v25  ;;  %v6699_v39 = vld [vmem:[#allocation7 + $0x1d8] sm:$0xf0]  ;;  %v6553_v42 = vld [vmem:[#allocation7 + $0xa8] sm:$0xf] }
  0x4c   :  { %702 = vmatpush.bf16.msra.mxu3 %v6594_v59  ;;  %v6598_v33 = vor.u32 %v9583_v26, %v6595_v27  ;;  %v6702_v41 = vor.u32 %v9608_v38, %v6699_v39  ;;  %v9574_v43 = vld [vmem:[#allocation7 + $0xb4] sm:$0xf0]  ;;  %v6681_v44 = vld [vmem:[#allocation7 + $0x1a8] sm:$0xf]  ;;  %v9572_v47 = vld [vmem:[#allocation7 + $0xac] sm:$0xf] }
  0x4d   :  { %709 = vmatpush.bf16.msrb.mxu0 %v6566_v34  ;;  %v6590_v34 = vor.u32 %v9580_v28, %v6587_v29  ;;  %v6554_v45 = vor.u32 %v9574_v43, %v6553_v42  ;;  %v9606_v46 = vld [vmem:[#allocation7 + $0x1b4] sm:$0xf0]  ;;  %v6555_v49 = vld [vmem:[#allocation7 + $0xb8] sm:$0xf0]  ;;  %v9604_v50 = vld [vmem:[#allocation7 + $0x1ac] sm:$0xf] }
  0x4e   :  { %722 = vmatpush.bf16.msrb.mxu1 %v6694_v37  ;;  %v6571_v37 = vld [vmem:[#allocation7 + $0xd8] sm:$0xf0]  ;;  %v6537_v54 = vld [vmem:[#allocation7 + $0x88] sm:$0xf]  ;;  %v9570_v55 = vld [vmem:[#allocation7 + $0x94] sm:$0xf0] }
  0x4f   :  { %734 = vmatpush.bf16.msrb.mxu2 %v6586_v60  ;;  %v6574_v40 = vor.u32 %v9576_v36, %v6571_v37  ;;  %v6683_v51 = vld [vmem:[#allocation7 + $0x1b8] sm:$0xf0]  ;;  %v6665_v56 = vld [vmem:[#allocation7 + $0x188] sm:$0xf]  ;;  %v6538_v57 = vor.u32 %v9570_v55, %v6537_v54  ;;  %v9602_v58 = vld [vmem:[#allocation7 + $0x194] sm:$0xf0] }
  0x50   :  { %747 = vmatpush.bf16.msrb.mxu3 %v6714_v63  ;;  %v6686_v53 = vor.u32 %v9604_v50, %v6683_v51  ;;  %v9568_v59 = vld [vmem:[#allocation7 + $0x8c] sm:$0xf]  ;;  %v6539_v60 = vld [vmem:[#allocation7 + $0x98] sm:$0xf0]  ;;  %v9566_v3 = vld [vmem:[#allocation7 + $0x74] sm:$0xf0] }
  0x51   :  { %710 = vmatpush.bf16.msrb.mxu0 %v6550_v48  ;;  %v6682_v48 = vor.u32 %v9606_v46, %v6681_v44  ;;  %v6542_v62 = vor.u32 %v9568_v59, %v6539_v60  ;;  %v9600_v63 = vld [vmem:[#allocation7 + $0x18c] sm:$0xf]  ;;  %v6667_v0 = vld [vmem:[#allocation7 + $0x198] sm:$0xf0]  ;;  %v6649_v4 = vld [vmem:[#allocation7 + $0x168] sm:$0xf] }
  0x52   :  { %723 = vmatpush.bf16.msrb.mxu1 %v6678_v52  ;;  %v6558_v52 = vor.u32 %v9572_v47, %v6555_v49  ;;  %v6670_v1 = vor.u32 %v9600_v63, %v6667_v0  ;;  %v9598_v6 = vld [vmem:[#allocation7 + $0x174] sm:$0xf0]  ;;  %v9564_v7 = vld [vmem:[#allocation7 + $0x6c] sm:$0xf]  ;;  %v6651_v12 = vld [vmem:[#allocation7 + $0x178] sm:$0xf0] }
  0x53   :  { %735 = vmatpush.bf16.msrb.mxu2 %v6570_v8  ;;  %v6523_v8 = vld [vmem:[#allocation7 + $0x78] sm:$0xf0]  ;;  %v6505_v13 = vld [vmem:[#allocation7 + $0x48] sm:$0xf]  ;;  %v9562_v15 = vld [vmem:[#allocation7 + $0x54] sm:$0xf0] }
  0x54   :  { %748 = vmatpush.bf16.msrb.mxu3 %v6698_v10  ;;  %v6526_v10 = vor.u32 %v9564_v7, %v6523_v8  ;;  %v6506_v18 = vor.u32 %v9562_v15, %v6505_v13  ;;  %v9560_v20 = vld [vmem:[#allocation7 + $0x4c] sm:$0xf]  ;;  %v6507_v21 = vld [vmem:[#allocation7 + $0x58] sm:$0xf0]  ;;  %v6489_v25 = vld [vmem:[#allocation7 + $0x28] sm:$0xf] }
  0x55   :  { %711 = vmatpush.bf16.msrb.mxu0 %v6534_v61  ;;  %v6666_v61 = vor.u32 %v9602_v58, %v6665_v56  ;;  %v6635_v24 = vld [vmem:[#allocation7 + $0x158] sm:$0xf0]  ;;  %v9558_v26 = vld [vmem:[#allocation7 + $0x34] sm:$0xf0]  ;;  %v6617_v28 = vld [vmem:[#allocation7 + $0x128] sm:$0xf] }
  0x56   :  { %724 = vmatpush.bf16.msrb.mxu1 %v6662_v2  ;;  %v6521_v2 = vld [vmem:[#allocation7 + $0x68] sm:$0xf]  ;;  %v9590_v29 = vld [vmem:[#allocation7 + $0x134] sm:$0xf0]  ;;  %v9556_v30 = vld [vmem:[#allocation7 + $0x2c] sm:$0xf]  ;;  %v6490_v31 = vor.u32 %v9558_v26, %v6489_v25 }
  0x57   :  { %736 = vmatpush.bf16.msrb.mxu2 %v6554_v45  ;;  %v6522_v5 = vor.u32 %v9566_v3, %v6521_v2  ;;  %v6473_v36 = vld [vmem:[#allocation7 + $0x8] sm:$0xf]  ;;  %v9554_v37 = vld [vmem:[#allocation7 + $0x14] sm:$0xf0]  ;;  %v9552_v42 = vld [vmem:[#allocation7 + $0xc] sm:$0xf] }
  0x58   :  { %749 = vmatpush.bf16.msrb.mxu3 %v6682_v48  ;;  %v6475_v43 = vld [vmem:[#allocation7 + $0x18] sm:$0xf0]  ;;  %v9584_v44 = vld [vmem:[#allocation7 + $0x10c] sm:$0xf]  ;;  %v6474_v46 = vor.u32 %v9554_v37, %v6473_v36  ;;  %v7201_v56 = vld [vmem:[#allocation10 + $0x3c0] sm:$0xf] }
  0x59   :  { %712 = vmatpush.bf16.msrb.mxu0 %v6518_v9  ;;  %v6650_v9 = vor.u32 %v9598_v6, %v6649_v4  ;;  %v6603_v45 = vld [vmem:[#allocation7 + $0x118] sm:$0xf0]  ;;  %v6478_v48 = vor.u32 %v9552_v42, %v6475_v43  ;;  %v6945_v58 = vld [vmem:[#allocation10 + $0x1c0] sm:$0xf]  ;;  %s6383_s28 = sshll.u32 %s10597_s0, 4  ;;  %s6385_s30 = sshll.u32 %s10961_s9, 4  ;;  %s6384_s28 = int_to_ptr.vmem [resolvable:$true] %s6383_s28  ;;  %s6386_s30 = int_to_ptr.hbm [resolvable:$true] %s6385_s30 }
  0x5a   :  { %725 = vmatpush.bf16.msrb.mxu1 %v6646_v11  ;;  %v9596_v11 = vld [vmem:[#allocation7 + $0x16c] sm:$0xf]  ;;  %v6606_v49 = vor.u32 %v9584_v44, %v6603_v45  ;;  %v168_v50 = vld [vmem:[#allocation5] sm:$0x3]  ;;  %v9675_v60 = vld [vmem:[#allocation10 + $0x1dc] sm:$0xf0] }
  0x5b   :  { %737 = vmatpush.bf16.msrb.mxu2 %v6538_v57  ;;  %v6654_v14 = vor.u32 %v9596_v11, %v6651_v12  ;;  %v170_v51 = vperm.slane %v168_v50, 0  ;;  %v9739_v57 = vld [vmem:[#allocation10 + $0x3dc] sm:$0xf0] }
  0x5c   :  { %750 = vmatpush.bf16.msrb.mxu3 %v6666_v61  ;;  %v7713_v61 = vld [vmem:[#allocation10 + $0x7c0] sm:$0xf]  ;;  %v7202_v6 = vor.u32 %v9739_v57, %v7201_v56 }
  0x5d   :  { %713 = vmatpush.bf16.msrb.mxu0 %v6502_v16  ;;  %v6633_v16 = vld [vmem:[#allocation7 + $0x148] sm:$0xf]  ;;  %v7457_v0 = vld [vmem:[#allocation10 + $0x5c0] sm:$0xf] }
  0x5e   :  { %726 = vmatpush.bf16.msrb.mxu1 %v6630_v17  ;;  %v9594_v17 = vld [vmem:[#allocation7 + $0x154] sm:$0xf0]  ;;  %v9803_v2 = vld [vmem:[#allocation10 + $0x5dc] sm:$0xf0] }
  0x5f   :  { %738 = vmatpush.bf16.msrb.mxu2 %v6522_v5  ;;  %v6634_v19 = vor.u32 %v9594_v17, %v6633_v16  ;;  %v7169_v7 = vld [vmem:[#allocation10 + $0x380] sm:$0xf]  ;;  %v7458_v15 = vor.u32 %v9803_v2, %v7457_v0 }
  0x60   :  { %751 = vmatpush.bf16.msrb.mxu3 %v6650_v9  ;;  %v9731_v8 = vld [vmem:[#allocation10 + $0x39c] sm:$0xf0]  ;;  %v6946_v9 = vor.u32 %v9675_v60, %v6945_v58 }
  0x61   :  { %714 = vmatpush.bf16.msrb.mxu0 %v6486_v22  ;;  %v9592_v22 = vld [vmem:[#allocation7 + $0x14c] sm:$0xf]  ;;  %v6913_v11 = vld [vmem:[#allocation10 + $0x180] sm:$0xf] }
  0x62   :  { %727 = vmatpush.bf16.msrb.mxu1 %v6614_v23  ;;  %v6510_v23 = vor.u32 %v9560_v20, %v6507_v21  ;;  %v6638_v27 = vor.u32 %v9592_v22, %v6635_v24  ;;  %v9667_v12 = vld [vmem:[#allocation10 + $0x19c] sm:$0xf0]  ;;  %v7170_v21 = vor.u32 %v9731_v8, %v7169_v7 }
  0x63   :  { %739 = vmatpush.bf16.msrb.mxu2 %v6506_v18  ;;  %v9859_v17 = vld [vmem:[#allocation10 + $0x79c] sm:$0xf0]  ;;  %v6914_v24 = vor.u32 %v9667_v12, %v6913_v11 }
  0x64   :  { %752 = vmatpush.bf16.msrb.mxu3 %v6634_v19  ;;  %v7425_v18 = vld [vmem:[#allocation10 + $0x580] sm:$0xf] }
  0x65   :  { %715 = vmatpush.bf16.msrb.mxu0 %v6470_v32  ;;  %v6491_v32 = vld [vmem:[#allocation7 + $0x38] sm:$0xf0]  ;;  %v9795_v19 = vld [vmem:[#allocation10 + $0x59c] sm:$0xf0] }
  0x66   :  { %728 = vmatpush.bf16.msrb.mxu1 %v6598_v33  ;;  %v9588_v33 = vld [vmem:[#allocation7 + $0x12c] sm:$0xf]  ;;  %v6494_v38 = vor.u32 %v9556_v30, %v6491_v32  ;;  %v7137_v22 = vld [vmem:[#allocation10 + $0x340] sm:$0xf] }
  0x67   :  { %740 = vmatpush.bf16.msrb.mxu2 %v6490_v31  ;;  %v6881_v25 = vld [vmem:[#allocation10 + $0x140] sm:$0xf] }
  0x68   :  { %v9659_v26 = vld [vmem:[#allocation10 + $0x15c] sm:$0xf0] }
  0x69   :  { %760 = vmatpush.bf16.msra.mxu0 %v6590_v34  ;;  %v6619_v34 = vld [vmem:[#allocation7 + $0x138] sm:$0xf0]  ;;  %v9851_v30 = vld [vmem:[#allocation10 + $0x75c] sm:$0xf0]  ;;  %v6882_v36 = vor.u32 %v9659_v26, %v6881_v25  ;;  %v7203_v26 = vld [vmem:[#allocation10 + $0x3e0] sm:$0xf0] }
  0x6a   :  { %773 = vmatpush.bf16.msra.mxu1 %v6718_v35  ;;  %v6618_v35 = vor.u32 %v9590_v29, %v6617_v28  ;;  %v6622_v39 = vor.u32 %v9588_v33, %v6619_v34  ;;  %v7649_v28 = vld [vmem:[#allocation10 + $0x740] sm:$0xf]  ;;  %v7426_v29 = vor.u32 %v9795_v19, %v7425_v18 }
  0x6b   :  { %741 = vmatpush.bf16.msrb.mxu2 %v6474_v46  ;;  %v7393_v31 = vld [vmem:[#allocation10 + $0x540] sm:$0xf] }
  0x6c   :  { %753 = vmatpush.bf16.msrb.mxu3 %v6618_v35  ;;  %v9787_v32 = vld [vmem:[#allocation10 + $0x55c] sm:$0xf0] }
  0x6d   :  { %761 = vmatpush.bf16.msra.mxu0 %v6574_v40  ;;  %v6601_v40 = vld [vmem:[#allocation7 + $0x108] sm:$0xf]  ;;  %v7105_v34 = vld [vmem:[#allocation10 + $0x300] sm:$0xf] }
  0x6e   :  { %774 = vmatpush.bf16.msra.mxu1 %v6702_v41  ;;  %v9586_v41 = vld [vmem:[#allocation7 + $0x114] sm:$0xf0]  ;;  %v9715_v35 = vld [vmem:[#allocation10 + $0x31c] sm:$0xf0] }
  0x6f   :  { %v6602_v47 = vor.u32 %v9586_v41, %v6601_v40  ;;  %v6849_v37 = vld [vmem:[#allocation10 + $0x100] sm:$0xf]  ;;  %v7394_v41 = vor.u32 %v9787_v32, %v7393_v31  ;;  %v7106_v45 = vor.u32 %v9715_v35, %v7105_v34  ;;  %v7715_v34 = vld [vmem:[#allocation10 + $0x7e0] sm:$0xf0] }
  0x70   :  { %v7617_v40 = vld [vmem:[#allocation10 + $0x700] sm:$0xf] }
  0x71   :  { %762 = vmatpush.bf16.msra.mxu0 %v6558_v52  ;;  %754 = vmatpush.bf16.msrb.mxu3 %v6602_v47  ;;  %v171_v52 = vperm.slane %v168_v50, 1  ;;  %v9843_v42 = vld [vmem:[#allocation10 + $0x71c] sm:$0xf0] }
  0x72   :  { %775 = vmatpush.bf16.msra.mxu1 %v6686_v53  ;;  %v7361_v43 = vld [vmem:[#allocation10 + $0x500] sm:$0xf] }
  0x73   :  { %v9779_v44 = vld [vmem:[#allocation10 + $0x51c] sm:$0xf0] }
  0x74   :  { %v7073_v46 = vld [vmem:[#allocation10 + $0x2c0] sm:$0xf] }
  0x75   :  { %763 = vmatpush.bf16.msra.mxu0 %v6542_v62  ;;  %v9867_v62 = vld [vmem:[#allocation10 + $0x7dc] sm:$0xf0] }
  0x76   :  { %776 = vmatpush.bf16.msra.mxu1 %v6670_v1  ;;  %v7714_v13 = vor.u32 %v9867_v62, %v7713_v61  ;;  %v9707_v47 = vld [vmem:[#allocation10 + $0x2dc] sm:$0xf0] }
  0x77   :  { %v9643_v50 = vld [vmem:[#allocation10 + $0xdc] sm:$0xf0]  ;;  %v7074_v57 = vor.u32 %v9707_v47, %v7073_v46  ;;  %v7139_v46 = vld [vmem:[#allocation10 + $0x360] sm:$0xf0] }
  0x78   :  { %v9771_v56 = vld [vmem:[#allocation10 + $0x4dc] sm:$0xf0]  ;;  %v9655_v47 = vld [vmem:[#allocation10 + $0x144] sm:$0xf] }
  0x79   :  { %764 = vmatpush.bf16.msra.mxu0 %v6526_v10  ;;  %v7041_v58 = vld [vmem:[#allocation10 + $0x280] sm:$0xf] }
  0x7a   :  { %777 = vmatpush.bf16.msra.mxu1 %v6654_v14  ;;  %v7681_v14 = vld [vmem:[#allocation10 + $0x780] sm:$0xf] }
  0x7b   :  { %v6785_v61 = vld [vmem:[#allocation10 + $0x80] sm:$0xf] }
  0x7c   :  { %v9635_v62 = vld [vmem:[#allocation10 + $0x9c] sm:$0xf0] }
  0x7d   :  { %765 = vmatpush.bf16.msra.mxu0 %v6510_v23  ;;  %v9723_v23 = vld [vmem:[#allocation10 + $0x35c] sm:$0xf0] }
  0x7e   :  { %778 = vmatpush.bf16.msra.mxu1 %v6638_v27  ;;  %v7682_v27 = vor.u32 %v9859_v17, %v7681_v14  ;;  %v7138_v33 = vor.u32 %v9723_v23, %v7137_v22  ;;  %v7553_v0 = vld [vmem:[#allocation10 + $0x680] sm:$0xf] }
  0x7f   :  { %v9827_v2 = vld [vmem:[#allocation10 + $0x69c] sm:$0xf0] }
  0x80   :  { %v7009_v7 = vld [vmem:[#allocation10 + $0x240] sm:$0xf] }
  0x81   :  { %766 = vmatpush.bf16.msra.mxu0 %v6494_v38  ;;  %v9651_v38 = vld [vmem:[#allocation10 + $0x11c] sm:$0xf0] }
  0x82   :  { %779 = vmatpush.bf16.msra.mxu1 %v6622_v39  ;;  %v7650_v39 = vor.u32 %v9851_v30, %v7649_v28  ;;  %v9691_v8 = vld [vmem:[#allocation10 + $0x25c] sm:$0xf0]  ;;  %v6947_v28 = vld [vmem:[#allocation10 + $0x1e0] sm:$0xf0] }
  0x83   :  { %v6753_v11 = vld [vmem:[#allocation10 + $0x40] sm:$0xf]  ;;  %v7010_v18 = vor.u32 %v9691_v8, %v7009_v7  ;;  %v6819_v7 = vld [vmem:[#allocation10 + $0xe0] sm:$0xf0] }
  0x84   :  { %v9627_v12 = vld [vmem:[#allocation10 + $0x5c] sm:$0xf0]  ;;  %v9799_v8 = vld [vmem:[#allocation10 + $0x5c4] sm:$0xf] }
  0x85   :  { %767 = vmatpush.bf16.msra.mxu0 %v6478_v48  ;;  %v6850_v48 = vor.u32 %v9651_v38, %v6849_v37  ;;  %v7521_v14 = vld [vmem:[#allocation10 + $0x640] sm:$0xf]  ;;  %v7171_v38 = vld [vmem:[#allocation10 + $0x3a0] sm:$0xf0] }
  0x86   :  { %780 = vmatpush.bf16.msra.mxu1 %v6606_v49  ;;  %v6817_v49 = vld [vmem:[#allocation10 + $0xc0] sm:$0xf] }
  0x87   :  { %v6818_v60 = vor.u32 %v9643_v50, %v6817_v49  ;;  %v9755_v17 = vld [vmem:[#allocation10 + $0x45c] sm:$0xf0]  ;;  %v9711_v50 = vld [vmem:[#allocation10 + $0x304] sm:$0xf] }
  0x88   :  { %v9683_v19 = vld [vmem:[#allocation10 + $0x21c] sm:$0xf0] }
  0x89   :  { %v6721_v22 = vld [vmem:[#allocation10] sm:$0xf] }
  0x8a   :  { %v9619_v23 = vld [vmem:[#allocation10 + $0x1c] sm:$0xf0] }
  0x8b   :  { %v9811_v30 = vld [vmem:[#allocation10 + $0x61c] sm:$0xf0]  ;;  %v6722_v32 = vor.u32 %v9619_v23, %v6721_v22  ;;  %v9679_v23 = vld [vmem:[#allocation10 + $0x204] sm:$0xf] }
  0xc5   :  { %v263_v53 = vpop.f32.mrf.mxu0 }
  0xc6   :  { %v264_v54 = vadd.f32 %v263_v53, %v170_v51  ;;  %v276_v55 = vpop.f32.mrf.mxu1  ;;  %v7618_v51 = vor.u32 %v9843_v42, %v7617_v40  ;;  %v7362_v53 = vor.u32 %v9779_v44, %v7361_v43  ;;  %v6915_v40 = vld [vmem:[#allocation10 + $0x1a0] sm:$0xf0] }
  0xc7   :  { %v277_v59 = vadd.f32 %v276_v55, %v171_v52  ;;  %v7585_v52 = vld [vmem:[#allocation10 + $0x6c0] sm:$0xf]  ;;  %v9719_v44 = vld [vmem:[#allocation10 + $0x344] sm:$0xf] }
  0xc8   :  { %vm280_vm0 = vcmp.ge.f32.partialorder %v264_v54, 0.0  ;;  %v282_v63 = vmul.f32 0.2, %v264_v54  ;;  %v7329_v55 = vld [vmem:[#allocation10 + $0x4c0] sm:$0xf]  ;;  %v7142_v49 = vor.u32 %v9719_v44, %v7139_v46 }
  0xc9   :  { %vm281_vm1 = vcmp.ge.f32.partialorder %v277_v59, 0.0  ;;  %v283_v1 = vmul.f32 0.2, %v277_v59  ;;  %v9823_v44 = vld [vmem:[#allocation10 + $0x684] sm:$0xf] }
  0xca   :  { %v284_v3 = vsel %vm280_vm0, %v264_v54, %v282_v63  ;;  %v9835_v54 = vld [vmem:[#allocation10 + $0x6dc] sm:$0xf0] }
  0xcb   :  { %v10675_v4 = vpack.c.bf16 %v284_v3, %v284_v3  ;;  %v285_v5 = vsel %vm281_vm1, %v277_v59, %v283_v1  ;;  %v9699_v59 = vld [vmem:[#allocation10 + $0x29c] sm:$0xf0]  ;;  %v7586_v63 = vor.u32 %v9835_v54, %v7585_v52  ;;  %v7330_v1 = vor.u32 %v9771_v56, %v7329_v55  ;;  %v7107_v52 = vld [vmem:[#allocation10 + $0x320] sm:$0xf0] }
  0xcc   :  { %v10677_v10 = vpack.c.bf16 %v285_v5, %v285_v5  ;;  %v7297_v3 = vld [vmem:[#allocation10 + $0x480] sm:$0xf]  ;;  %v6851_v54 = vld [vmem:[#allocation10 + $0x120] sm:$0xf0]  ;;  %v7110_v55 = vor.u32 %v9711_v50, %v7107_v52 }
  0xcd   :  { %v265_v16 = vpop.f32.mrf.mxu0  ;;  %690 = vmatmul.bf16.vlgmr.msra.gmra.mxu2 %v10675_v4  ;;  %716 = vmatmul.bf16.vlgmr.msrb.gmra.mxu0 %v10675_v4  ;;  %v9763_v5 = vld [vmem:[#allocation10 + $0x49c] sm:$0xf0]  ;;  %v9815_v50 = vld [vmem:[#allocation10 + $0x644] sm:$0xf] }
  0xce   :  { %v278_v20 = vpop.f32.mrf.mxu1  ;;  %703 = vmatmul.bf16.vlgmr.msra.gmra.mxu3 %v10677_v10  ;;  %729 = vmatmul.bf16.vlgmr.msrb.gmra.mxu1 %v10677_v10  ;;  %v7265_v16 = vld [vmem:[#allocation10 + $0x440] sm:$0xf] }
  0xcf   :  { %2369 = vmatpush.bf16.msra.mxu3 %v7202_v6  ;;  %2356 = vmatpush.bf16.msra.mxu2 %v6946_v9  ;;  %v7042_v6 = vor.u32 %v9699_v59, %v7041_v58  ;;  %v6786_v9 = vor.u32 %v9635_v62, %v6785_v61  ;;  %v6754_v20 = vor.u32 %v9627_v12, %v6753_v11  ;;  %v7075_v58 = vld [vmem:[#allocation10 + $0x2e0] sm:$0xf0] }
  0xd0   :  { %2395 = vmatpush.bf16.msrb.mxu1 %v7714_v13  ;;  %2382 = vmatpush.bf16.msrb.mxu0 %v7458_v15  ;;  %v7554_v13 = vor.u32 %v9827_v2, %v7553_v0  ;;  %v9819_v15 = vld [vmem:[#allocation10 + $0x65c] sm:$0xf0]  ;;  %v7266_v25 = vor.u32 %v9755_v17, %v7265_v16  ;;  %v7043_v61 = vld [vmem:[#allocation10 + $0x2a0] sm:$0xf0] }
  0xd1   :  { %v9855_v62 = vld [vmem:[#allocation10 + $0x784] sm:$0xf]  ;;  %v9747_v2 = vld [vmem:[#allocation10 + $0x41c] sm:$0xf0] }
  0xd2   :  { %v7683_v0 = vld [vmem:[#allocation10 + $0x7a0] sm:$0xf0] }
  0xd3   :  { %2370 = vmatpush.bf16.msra.mxu3 %v7170_v21  ;;  %2357 = vmatpush.bf16.msra.mxu2 %v6914_v24  ;;  %v9735_v21 = vld [vmem:[#allocation10 + $0x3c4] sm:$0xf]  ;;  %v7522_v24 = vor.u32 %v9819_v15, %v7521_v14 }
  0xd4   :  { %2396 = vmatpush.bf16.msrb.mxu1 %v7682_v27  ;;  %2383 = vmatpush.bf16.msrb.mxu0 %v7426_v29  ;;  %v9671_v27 = vld [vmem:[#allocation10 + $0x1c4] sm:$0xf]  ;;  %v7489_v29 = vld [vmem:[#allocation10 + $0x600] sm:$0xf]  ;;  %v7206_v35 = vor.u32 %v9735_v21, %v7203_v26 }
  0xd5   :  { %v6950_v37 = vor.u32 %v9671_v27, %v6947_v28  ;;  %v7459_v11 = vld [vmem:[#allocation10 + $0x5e0] sm:$0xf0] }
  0xd6   :  { %v7462_v12 = vor.u32 %v9799_v8, %v7459_v11  ;;  %v7011_v14 = vld [vmem:[#allocation10 + $0x260] sm:$0xf0]  ;;  %v9740_v11 = vld [vmem:[#allocation10 + $0x3e4] sm:$0xf0] }
  0xd7   :  { %2371 = vmatpush.bf16.msra.mxu3 %v7138_v33  ;;  %2358 = vmatpush.bf16.msra.mxu2 %v6882_v36  ;;  %v9863_v33 = vld [vmem:[#allocation10 + $0x7c4] sm:$0xf] }
  0xd8   :  { %2397 = vmatpush.bf16.msrb.mxu1 %v7650_v39  ;;  %2384 = vmatpush.bf16.msrb.mxu0 %v7394_v41  ;;  %v9727_v36 = vld [vmem:[#allocation10 + $0x384] sm:$0xf]  ;;  %v7490_v41 = vor.u32 %v9811_v30, %v7489_v29  ;;  %v7718_v42 = vor.u32 %v9863_v33, %v7715_v34 }
  0xd9   :  { %v9663_v39 = vld [vmem:[#allocation10 + $0x184] sm:$0xf]  ;;  %v7174_v43 = vor.u32 %v9727_v36, %v7171_v38 }
  0xda   :  { %v7651_v16 = vld [vmem:[#allocation10 + $0x760] sm:$0xf0] }
  0xdb   :  { %2372 = vmatpush.bf16.msra.mxu3 %v7106_v45  ;;  %2359 = vmatpush.bf16.msra.mxu2 %v6850_v48  ;;  %v6918_v45 = vor.u32 %v9663_v39, %v6915_v40  ;;  %v6883_v48 = vld [vmem:[#allocation10 + $0x160] sm:$0xf0] }
  0xdc   :  { %2398 = vmatpush.bf16.msrb.mxu1 %v7618_v51  ;;  %2385 = vmatpush.bf16.msrb.mxu0 %v7362_v53  ;;  %v6886_v51 = vor.u32 %v9655_v47, %v6883_v48  ;;  %v9647_v53 = vld [vmem:[#allocation10 + $0x104] sm:$0xf] }
  0xdd   :  { %742 = vmatmul.bf16.vlgmr.msrb.gmra.mxu2 %v10675_v4  ;;  %768 = vmatmul.bf16.vlgmr.msra.gmra.mxu0 %v10675_v4  ;;  %v7298_v4 = vor.u32 %v9763_v5, %v7297_v3  ;;  %v6854_v56 = vor.u32 %v9647_v53, %v6851_v54  ;;  %v7686_v3 = vor.u32 %v9855_v62, %v7683_v0  ;;  %v7427_v21 = vld [vmem:[#allocation10 + $0x5a0] sm:$0xf0] }
  0xde   :  { %755 = vmatmul.bf16.vlgmr.msrb.gmra.mxu3 %v10677_v10  ;;  %781 = vmatmul.bf16.vlgmr.msra.gmra.mxu1 %v10677_v10  ;;  %v6977_v10 = vld [vmem:[#allocation10 + $0x200] sm:$0xf]  ;;  %v7619_v27 = vld [vmem:[#allocation10 + $0x720] sm:$0xf0] }
  0xdf   :  { %2373 = vmatpush.bf16.msra.mxu3 %v7074_v57  ;;  %2360 = vmatpush.bf16.msra.mxu2 %v6818_v60  ;;  %v6978_v31 = vor.u32 %v9683_v19, %v6977_v10  ;;  %v9703_v57 = vld [vmem:[#allocation10 + $0x2c4] sm:$0xf] }
  0xe0   :  { %2399 = vmatpush.bf16.msrb.mxu1 %v7586_v63  ;;  %2386 = vmatpush.bf16.msrb.mxu0 %v7330_v1  ;;  %v7078_v59 = vor.u32 %v9703_v57, %v7075_v58  ;;  %v9695_v60 = vld [vmem:[#allocation10 + $0x284] sm:$0xf]  ;;  %v7233_v1 = vld [vmem:[#allocation10 + $0x400] sm:$0xf] }
  0xe1   :  { %v7046_v63 = vor.u32 %v9695_v60, %v7043_v61  ;;  %v7234_v5 = vor.u32 %v9747_v2, %v7233_v1  ;;  %v6787_v10 = vld [vmem:[#allocation10 + $0xa0] sm:$0xf0]  ;;  %v10687_v61 = vld [vmem:[#allocation8] sm:$0xf] }
  0xe2   :  { %v9791_v19 = vld [vmem:[#allocation10 + $0x584] sm:$0xf]  ;;  %v354_v8 = vperm.slane %v10687_v61, 0 }
  0xe3   :  { %2374 = vmatpush.bf16.msra.mxu3 %v7042_v6  ;;  %2361 = vmatpush.bf16.msra.mxu2 %v6786_v9  ;;  %v9639_v6 = vld [vmem:[#allocation10 + $0xc4] sm:$0xf]  ;;  %v7430_v22 = vor.u32 %v9791_v19, %v7427_v21  ;;  %v9732_v19 = vld [vmem:[#allocation10 + $0x3a4] sm:$0xf0] }
  0xe4   :  { %2400 = vmatpush.bf16.msrb.mxu1 %v7554_v13  ;;  %2387 = vmatpush.bf16.msrb.mxu0 %v7298_v4  ;;  %v6822_v9 = vor.u32 %v9639_v6, %v6819_v7  ;;  %v9687_v13 = vld [vmem:[#allocation10 + $0x244] sm:$0xf] }
  0xe5   :  { %v9847_v4 = vld [vmem:[#allocation10 + $0x744] sm:$0xf]  ;;  %v7014_v15 = vor.u32 %v9687_v13, %v7011_v14 }
  0xe6   :  { %v7654_v17 = vor.u32 %v9847_v4, %v7651_v16  ;;  %v9623_v29 = vld [vmem:[#allocation10 + $0x44] sm:$0xf] }
  0xe7   :  { %2375 = vmatpush.bf16.msra.mxu3 %v7010_v18  ;;  %2362 = vmatpush.bf16.msra.mxu2 %v6754_v20  ;;  %v9631_v18 = vld [vmem:[#allocation10 + $0x84] sm:$0xf] }
  0xe8   :  { %2401 = vmatpush.bf16.msrb.mxu1 %v7522_v24  ;;  %2388 = vmatpush.bf16.msrb.mxu0 %v7266_v25  ;;  %v6790_v20 = vor.u32 %v9631_v18, %v6787_v10  ;;  %v6979_v24 = vld [vmem:[#allocation10 + $0x220] sm:$0xf0]  ;;  %v7177_v10 = vld [vmem:[#allocation10 + $0x388] sm:$0xf] }
  0xe9   :  { %v9839_v25 = vld [vmem:[#allocation10 + $0x704] sm:$0xf]  ;;  %v6982_v26 = vor.u32 %v9679_v23, %v6979_v24  ;;  %v9676_v23 = vld [vmem:[#allocation10 + $0x1e4] sm:$0xf0] }
  0xea   :  { %v7622_v28 = vor.u32 %v9839_v25, %v7619_v27  ;;  %v6755_v30 = vld [vmem:[#allocation10 + $0x60] sm:$0xf0]  ;;  %v7178_v25 = vor.u32 %v9732_v19, %v7177_v10  ;;  %v9724_v27 = vld [vmem:[#allocation10 + $0x364] sm:$0xf0] }
  0xeb   :  { %2376 = vmatpush.bf16.msra.mxu3 %v6978_v31  ;;  %2363 = vmatpush.bf16.msra.mxu2 %v6722_v32  ;;  %v9783_v31 = vld [vmem:[#allocation10 + $0x544] sm:$0xf]  ;;  %v6758_v32 = vor.u32 %v9623_v29, %v6755_v30  ;;  %v357_v29 = vperm.slane %v10687_v61, 3  ;;  %v9852_v10 = vld [vmem:[#allocation10 + $0x764] sm:$0xf0] }
  0xec   :  { %2402 = vmatpush.bf16.msrb.mxu1 %v7490_v41  ;;  %2389 = vmatpush.bf16.msrb.mxu0 %v7234_v5  ;;  %v7395_v33 = vld [vmem:[#allocation10 + $0x560] sm:$0xf0] }
  0xed   :  { %v7398_v34 = vor.u32 %v9783_v31, %v7395_v33  ;;  %v7587_v36 = vld [vmem:[#allocation10 + $0x6e0] sm:$0xf0]  ;;  %v6921_v33 = vld [vmem:[#allocation10 + $0x188] sm:$0xf] }
  0xee   :  { %v9615_v38 = vld [vmem:[#allocation10 + $0x4] sm:$0xf] }
  0xef   :  { %2421 = vmatpush.bf16.msrb.mxu3 %v7206_v35  ;;  %2408 = vmatpush.bf16.msrb.mxu2 %v6950_v37  ;;  %v9831_v35 = vld [vmem:[#allocation10 + $0x6c4] sm:$0xf] }
  0xf0   :  { %2447 = vmatpush.bf16.msra.mxu1 %v7718_v42  ;;  %2434 = vmatpush.bf16.msra.mxu0 %v7462_v12  ;;  %v7590_v37 = vor.u32 %v9831_v35, %v7587_v36  ;;  %v6723_v39 = vld [vmem:[#allocation10 + $0x20] sm:$0xf0] }
  0xf1   :  { %v9775_v40 = vld [vmem:[#allocation10 + $0x504] sm:$0xf]  ;;  %v6726_v41 = vor.u32 %v9615_v38, %v6723_v39  ;;  %v7113_v38 = vld [vmem:[#allocation10 + $0x308] sm:$0xf] }
  0xf2   :  { %v7363_v42 = vld [vmem:[#allocation10 + $0x520] sm:$0xf0]  ;;  %v9716_v39 = vld [vmem:[#allocation10 + $0x324] sm:$0xf0] }
  0xf3   :  { %2422 = vmatpush.bf16.msrb.mxu3 %v7174_v43  ;;  %2409 = vmatpush.bf16.msrb.mxu2 %v6918_v45  ;;  %v7366_v43 = vor.u32 %v9775_v40, %v7363_v42  ;;  %v7555_v45 = vld [vmem:[#allocation10 + $0x6a0] sm:$0xf0] }
  0xf4   :  { %2448 = vmatpush.bf16.msra.mxu1 %v7686_v3  ;;  %2435 = vmatpush.bf16.msra.mxu0 %v7430_v22  ;;  %v7558_v46 = vor.u32 %v9823_v44, %v7555_v45  ;;  %v9767_v47 = vld [vmem:[#allocation10 + $0x4c4] sm:$0xf]  ;;  %v6953_v22 = vld [vmem:[#allocation10 + $0x1c8] sm:$0xf] }
  0xf5   :  { %v7331_v48 = vld [vmem:[#allocation10 + $0x4e0] sm:$0xf0]  ;;  %v6954_v30 = vor.u32 %v9676_v23, %v6953_v22  ;;  %v9660_v44 = vld [vmem:[#allocation10 + $0x164] sm:$0xf0] }
  0xf6   :  { %v9759_v53 = vld [vmem:[#allocation10 + $0x484] sm:$0xf]  ;;  %v6793_v22 = vld [vmem:[#allocation10 + $0x88] sm:$0xf] }
  0xf7   :  { %2423 = vmatpush.bf16.msrb.mxu3 %v7142_v49  ;;  %2410 = vmatpush.bf16.msrb.mxu2 %v6886_v51  ;;  %v7334_v49 = vor.u32 %v9767_v47, %v7331_v48  ;;  %v7523_v51 = vld [vmem:[#allocation10 + $0x660] sm:$0xf0]  ;;  %v7114_v47 = vor.u32 %v9716_v39, %v7113_v38  ;;  %v7081_v48 = vld [vmem:[#allocation10 + $0x2c8] sm:$0xf]  ;;  %v9736_v38 = vld [vmem:[#allocation10 + $0x3cc] sm:$0xf] }
  0xf8   :  { %2449 = vmatpush.bf16.msra.mxu1 %v7654_v17  ;;  %2436 = vmatpush.bf16.msra.mxu0 %v7398_v34  ;;  %v7526_v52 = vor.u32 %v9815_v50, %v7523_v51  ;;  %v7299_v54 = vld [vmem:[#allocation10 + $0x4a0] sm:$0xf0]  ;;  %v9668_v34 = vld [vmem:[#allocation10 + $0x1a4] sm:$0xf0]  ;;  %v7211_v39 = vld [vmem:[#allocation10 + $0x3e8] sm:$0xf0] }
  0xf9   :  { %v7491_v57 = vld [vmem:[#allocation10 + $0x620] sm:$0xf0]  ;;  %v6922_v42 = vor.u32 %v9668_v34, %v6921_v33  ;;  %v7721_v50 = vld [vmem:[#allocation10 + $0x7c8] sm:$0xf] }
  0xfa   :  { %v7267_v60 = vld [vmem:[#allocation10 + $0x460] sm:$0xf0]  ;;  %v9868_v51 = vld [vmem:[#allocation10 + $0x7e4] sm:$0xf0] }
  0xfb   :  { %2424 = vmatpush.bf16.msrb.mxu3 %v7110_v55  ;;  %2411 = vmatpush.bf16.msrb.mxu2 %v6854_v56  ;;  %v7302_v55 = vor.u32 %v9759_v53, %v7299_v54  ;;  %v9807_v56 = vld [vmem:[#allocation10 + $0x604] sm:$0xf]  ;;  %v9684_v33 = vld [vmem:[#allocation10 + $0x224] sm:$0xf0] }
  0xfc   :  { %2450 = vmatpush.bf16.msra.mxu1 %v7622_v28  ;;  %2437 = vmatpush.bf16.msra.mxu0 %v7366_v43  ;;  %v7494_v58 = vor.u32 %v9807_v56, %v7491_v57  ;;  %v9743_v0 = vld [vmem:[#allocation10 + $0x404] sm:$0xf]  ;;  %v6889_v43 = vld [vmem:[#allocation10 + $0x148] sm:$0xf] }
  0xfd   :  { %v7235_v1 = vld [vmem:[#allocation10 + $0x420] sm:$0xf0]  ;;  %v6890_v53 = vor.u32 %v9660_v44, %v6889_v43  ;;  %v9652_v56 = vld [vmem:[#allocation10 + $0x124] sm:$0xf0] }
  0xfe   :  { %v7238_v2 = vor.u32 %v9743_v0, %v7235_v1  ;;  %v9700_v1 = vld [vmem:[#allocation10 + $0x2a4] sm:$0xf0] }
  0xff   :  { %2425 = vmatpush.bf16.msrb.mxu3 %v7078_v59  ;;  %2412 = vmatpush.bf16.msrb.mxu2 %v6822_v9  ;;  %v9751_v59 = vld [vmem:[#allocation10 + $0x444] sm:$0xf]  ;;  %v7209_v9 = vld [vmem:[#allocation10 + $0x3c8] sm:$0xf] }
 0x100   :  { %2451 = vmatpush.bf16.msra.mxu1 %v7590_v37  ;;  %2438 = vmatpush.bf16.msra.mxu0 %v7334_v49  ;;  %v7270_v62 = vor.u32 %v9751_v59, %v7267_v60  ;;  %v7210_v16 = vor.u32 %v9740_v11, %v7209_v9  ;;  %v9708_v49 = vld [vmem:[#allocation10 + $0x2e4] sm:$0xf0] }
 0x101   :  { %v7082_v60 = vor.u32 %v9708_v49, %v7081_v48  ;;  %v9644_v9 = vld [vmem:[#allocation10 + $0xe4] sm:$0xf0] }
 0x102   :  { %v7465_v11 = vld [vmem:[#allocation10 + $0x5c8] sm:$0xf] }
 0x103   :  { %2426 = vmatpush.bf16.msrb.mxu3 %v7046_v63  ;;  %2413 = vmatpush.bf16.msrb.mxu2 %v6790_v20  ;;  %v355_v63 = vperm.slane %v10687_v61, 1  ;;  %v7625_v34 = vld [vmem:[#allocation10 + $0x708] sm:$0xf] }
 0x104   :  { %2452 = vmatpush.bf16.msra.mxu1 %v7558_v46  ;;  %2439 = vmatpush.bf16.msra.mxu0 %v7302_v55  ;;  %v356_v46 = vperm.slane %v10687_v61, 2  ;;  %v6857_v55 = vld [vmem:[#allocation10 + $0x108] sm:$0xf] }
 0x105   :  { %v9788_v43 = vld [vmem:[#allocation10 + $0x564] sm:$0xf0] }
 0x106   :  { %v9836_v48 = vld [vmem:[#allocation10 + $0x6e4] sm:$0xf0] }
 0x107   :  { %2427 = vmatpush.bf16.msrb.mxu3 %v7014_v15  ;;  %2414 = vmatpush.bf16.msrb.mxu2 %v6758_v32 }
 0x108   :  { %2453 = vmatpush.bf16.msra.mxu1 %v7526_v52  ;;  %2440 = vmatpush.bf16.msra.mxu0 %v7270_v62  ;;  %v7722_v62 = vor.u32 %v9868_v51, %v7721_v50  ;;  %v9728_v51 = vld [vmem:[#allocation10 + $0x38c] sm:$0xf] }
 0x10b   :  { %2428 = vmatpush.bf16.msrb.mxu3 %v6982_v26  ;;  %2415 = vmatpush.bf16.msrb.mxu2 %v6726_v41  ;;  %v7145_v26 = vld [vmem:[#allocation10 + $0x348] sm:$0xf] }
 0x10c   :  { %2454 = vmatpush.bf16.msra.mxu1 %v7494_v58  ;;  %2441 = vmatpush.bf16.msra.mxu0 %v7238_v2  ;;  %v7146_v36 = vor.u32 %v9724_v27, %v7145_v26  ;;  %v7689_v2 = vld [vmem:[#allocation10 + $0x788] sm:$0xf] }
 0x10d   :  { %v7433_v26 = vld [vmem:[#allocation10 + $0x588] sm:$0xf] }
 0x10e   :  { %v9796_v27 = vld [vmem:[#allocation10 + $0x5a4] sm:$0xf0] }
 0x14a   :  { %v717_v3 = vpop.f32.mrf.mxu0 }
 0x14b   :  { %v718_v5 = vadd.f32 %v717_v3, %v355_v63  ;;  %v730_v6 = vpop.f32.mrf.mxu1  ;;  %v7049_v63 = vld [vmem:[#allocation10 + $0x288] sm:$0xf] }
 0x14c   :  { %v9860_v3 = vld [vmem:[#allocation10 + $0x7a4] sm:$0xf0] }
 0x14d   :  { %v731_v7 = vadd.f32 %v730_v6, %v718_v5 }
 0x14f   :  { %vm787_vm2 = vcmp.ge.f32.partialorder %v731_v7, 0.0  ;;  %v791_v12 = vmul.f32 0.2, %v731_v7 }
 0x150   :  { %v691_v13 = vpop.f32.mrf.mxu2 }
 0x151   :  { %v795_v14 = vsel %vm787_vm2, %v731_v7, %v791_v12  ;;  %v692_v4 = vadd.f32 %v691_v13, %v354_v8  ;;  %v704_v15 = vpop.f32.mrf.mxu3  ;;  %v6858_v7 = vor.u32 %v9652_v56, %v6857_v55  ;;  %v6825_v8 = vld [vmem:[#allocation10 + $0xc8] sm:$0xf] }
 0x152   :  { %v10691_v17 = vpack.c.bf16 %v795_v14, %v795_v14  ;;  %v719_v18 = vpop.f32.mrf.mxu0  ;;  %v9804_v12 = vld [vmem:[#allocation10 + $0x5e4] sm:$0xf0]  ;;  %v7050_v14 = vor.u32 %v9700_v1, %v7049_v63 }
 0x153   :  { %v705_v20 = vadd.f32 %v704_v15, %v692_v4  ;;  %v732_v21 = vpop.f32.mrf.mxu1  ;;  %v7690_v4 = vor.u32 %v9860_v3, %v7689_v2  ;;  %v7017_v15 = vld [vmem:[#allocation10 + $0x248] sm:$0xf]  ;;  %v9720_v2 = vld [vmem:[#allocation10 + $0x34c] sm:$0xf] }
 0x154   :  { %2377 = vmatmul.bf16.vlgmr.msra.gmra.mxu3 %v10691_v17  ;;  %v7657_v18 = vld [vmem:[#allocation10 + $0x748] sm:$0xf]  ;;  %v7466_v21 = vor.u32 %v9804_v12, %v7465_v11  ;;  %v7147_v3 = vld [vmem:[#allocation10 + $0x368] sm:$0xf0] }
 0x155   :  { %vm786_vm3 = vcmp.ge.f32.partialorder %v705_v20, 0.0  ;;  %v790_v24 = vmul.f32 0.2, %v705_v20  ;;  %2473 = vmatpush.bf16.msra.mxu3 %v7210_v16  ;;  %v9692_v16 = vld [vmem:[#allocation10 + $0x264] sm:$0xf0]  ;;  %v7150_v12 = vor.u32 %v9720_v2, %v7147_v3 }
 0x156   :  { %v7369_v55 = vld [vmem:[#allocation10 + $0x508] sm:$0xf]  ;;  %v6923_v11 = vld [vmem:[#allocation10 + $0x1a8] sm:$0xf0] }
 0x157   :  { %v794_v28 = vsel %vm786_vm3, %v705_v20, %v790_v24  ;;  %v6826_v20 = vor.u32 %v9644_v9, %v6825_v8  ;;  %v9780_v56 = vld [vmem:[#allocation10 + $0x524] sm:$0xf0]  ;;  %v9664_v9 = vld [vmem:[#allocation10 + $0x18c] sm:$0xf] }
 0x158   :  { %v10695_v31 = vpack.c.bf16 %v794_v28, %v794_v28  ;;  %v693_v32 = vpop.f32.mrf.mxu2  ;;  %v9828_v63 = vld [vmem:[#allocation10 + $0x6a4] sm:$0xf0]  ;;  %v7370_v1 = vor.u32 %v9780_v56, %v7369_v55  ;;  %v9688_v55 = vld [vmem:[#allocation10 + $0x24c] sm:$0xf] }
 0x159   :  { %v706_v35 = vpop.f32.mrf.mxu3  ;;  %2474 = vmatpush.bf16.msra.mxu3 %v7178_v25  ;;  %v9636_v25 = vld [vmem:[#allocation10 + $0xa4] sm:$0xf0]  ;;  %v7435_v2 = vld [vmem:[#allocation10 + $0x5a8] sm:$0xf0] }
 0x15a   :  { %v769_v37 = vpop.f32.mrf.mxu0  ;;  %2364 = vmatmul.bf16.vlgmr.msra.gmra.mxu2 %v10695_v31  ;;  %v6985_v32 = vld [vmem:[#allocation10 + $0x208] sm:$0xf] }
 0x15b   :  { %v770_v40 = vadd.f32 %v769_v37, %v357_v29  ;;  %v782_v41 = vpop.f32.mrf.mxu1  ;;  %2460 = vmatpush.bf16.msra.mxu2 %v6954_v30  ;;  %v7018_v29 = vor.u32 %v9692_v16, %v7017_v15  ;;  %v7658_v30 = vor.u32 %v9852_v10, %v7657_v18  ;;  %v9844_v35 = vld [vmem:[#allocation10 + $0x724] sm:$0xf0]  ;;  %v7434_v37 = vor.u32 %v9796_v27, %v7433_v26  ;;  %v9712_v15 = vld [vmem:[#allocation10 + $0x30c] sm:$0xf] }
 0x15c   :  { %v6986_v44 = vor.u32 %v9684_v33, %v6985_v32  ;;  %v7115_v16 = vld [vmem:[#allocation10 + $0x328] sm:$0xf0]  ;;  %v6926_v18 = vor.u32 %v9664_v9, %v6923_v11  ;;  %v7305_v10 = vld [vmem:[#allocation10 + $0x488] sm:$0xf] }
 0x15d   :  { %v783_v45 = vadd.f32 %v782_v41, %v770_v40  ;;  %2475 = vmatpush.bf16.msra.mxu3 %v7146_v36  ;;  %v6794_v36 = vor.u32 %v9636_v25, %v6793_v22  ;;  %v6761_v40 = vld [vmem:[#allocation10 + $0x48] sm:$0xf]  ;;  %v6891_v22 = vld [vmem:[#allocation10 + $0x168] sm:$0xf0] }
 0x15e   :  { %v9628_v41 = vld [vmem:[#allocation10 + $0x64] sm:$0xf0]  ;;  %v9704_v27 = vld [vmem:[#allocation10 + $0x2cc] sm:$0xf] }
 0x15f   :  { %vm789_vm4 = vcmp.ge.f32.partialorder %v783_v45, 0.0  ;;  %v793_v52 = vmul.f32 0.2, %v783_v45  ;;  %2461 = vmatpush.bf16.msra.mxu2 %v6922_v42  ;;  %v7401_v42 = vld [vmem:[#allocation10 + $0x548] sm:$0xf]  ;;  %v6762_v49 = vor.u32 %v9628_v41, %v6761_v40 }
 0x160   :  { %v743_v54 = vpop.f32.mrf.mxu2  ;;  %v7402_v50 = vor.u32 %v9788_v43, %v7401_v42  ;;  %v7497_v25 = vld [vmem:[#allocation10 + $0x608] sm:$0xf]  ;;  %v7723_v32 = vld [vmem:[#allocation10 + $0x7e8] sm:$0xf0] }
 0x161   :  { %v797_v57 = vsel %vm789_vm4, %v783_v45, %v793_v52  ;;  %v744_v58 = vadd.f32 %v743_v54, %v356_v46  ;;  %v756_v59 = vpop.f32.mrf.mxu3  ;;  %2476 = vmatpush.bf16.msra.mxu3 %v7114_v47  ;;  %v7626_v45 = vor.u32 %v9844_v35, %v7625_v34  ;;  %v7214_v46 = vor.u32 %v9736_v38, %v7211_v39  ;;  %v7593_v47 = vld [vmem:[#allocation10 + $0x6c8] sm:$0xf]  ;;  %v7179_v52 = vld [vmem:[#allocation10 + $0x3a8] sm:$0xf0] }
 0x162   :  { %v10699_v61 = vpack.c.bf16 %v797_v57, %v797_v57  ;;  %v771_v0 = vpop.f32.mrf.mxu0  ;;  %v9620_v54 = vld [vmem:[#allocation10 + $0x24] sm:$0xf0]  ;;  %v7594_v57 = vor.u32 %v9836_v48, %v7593_v47  ;;  %v6859_v38 = vld [vmem:[#allocation10 + $0x128] sm:$0xf0] }
 0x163   :  { %v757_v5 = vadd.f32 %v756_v59, %v744_v58  ;;  %v784_v6 = vpop.f32.mrf.mxu1  ;;  %2462 = vmatpush.bf16.msra.mxu2 %v6890_v53  ;;  %v6729_v53 = vld [vmem:[#allocation10 + $0x8] sm:$0xf]  ;;  %v9672_v58 = vld [vmem:[#allocation10 + $0x1cc] sm:$0xf] }
 0x164   :  { %2403 = vmatmul.bf16.vlgmr.msrb.gmra.mxu1 %v10699_v61  ;;  %2429 = vmatmul.bf16.vlgmr.msrb.gmra.mxu3 %v10691_v17  ;;  %v6955_v59 = vld [vmem:[#allocation10 + $0x1e8] sm:$0xf0]  ;;  %v6730_v0 = vor.u32 %v9620_v54, %v6729_v53  ;;  %v7337_v6 = vld [vmem:[#allocation10 + $0x4c8] sm:$0xf] }
 0x165   :  { %vm788_vm5 = vcmp.ge.f32.partialorder %v757_v5, 0.0  ;;  %v792_v13 = vmul.f32 0.2, %v757_v5  ;;  %2477 = vmatpush.bf16.msra.mxu3 %v7082_v60  ;;  %2499 = vmatpush.bf16.msrb.mxu1 %v7722_v62  ;;  %v7182_v60 = vor.u32 %v9728_v51, %v7179_v52  ;;  %v7561_v62 = vld [vmem:[#allocation10 + $0x688] sm:$0xf] }
 0x166   :  { %v7562_v8 = vor.u32 %v9828_v63, %v7561_v62  ;;  %v9812_v26 = vld [vmem:[#allocation10 + $0x624] sm:$0xf0]  ;;  %v9696_v41 = vld [vmem:[#allocation10 + $0x28c] sm:$0xf] }
 0x167   :  { %v796_v19 = vsel %vm788_vm5, %v757_v5, %v792_v13  ;;  %2463 = vmatpush.bf16.msra.mxu2 %v6858_v7  ;;  %v6958_v5 = vor.u32 %v9672_v58, %v6955_v59  ;;  %v9772_v7 = vld [vmem:[#allocation10 + $0x4e4] sm:$0xf0]  ;;  %v7051_v43 = vld [vmem:[#allocation10 + $0x2a8] sm:$0xf0] }
 0x168   :  { %v10703_v23 = vpack.c.bf16 %v796_v19, %v796_v19  ;;  %v745_v24 = vpop.f32.mrf.mxu2  ;;  %v7529_v13 = vld [vmem:[#allocation10 + $0x648] sm:$0xf]  ;;  %v9800_v51 = vld [vmem:[#allocation10 + $0x5cc] sm:$0xf]  ;;  %v7054_v53 = vor.u32 %v9696_v41, %v7051_v43  ;;  %v7153_v41 = vld [vmem:[#allocation10 + $0x350] sm:$0xf] }
 0x169   :  { %v758_v28 = vpop.f32.mrf.mxu3  ;;  %2478 = vmatpush.bf16.msra.mxu3 %v7050_v14  ;;  %2500 = vmatpush.bf16.msrb.mxu1 %v7690_v4  ;;  %v9820_v14 = vld [vmem:[#allocation10 + $0x664] sm:$0xf0]  ;;  %v7338_v4 = vor.u32 %v9772_v7, %v7337_v6  ;;  %v7118_v24 = vor.u32 %v9712_v15, %v7115_v16  ;;  %v7467_v52 = vld [vmem:[#allocation10 + $0x5e8] sm:$0xf0] }
 0x16a   :  { %2390 = vmatmul.bf16.vlgmr.msrb.gmra.mxu0 %v10703_v23  ;;  %2416 = vmatmul.bf16.vlgmr.msrb.gmra.mxu2 %v10695_v31  ;;  %v9764_v19 = vld [vmem:[#allocation10 + $0x4a4] sm:$0xf0]  ;;  %v9848_v58 = vld [vmem:[#allocation10 + $0x74c] sm:$0xf]  ;;  %v7470_v62 = vor.u32 %v9800_v51, %v7467_v52 }
 0x16b   :  { %2464 = vmatpush.bf16.msra.mxu2 %v6826_v20  ;;  %2486 = vmatpush.bf16.msrb.mxu0 %v7466_v21  ;;  %v7530_v20 = vor.u32 %v9820_v14, %v7529_v13  ;;  %v9656_v21 = vld [vmem:[#allocation10 + $0x14c] sm:$0xf]  ;;  %v7306_v28 = vor.u32 %v9764_v19, %v7305_v10  ;;  %v7273_v34 = vld [vmem:[#allocation10 + $0x448] sm:$0xf]  ;;  %v7217_v13 = vld [vmem:[#allocation10 + $0x3d0] sm:$0xf] }
 0x16c   :  { %v6894_v33 = vor.u32 %v9656_v21, %v6891_v22  ;;  %v9756_v35 = vld [vmem:[#allocation10 + $0x464] sm:$0xf0]  ;;  %v7659_v59 = vld [vmem:[#allocation10 + $0x768] sm:$0xf0]  ;;  %v9741_v14 = vld [vmem:[#allocation10 + $0x3ec] sm:$0xf0] }
 0x16d   :  { %2479 = vmatpush.bf16.msra.mxu3 %v7018_v29  ;;  %2501 = vmatpush.bf16.msrb.mxu1 %v7658_v30  ;;  %v7083_v29 = vld [vmem:[#allocation10 + $0x2e8] sm:$0xf0]  ;;  %v7274_v42 = vor.u32 %v9756_v35, %v7273_v34  ;;  %v7241_v47 = vld [vmem:[#allocation10 + $0x408] sm:$0xf]  ;;  %v6961_v34 = vld [vmem:[#allocation10 + $0x1d0] sm:$0xf] }
 0x16e   :  { %v9864_v30 = vld [vmem:[#allocation10 + $0x7cc] sm:$0xf]  ;;  %v7086_v39 = vor.u32 %v9704_v27, %v7083_v29  ;;  %v9748_v48 = vld [vmem:[#allocation10 + $0x424] sm:$0xf0]  ;;  %v9733_v27 = vld [vmem:[#allocation10 + $0x3ac] sm:$0xf0] }
 0x16f   :  { %2465 = vmatpush.bf16.msra.mxu2 %v6794_v36  ;;  %2487 = vmatpush.bf16.msrb.mxu0 %v7434_v37  ;;  %v7498_v36 = vor.u32 %v9812_v26, %v7497_v25  ;;  %v9648_v37 = vld [vmem:[#allocation10 + $0x10c] sm:$0xf]  ;;  %v7726_v40 = vor.u32 %v9864_v30, %v7723_v32  ;;  %v7242_v56 = vor.u32 %v9748_v48, %v7241_v47  ;;  %v7185_v26 = vld [vmem:[#allocation10 + $0x390] sm:$0xf] }
 0x170   :  { %v9632_v63 = vld [vmem:[#allocation10 + $0x8c] sm:$0xf]  ;;  %v9677_v35 = vld [vmem:[#allocation10 + $0x1ec] sm:$0xf0] }
 0x171   :  { %2480 = vmatpush.bf16.msra.mxu3 %v6986_v44  ;;  %2502 = vmatpush.bf16.msrb.mxu1 %v7626_v45  ;;  %v9856_v44 = vld [vmem:[#allocation10 + $0x78c] sm:$0xf]  ;;  %v6962_v43 = vor.u32 %v9677_v35, %v6961_v34  ;;  %v6929_v47 = vld [vmem:[#allocation10 + $0x190] sm:$0xf] }
 0x172   :  { %v7691_v45 = vld [vmem:[#allocation10 + $0x7a8] sm:$0xf0]  ;;  %v9669_v48 = vld [vmem:[#allocation10 + $0x1ac] sm:$0xf0] }
 0x173   :  { %2466 = vmatpush.bf16.msra.mxu2 %v6762_v49  ;;  %2488 = vmatpush.bf16.msrb.mxu0 %v7402_v50  ;;  %v9640_v49 = vld [vmem:[#allocation10 + $0xcc] sm:$0xf]  ;;  %v7694_v54 = vor.u32 %v9856_v44, %v7691_v45 }
 0x174   :  { %2455 = vmatmul.bf16.vlgmr.msra.gmra.mxu1 %v10699_v61  ;;  %2481 = vmatmul.bf16.vlgmr.msra.gmra.mxu3 %v10691_v17  ;;  %v6827_v50 = vld [vmem:[#allocation10 + $0xe8] sm:$0xf0] }
 0x175   :  { %2525 = vmatpush.bf16.msrb.mxu3 %v7214_v46  ;;  %2503 = vmatpush.bf16.msrb.mxu1 %v7594_v57  ;;  %v6862_v46 = vor.u32 %v9648_v37, %v6859_v38  ;;  %v7019_v57 = vld [vmem:[#allocation10 + $0x268] sm:$0xf0] }
 0x176   :  { %v7022_v3 = vor.u32 %v9688_v55, %v7019_v57  ;;  %v9680_v6 = vld [vmem:[#allocation10 + $0x20c] sm:$0xf]  ;;  %v6930_v55 = vor.u32 %v9669_v48, %v6929_v47  ;;  %v9845_v47 = vld [vmem:[#allocation10 + $0x72c] sm:$0xf0] }
 0x177   :  { %2467 = vmatpush.bf16.msra.mxu2 %v6730_v0  ;;  %2489 = vmatpush.bf16.msrb.mxu0 %v7370_v1  ;;  %v6795_v0 = vld [vmem:[#allocation10 + $0xa8] sm:$0xf0] }
 0x178   :  { %v9792_v1 = vld [vmem:[#allocation10 + $0x58c] sm:$0xf]  ;;  %v6798_v11 = vor.u32 %v9632_v63, %v6795_v0 }
 0x179   :  { %2526 = vmatpush.bf16.msrb.mxu3 %v7182_v60  ;;  %2504 = vmatpush.bf16.msrb.mxu1 %v7562_v8  ;;  %v6830_v60 = vor.u32 %v9640_v49, %v6827_v50  ;;  %v6987_v7 = vld [vmem:[#allocation10 + $0x228] sm:$0xf0] }
 0x17a   :  { %2442 = vmatmul.bf16.vlgmr.msra.gmra.mxu0 %v10703_v23  ;;  %2468 = vmatmul.bf16.vlgmr.msra.gmra.mxu2 %v10695_v31  ;;  %v9840_v8 = vld [vmem:[#allocation10 + $0x70c] sm:$0xf]  ;;  %v6990_v10 = vor.u32 %v9680_v6, %v6987_v7  ;;  %v9869_v6 = vld [vmem:[#allocation10 + $0x7ec] sm:$0xf0] }
 0x17b   :  { %2512 = vmatpush.bf16.msrb.mxu2 %v6958_v5  ;;  %2490 = vmatpush.bf16.msrb.mxu0 %v7338_v4  ;;  %v7662_v5 = vor.u32 %v9848_v58, %v7659_v59  ;;  %v7627_v9 = vld [vmem:[#allocation10 + $0x728] sm:$0xf0]  ;;  %v6897_v59 = vld [vmem:[#allocation10 + $0x150] sm:$0xf] }
 0x17c   :  { %v9624_v4 = vld [vmem:[#allocation10 + $0x4c] sm:$0xf]  ;;  %v7630_v19 = vor.u32 %v9840_v8, %v7627_v9 }
 0x17d   :  { %2527 = vmatpush.bf16.msrb.mxu3 %v7150_v12  ;;  %2505 = vmatpush.bf16.msrb.mxu1 %v7530_v20  ;;  %v7438_v12 = vor.u32 %v9792_v1, %v7435_v2  ;;  %v6763_v15 = vld [vmem:[#allocation10 + $0x68] sm:$0xf0]  ;;  %v7218_v20 = vor.u32 %v9741_v14, %v7217_v13  ;;  %v7089_v1 = vld [vmem:[#allocation10 + $0x2d0] sm:$0xf] }
 0x17e   :  { %v9784_v16 = vld [vmem:[#allocation10 + $0x54c] sm:$0xf]  ;;  %v9653_v13 = vld [vmem:[#allocation10 + $0x12c] sm:$0xf0] }
 0x17f   :  { %2513 = vmatpush.bf16.msrb.mxu2 %v6926_v18  ;;  %2491 = vmatpush.bf16.msrb.mxu0 %v7306_v28  ;;  %v7403_v18 = vld [vmem:[#allocation10 + $0x568] sm:$0xf0] }
 0x180   :  { %v9832_v21 = vld [vmem:[#allocation10 + $0x6cc] sm:$0xf]  ;;  %v7406_v25 = vor.u32 %v9784_v16, %v7403_v18  ;;  %v9701_v18 = vld [vmem:[#allocation10 + $0x2ac] sm:$0xf0] }
 0x181   :  { %2528 = vmatpush.bf16.msrb.mxu3 %v7118_v24  ;;  %2506 = vmatpush.bf16.msrb.mxu1 %v7498_v36  ;;  %v7595_v22 = vld [vmem:[#allocation10 + $0x6e8] sm:$0xf0]  ;;  %v6766_v24 = vor.u32 %v9624_v4, %v6763_v15  ;;  %v7186_v36 = vor.u32 %v9733_v27, %v7185_v26  ;;  %v7057_v15 = vld [vmem:[#allocation10 + $0x290] sm:$0xf] }
 0x182   :  { %v9616_v28 = vld [vmem:[#allocation10 + $0xc] sm:$0xf]  ;;  %v7473_v26 = vld [vmem:[#allocation10 + $0x5d0] sm:$0xf] }
 0x183   :  { %2514 = vmatpush.bf16.msrb.mxu2 %v6894_v33  ;;  %2492 = vmatpush.bf16.msrb.mxu0 %v7274_v42  ;;  %v6731_v29 = vld [vmem:[#allocation10 + $0x28] sm:$0xf0]  ;;  %v7598_v33 = vor.u32 %v9832_v21, %v7595_v22  ;;  %v9725_v42 = vld [vmem:[#allocation10 + $0x36c] sm:$0xf0] }
 0x184   :  { %2507 = vmatmul.bf16.vlgmr.msrb.gmra.mxu1 %v10699_v61  ;;  %v9776_v30 = vld [vmem:[#allocation10 + $0x50c] sm:$0xf]  ;;  %v7154_v49 = vor.u32 %v9725_v42, %v7153_v41  ;;  %v9805_v27 = vld [vmem:[#allocation10 + $0x5ec] sm:$0xf0] }
 0x185   :  { %2529 = vmatpush.bf16.msrb.mxu3 %v7086_v39  ;;  %2551 = vmatpush.bf16.msra.mxu1 %v7726_v40  ;;  %v7371_v32 = vld [vmem:[#allocation10 + $0x528] sm:$0xf0]  ;;  %v6734_v39 = vor.u32 %v9616_v28, %v6731_v29  ;;  %v7058_v28 = vor.u32 %v9701_v18, %v7057_v15  ;;  %v7474_v35 = vor.u32 %v9805_v27, %v7473_v26  ;;  %v9797_v41 = vld [vmem:[#allocation10 + $0x5ac] sm:$0xf0]  ;;  %v9721_v15 = vld [vmem:[#allocation10 + $0x354] sm:$0xf] }
 0x186   :  { %v9824_v37 = vld [vmem:[#allocation10 + $0x68c] sm:$0xf]  ;;  %v7374_v40 = vor.u32 %v9776_v30, %v7371_v32  ;;  %v7025_v32 = vld [vmem:[#allocation10 + $0x250] sm:$0xf]  ;;  %v7155_v18 = vld [vmem:[#allocation10 + $0x370] sm:$0xf0] }
 0x187   :  { %2515 = vmatpush.bf16.msrb.mxu2 %v6862_v46  ;;  %2493 = vmatpush.bf16.msrb.mxu0 %v7242_v56  ;;  %v7563_v38 = vld [vmem:[#allocation10 + $0x6a8] sm:$0xf0]  ;;  %v7537_v26 = vld [vmem:[#allocation10 + $0x650] sm:$0xf] }
 0x188   :  { %v9768_v44 = vld [vmem:[#allocation10 + $0x4cc] sm:$0xf]  ;;  %v7566_v46 = vor.u32 %v9824_v37, %v7563_v38  ;;  %v9853_v37 = vld [vmem:[#allocation10 + $0x76c] sm:$0xf0] }
 0x189   :  { %2530 = vmatpush.bf16.msrb.mxu3 %v7054_v53  ;;  %2552 = vmatpush.bf16.msra.mxu1 %v7694_v54  ;;  %v7339_v45 = vld [vmem:[#allocation10 + $0x4e8] sm:$0xf0]  ;;  %v7121_v53 = vld [vmem:[#allocation10 + $0x310] sm:$0xf] }
 0x18a   :  { %2494 = vmatmul.bf16.vlgmr.msrb.gmra.mxu0 %v10703_v23  ;;  %v9816_v50 = vld [vmem:[#allocation10 + $0x64c] sm:$0xf]  ;;  %v7342_v52 = vor.u32 %v9768_v44, %v7339_v45  ;;  %v9717_v54 = vld [vmem:[#allocation10 + $0x32c] sm:$0xf0] }
 0x18b   :  { %2516 = vmatpush.bf16.msrb.mxu2 %v6830_v60  ;;  %2538 = vmatpush.bf16.msra.mxu0 %v7470_v62  ;;  %v7531_v51 = vld [vmem:[#allocation10 + $0x668] sm:$0xf0]  ;;  %v9661_v60 = vld [vmem:[#allocation10 + $0x16c] sm:$0xf0]  ;;  %v7122_v62 = vor.u32 %v9717_v54, %v7121_v53 }
 0x18c   :  { %v9760_v56 = vld [vmem:[#allocation10 + $0x48c] sm:$0xf]  ;;  %v7534_v58 = vor.u32 %v9816_v50, %v7531_v51  ;;  %v6898_v7 = vor.u32 %v9661_v60, %v6897_v59  ;;  %v6801_v38 = vld [vmem:[#allocation10 + $0x90] sm:$0xf]  ;;  %v9737_v50 = vld [vmem:[#allocation10 + $0x3d4] sm:$0xf] }
 0x18d   :  { %2531 = vmatpush.bf16.msrb.mxu3 %v7022_v3  ;;  %2553 = vmatpush.bf16.msra.mxu1 %v7662_v5  ;;  %v7307_v57 = vld [vmem:[#allocation10 + $0x4a8] sm:$0xf0]  ;;  %v9709_v3 = vld [vmem:[#allocation10 + $0x2ec] sm:$0xf0]  ;;  %v7219_v51 = vld [vmem:[#allocation10 + $0x3f0] sm:$0xf0] }
 0x18e   :  { %v9808_v63 = vld [vmem:[#allocation10 + $0x60c] sm:$0xf]  ;;  %v7310_v2 = vor.u32 %v9760_v56, %v7307_v57  ;;  %v7729_v5 = vld [vmem:[#allocation10 + $0x7d0] sm:$0xf]  ;;  %v7090_v14 = vor.u32 %v9709_v3, %v7089_v1  ;;  %v7187_v1 = vld [vmem:[#allocation10 + $0x3b0] sm:$0xf0] }
 0x18f   :  { %2517 = vmatpush.bf16.msrb.mxu2 %v6798_v11  ;;  %2539 = vmatpush.bf16.msra.mxu0 %v7438_v12  ;;  %v7499_v0 = vld [vmem:[#allocation10 + $0x628] sm:$0xf0]  ;;  %v6865_v12 = vld [vmem:[#allocation10 + $0x110] sm:$0xf]  ;;  %v7730_v4 = vor.u32 %v9869_v6, %v7729_v5 }
 0x190   :  { %v9752_v8 = vld [vmem:[#allocation10 + $0x44c] sm:$0xf]  ;;  %v7502_v11 = vor.u32 %v9808_v63, %v7499_v0  ;;  %v9685_v45 = vld [vmem:[#allocation10 + $0x22c] sm:$0xf0]  ;;  %v9729_v0 = vld [vmem:[#allocation10 + $0x394] sm:$0xf] }
 0x191   :  { %2532 = vmatpush.bf16.msrb.mxu3 %v6990_v10  ;;  %2554 = vmatpush.bf16.msra.mxu1 %v7630_v19  ;;  %v7275_v9 = vld [vmem:[#allocation10 + $0x468] sm:$0xf0]  ;;  %v7697_v10 = vld [vmem:[#allocation10 + $0x790] sm:$0xf] }
 0x192   :  { %v7278_v16 = vor.u32 %v9752_v8, %v7275_v9  ;;  %v9861_v19 = vld [vmem:[#allocation10 + $0x7ac] sm:$0xf0]  ;;  %v9744_v21 = vld [vmem:[#allocation10 + $0x40c] sm:$0xf]  ;;  %v6963_v8 = vld [vmem:[#allocation10 + $0x1f0] sm:$0xf0] }
 0x193   :  { %2518 = vmatpush.bf16.msrb.mxu2 %v6766_v24  ;;  %2540 = vmatpush.bf16.msra.mxu0 %v7406_v25  ;;  %v7243_v22 = vld [vmem:[#allocation10 + $0x428] sm:$0xf0]  ;;  %v6833_v24 = vld [vmem:[#allocation10 + $0xd0] sm:$0xf]  ;;  %v7698_v29 = vor.u32 %v9861_v19, %v7697_v10 }
 0x194   :  { %2533 = vmatmul.bf16.vlgmr.msrb.gmra.mxu3 %v10691_v17  ;;  %v9645_v25 = vld [vmem:[#allocation10 + $0xec] sm:$0xf0]  ;;  %v7246_v30 = vor.u32 %v9744_v21, %v7243_v22  ;;  %v6931_v21 = vld [vmem:[#allocation10 + $0x1b0] sm:$0xf0] }
 0x195   :  { %2577 = vmatpush.bf16.msra.mxu3 %v7218_v20  ;;  %2555 = vmatpush.bf16.msra.mxu1 %v7598_v33  ;;  %v6866_v20 = vor.u32 %v9653_v13, %v6865_v12  ;;  %v9693_v33 = vld [vmem:[#allocation10 + $0x26c] sm:$0xf0]  ;;  %v6834_v34 = vor.u32 %v9645_v25, %v6833_v24  ;;  %v7158_v24 = vor.u32 %v9721_v15, %v7155_v18  ;;  %v7443_v15 = vld [vmem:[#allocation10 + $0x5b0] sm:$0xf0] }
 0x196   :  { %v7026_v42 = vor.u32 %v9693_v33, %v7025_v32  ;;  %v9629_v53 = vld [vmem:[#allocation10 + $0x6c] sm:$0xf0]  ;;  %v9681_v18 = vld [vmem:[#allocation10 + $0x214] sm:$0xf] }
 0x197   :  { %2519 = vmatpush.bf16.msrb.mxu2 %v6734_v39  ;;  %2541 = vmatpush.bf16.msra.mxu0 %v7374_v40  ;;  %v9637_v39 = vld [vmem:[#allocation10 + $0xac] sm:$0xf0] }
 0x198   :  { %v7441_v40 = vld [vmem:[#allocation10 + $0x590] sm:$0xf]  ;;  %v6802_v48 = vor.u32 %v9637_v39, %v6801_v38 }
 0x199   :  { %2578 = vmatpush.bf16.msra.mxu3 %v7186_v36  ;;  %2556 = vmatpush.bf16.msra.mxu1 %v7566_v46  ;;  %v7665_v36 = vld [vmem:[#allocation10 + $0x750] sm:$0xf] }
 0x19a   :  { %2520 = vmatmul.bf16.vlgmr.msrb.gmra.mxu2 %v10695_v31  ;;  %v7666_v44 = vor.u32 %v9853_v37, %v7665_v36  ;;  %v7633_v46 = vld [vmem:[#allocation10 + $0x710] sm:$0xf] }
 0x19b   :  { %2564 = vmatpush.bf16.msra.mxu2 %v6962_v43  ;;  %2542 = vmatpush.bf16.msra.mxu0 %v7342_v52  ;;  %v6993_v43 = vld [vmem:[#allocation10 + $0x210] sm:$0xf]  ;;  %v7634_v57 = vor.u32 %v9845_v47, %v7633_v46 }
 0x19c   :  { %v6769_v52 = vld [vmem:[#allocation10 + $0x50] sm:$0xf]  ;;  %v6994_v56 = vor.u32 %v9685_v45, %v6993_v43  ;;  %v7731_v45 = vld [vmem:[#allocation10 + $0x7f0] sm:$0xf0] }
 0x19d   :  { %2579 = vmatpush.bf16.msra.mxu3 %v7154_v49  ;;  %2557 = vmatpush.bf16.msra.mxu1 %v7534_v58  ;;  %v7442_v49 = vor.u32 %v9797_v41, %v7441_v40  ;;  %v7409_v54 = vld [vmem:[#allocation10 + $0x550] sm:$0xf]  ;;  %v7222_v58 = vor.u32 %v9737_v50, %v7219_v51  ;;  %v9705_v41 = vld [vmem:[#allocation10 + $0x2d4] sm:$0xf] }
 0x19e   :  { %v7601_v59 = vld [vmem:[#allocation10 + $0x6d0] sm:$0xf] }
 0x19f   :  { %2565 = vmatpush.bf16.msra.mxu2 %v6930_v55  ;;  %2543 = vmatpush.bf16.msra.mxu0 %v7310_v2  ;;  %v9789_v55 = vld [vmem:[#allocation10 + $0x56c] sm:$0xf0] }
 0x1a0   :  { %v9837_v60 = vld [vmem:[#allocation10 + $0x6ec] sm:$0xf0]  ;;  %v7410_v63 = vor.u32 %v9789_v55, %v7409_v54  ;;  %v7059_v54 = vld [vmem:[#allocation10 + $0x2b0] sm:$0xf0] }
 0x1a1   :  { %2580 = vmatpush.bf16.msra.mxu3 %v7122_v62  ;;  %2558 = vmatpush.bf16.msra.mxu1 %v7502_v11  ;;  %v6770_v62 = vor.u32 %v9629_v53, %v6769_v52  ;;  %v6737_v2 = vld [vmem:[#allocation10 + $0x10] sm:$0xf]  ;;  %v7602_v9 = vor.u32 %v9837_v60, %v7601_v59  ;;  %v7190_v11 = vor.u32 %v9729_v0, %v7187_v1  ;;  %v9697_v53 = vld [vmem:[#allocation10 + $0x294] sm:$0xf] }
 0x1a2   :  { %v9621_v3 = vld [vmem:[#allocation10 + $0x2c] sm:$0xf0]  ;;  %v9801_v0 = vld [vmem:[#allocation10 + $0x5d4] sm:$0xf] }
 0x1a3   :  { %2566 = vmatpush.bf16.msra.mxu2 %v6898_v7  ;;  %2544 = vmatpush.bf16.msra.mxu0 %v7278_v16  ;;  %v7377_v5 = vld [vmem:[#allocation10 + $0x510] sm:$0xf]  ;;  %v9673_v7 = vld [vmem:[#allocation10 + $0x1d4] sm:$0xf]  ;;  %v6738_v12 = vor.u32 %v9621_v3, %v6737_v2  ;;  %v7062_v2 = vor.u32 %v9697_v53, %v7059_v54  ;;  %v7161_v53 = vld [vmem:[#allocation10 + $0x358] sm:$0xf] }
 0x1a4   :  { %2559 = vmatmul.bf16.vlgmr.msra.gmra.mxu1 %v10699_v61  ;;  %v9781_v6 = vld [vmem:[#allocation10 + $0x52c] sm:$0xf0]  ;;  %v6966_v16 = vor.u32 %v9673_v7, %v6963_v8  ;;  %v7475_v1 = vld [vmem:[#allocation10 + $0x5f0] sm:$0xf0] }
 0x1a5   :  { %2581 = vmatpush.bf16.msra.mxu3 %v7090_v14  ;;  %2603 = vmatpush.bf16.msrb.mxu1 %v7730_v4  ;;  %v7378_v13 = vor.u32 %v9781_v6, %v7377_v5  ;;  %v7569_v14 = vld [vmem:[#allocation10 + $0x690] sm:$0xf]  ;;  %v9689_v7 = vld [vmem:[#allocation10 + $0x254] sm:$0xf] }
 0x1a6   :  { %v9829_v4 = vld [vmem:[#allocation10 + $0x6ac] sm:$0xf0]  ;;  %v7027_v8 = vld [vmem:[#allocation10 + $0x270] sm:$0xf0] }
 0x1a7   :  { %2567 = vmatpush.bf16.msra.mxu2 %v6866_v20  ;;  %2545 = vmatpush.bf16.msra.mxu0 %v7246_v30  ;;  %v7345_v10 = vld [vmem:[#allocation10 + $0x4d0] sm:$0xf]  ;;  %v9665_v20 = vld [vmem:[#allocation10 + $0x194] sm:$0xf]  ;;  %v7570_v22 = vor.u32 %v9829_v4, %v7569_v14 }
 0x1a8   :  { %v9773_v19 = vld [vmem:[#allocation10 + $0x4ec] sm:$0xf0]  ;;  %v7123_v30 = vld [vmem:[#allocation10 + $0x330] sm:$0xf0] }
 0x1a9   :  { %2582 = vmatpush.bf16.msra.mxu3 %v7058_v28  ;;  %2604 = vmatpush.bf16.msrb.mxu1 %v7698_v29  ;;  %v7346_v25 = vor.u32 %v9773_v19, %v7345_v10  ;;  %v9821_v27 = vld [vmem:[#allocation10 + $0x66c] sm:$0xf0]  ;;  %v9713_v28 = vld [vmem:[#allocation10 + $0x314] sm:$0xf]  ;;  %v6934_v29 = vor.u32 %v9665_v20, %v6931_v21 }
 0x1aa   :  { %2546 = vmatmul.bf16.vlgmr.msra.gmra.mxu0 %v10703_v23  ;;  %v7313_v32 = vld [vmem:[#allocation10 + $0x490] sm:$0xf]  ;;  %v7538_v36 = vor.u32 %v9821_v27, %v7537_v26  ;;  %v7126_v38 = vor.u32 %v9713_v28, %v7123_v30  ;;  %v6803_v14 = vld [vmem:[#allocation10 + $0xb0] sm:$0xf0]  ;;  %v9742_v26 = vld [vmem:[#allocation10 + $0x3f4] sm:$0xf0] }
 0x1ab   :  { %2568 = vmatpush.bf16.msra.mxu2 %v6834_v34  ;;  %2590 = vmatpush.bf16.msrb.mxu0 %v7474_v35  ;;  %v9765_v33 = vld [vmem:[#allocation10 + $0x4ac] sm:$0xf0]  ;;  %v9657_v34 = vld [vmem:[#allocation10 + $0x154] sm:$0xf] }
 0x1ac   :  { %v6899_v35 = vld [vmem:[#allocation10 + $0x170] sm:$0xf0]  ;;  %v7505_v37 = vld [vmem:[#allocation10 + $0x610] sm:$0xf]  ;;  %v7314_v39 = vor.u32 %v9765_v33, %v7313_v32 }
 0x1ad   :  { %2583 = vmatpush.bf16.msra.mxu3 %v7026_v42  ;;  %2605 = vmatpush.bf16.msrb.mxu1 %v7666_v44  ;;  %v9813_v40 = vld [vmem:[#allocation10 + $0x62c] sm:$0xf0]  ;;  %v7091_v42 = vld [vmem:[#allocation10 + $0x2f0] sm:$0xf0]  ;;  %v6902_v43 = vor.u32 %v9657_v34, %v6899_v35 }
 0x1ae   :  { %v9865_v44 = vld [vmem:[#allocation10 + $0x7d4] sm:$0xf]  ;;  %v7281_v46 = vld [vmem:[#allocation10 + $0x450] sm:$0xf]  ;;  %v7506_v50 = vor.u32 %v9813_v40, %v7505_v37  ;;  %v7094_v51 = vor.u32 %v9705_v41, %v7091_v42  ;;  %v9734_v40 = vld [vmem:[#allocation10 + $0x3b4] sm:$0xf0] }
 0x1af   :  { %2569 = vmatpush.bf16.msra.mxu2 %v6802_v48  ;;  %2591 = vmatpush.bf16.msrb.mxu0 %v7442_v49  ;;  %v9757_v47 = vld [vmem:[#allocation10 + $0x46c] sm:$0xf0]  ;;  %v9649_v48 = vld [vmem:[#allocation10 + $0x114] sm:$0xf]  ;;  %v7734_v52 = vor.u32 %v9865_v44, %v7731_v45  ;;  %v6969_v45 = vld [vmem:[#allocation10 + $0x1d8] sm:$0xf] }
 0x1b0   :  { %v6867_v49 = vld [vmem:[#allocation10 + $0x130] sm:$0xf0]  ;;  %v7282_v55 = vor.u32 %v9757_v47, %v7281_v46  ;;  %v7249_v59 = vld [vmem:[#allocation10 + $0x410] sm:$0xf]  ;;  %v9678_v46 = vld [vmem:[#allocation10 + $0x1f4] sm:$0xf0] }
 0x1b1   :  { %2584 = vmatpush.bf16.msra.mxu3 %v6994_v56  ;;  %2606 = vmatpush.bf16.msrb.mxu1 %v7634_v57  ;;  %v6870_v56 = vor.u32 %v9649_v48, %v6867_v49  ;;  %v9857_v57 = vld [vmem:[#allocation10 + $0x794] sm:$0xf]  ;;  %v9749_v60 = vld [vmem:[#allocation10 + $0x42c] sm:$0xf0]  ;;  %v6970_v54 = vor.u32 %v9678_v46, %v6969_v45 }
 0x1b2   :  { %v7250_v5 = vor.u32 %v9749_v60, %v7249_v59  ;;  %v9793_v4 = vld [vmem:[#allocation10 + $0x594] sm:$0xf]  ;;  %v9670_v59 = vld [vmem:[#allocation10 + $0x1b4] sm:$0xf0] }
 0x1b3   :  { %2570 = vmatpush.bf16.msra.mxu2 %v6770_v62  ;;  %2592 = vmatpush.bf16.msrb.mxu0 %v7410_v63  ;;  %v9641_v62 = vld [vmem:[#allocation10 + $0xd4] sm:$0xf] }
 0x1b4   :  { %2585 = vmatmul.bf16.vlgmr.msra.gmra.mxu3 %v10691_v17  ;;  %v6835_v63 = vld [vmem:[#allocation10 + $0xf0] sm:$0xf0] }
 0x1b5   :  { %2629 = vmatpush.bf16.msrb.mxu3 %v7222_v58  ;;  %2607 = vmatpush.bf16.msrb.mxu1 %v7602_v9  ;;  %v7699_v58 = vld [vmem:[#allocation10 + $0x7b0] sm:$0xf0]  ;;  %v6838_v6 = vor.u32 %v9641_v62, %v6835_v63 }
 0x1b6   :  { %v7702_v3 = vor.u32 %v9857_v57, %v7699_v58  ;;  %v9849_v9 = vld [vmem:[#allocation10 + $0x754] sm:$0xf]  ;;  %v6937_v58 = vld [vmem:[#allocation10 + $0x198] sm:$0xf] }
 0x1b7   :  { %2571 = vmatpush.bf16.msra.mxu2 %v6738_v12  ;;  %2593 = vmatpush.bf16.msrb.mxu0 %v7378_v13  ;;  %v7667_v12 = vld [vmem:[#allocation10 + $0x770] sm:$0xf0] }
 0x1b8   :  { %v9633_v13 = vld [vmem:[#allocation10 + $0x94] sm:$0xf]  ;;  %v7670_v10 = vor.u32 %v9849_v9, %v7667_v12  ;;  %v9662_v9 = vld [vmem:[#allocation10 + $0x174] sm:$0xf0] }
 0x1b9   :  { %2630 = vmatpush.bf16.msrb.mxu3 %v7190_v11  ;;  %2608 = vmatpush.bf16.msrb.mxu1 %v7570_v22  ;;  %v7478_v11 = vor.u32 %v9801_v0, %v7475_v1  ;;  %v6806_v19 = vor.u32 %v9633_v13, %v6803_v14  ;;  %v6995_v20 = vld [vmem:[#allocation10 + $0x230] sm:$0xf0] }
 0x1ba   :  { %2572 = vmatmul.bf16.vlgmr.msra.gmra.mxu2 %v10695_v31  ;;  %v9841_v21 = vld [vmem:[#allocation10 + $0x714] sm:$0xf]  ;;  %v6998_v32 = vor.u32 %v9681_v18, %v6995_v20 }
 0x1bb   :  { %2616 = vmatpush.bf16.msrb.mxu2 %v6966_v16  ;;  %2594 = vmatpush.bf16.msrb.mxu0 %v7346_v25  ;;  %v7030_v16 = vor.u32 %v9689_v7, %v7027_v8  ;;  %v7635_v22 = vld [vmem:[#allocation10 + $0x730] sm:$0xf0]  ;;  %v7225_v25 = vld [vmem:[#allocation10 + $0x3d8] sm:$0xf] }
 0x1bc   :  { %v9625_v27 = vld [vmem:[#allocation10 + $0x54] sm:$0xf]  ;;  %v7638_v33 = vor.u32 %v9841_v21, %v7635_v22  ;;  %v7226_v34 = vor.u32 %v9742_v26, %v7225_v25  ;;  %v6905_v8 = vld [vmem:[#allocation10 + $0x158] sm:$0xf] }
 0x1bd   :  { %2631 = vmatpush.bf16.msrb.mxu3 %v7158_v24  ;;  %2609 = vmatpush.bf16.msrb.mxu1 %v7538_v36  ;;  %v7446_v24 = vor.u32 %v9793_v4, %v7443_v15  ;;  %v6771_v28 = vld [vmem:[#allocation10 + $0x70] sm:$0xf0]  ;;  %v7097_v15 = vld [vmem:[#allocation10 + $0x2d8] sm:$0xf]  ;;  %v6906_v18 = vor.u32 %v9662_v9, %v6905_v8  ;;  %v9738_v8 = vld [vmem:[#allocation10 + $0x3dc] sm:$0xf] }
 0x1be   :  { %v7411_v30 = vld [vmem:[#allocation10 + $0x570] sm:$0xf0]  ;;  %v6774_v37 = vor.u32 %v9625_v27, %v6771_v28  ;;  %v6873_v22 = vld [vmem:[#allocation10 + $0x118] sm:$0xf]  ;;  %v7227_v9 = vld [vmem:[#allocation10 + $0x3f8] sm:$0xf0] }
 0x1bf   :  { %2617 = vmatpush.bf16.msrb.mxu2 %v6934_v29  ;;  %2595 = vmatpush.bf16.msrb.mxu0 %v7314_v39  ;;  %v9785_v29 = vld [vmem:[#allocation10 + $0x554] sm:$0xf]  ;;  %v7193_v39 = vld [vmem:[#allocation10 + $0x398] sm:$0xf] }
 0x1c0   :  { %v9833_v35 = vld [vmem:[#allocation10 + $0x6d4] sm:$0xf]  ;;  %v7194_v48 = vor.u32 %v9734_v40, %v7193_v39  ;;  %v6841_v39 = vld [vmem:[#allocation10 + $0xd8] sm:$0xf] }
 0x1c1   :  { %2632 = vmatpush.bf16.msrb.mxu3 %v7126_v38  ;;  %2610 = vmatpush.bf16.msrb.mxu1 %v7506_v50  ;;  %v7603_v36 = vld [vmem:[#allocation10 + $0x6f0] sm:$0xf0]  ;;  %v7414_v38 = vor.u32 %v9785_v29, %v7411_v30  ;;  %v7065_v29 = vld [vmem:[#allocation10 + $0x298] sm:$0xf] }
 0x1c2   :  { %v9617_v41 = vld [vmem:[#allocation10 + $0x14] sm:$0xf]  ;;  %v7606_v47 = vor.u32 %v9833_v35, %v7603_v36  ;;  %v9702_v30 = vld [vmem:[#allocation10 + $0x2b4] sm:$0xf0] }
 0x1c3   :  { %2618 = vmatpush.bf16.msrb.mxu2 %v6902_v43  ;;  %2596 = vmatpush.bf16.msrb.mxu0 %v7282_v55  ;;  %v6739_v42 = vld [vmem:[#allocation10 + $0x30] sm:$0xf0]  ;;  %v9726_v55 = vld [vmem:[#allocation10 + $0x374] sm:$0xf0] }
 0x1c4   :  { %2611 = vmatmul.bf16.vlgmr.msrb.gmra.mxu1 %v10699_v61  ;;  %v9777_v43 = vld [vmem:[#allocation10 + $0x514] sm:$0xf]  ;;  %v6742_v49 = vor.u32 %v9617_v41, %v6739_v42  ;;  %v7162_v62 = vor.u32 %v9726_v55, %v7161_v53  ;;  %v7705_v35 = vld [vmem:[#allocation10 + $0x798] sm:$0xf] }
 0x1c5   :  { %2633 = vmatpush.bf16.msrb.mxu3 %v7094_v51  ;;  %2655 = vmatpush.bf16.msra.mxu1 %v7734_v52  ;;  %v7379_v44 = vld [vmem:[#allocation10 + $0x530] sm:$0xf0]  ;;  %v9862_v36 = vld [vmem:[#allocation10 + $0x7b4] sm:$0xf0] }
 0x1c6   :  { %v7382_v50 = vor.u32 %v9777_v43, %v7379_v44  ;;  %v9825_v51 = vld [vmem:[#allocation10 + $0x694] sm:$0xf]  ;;  %v9646_v40 = vld [vmem:[#allocation10 + $0xf4] sm:$0xf0]  ;;  %v7066_v44 = vor.u32 %v9702_v30, %v7065_v29  ;;  %v7706_v45 = vor.u32 %v9862_v36, %v7705_v35 }
 0x1c7   :  { %2619 = vmatpush.bf16.msrb.mxu2 %v6870_v56  ;;  %2597 = vmatpush.bf16.msrb.mxu0 %v7250_v5  ;;  %v7571_v52 = vld [vmem:[#allocation10 + $0x6b0] sm:$0xf0]  ;;  %v9718_v5 = vld [vmem:[#allocation10 + $0x334] sm:$0xf0] }
 0x1c8   :  { %v9769_v56 = vld [vmem:[#allocation10 + $0x4d4] sm:$0xf]  ;;  %v7574_v60 = vor.u32 %v9825_v51, %v7571_v52  ;;  %v7481_v42 = vld [vmem:[#allocation10 + $0x5d8] sm:$0xf] }
 0x1c9   :  { %2634 = vmatpush.bf16.msrb.mxu3 %v7062_v2  ;;  %2656 = vmatpush.bf16.msra.mxu1 %v7702_v3  ;;  %v7347_v57 = vld [vmem:[#allocation10 + $0x4f0] sm:$0xf0]  ;;  %v7129_v2 = vld [vmem:[#allocation10 + $0x318] sm:$0xf]  ;;  %v6938_v3 = vor.u32 %v9670_v59, %v6937_v58 }
 0x1ca   :  { %2598 = vmatmul.bf16.vlgmr.msrb.gmra.mxu0 %v10703_v23  ;;  %v7350_v63 = vor.u32 %v9769_v56, %v7347_v57  ;;  %v9817_v0 = vld [vmem:[#allocation10 + $0x654] sm:$0xf]  ;;  %v7130_v13 = vor.u32 %v9718_v5, %v7129_v2  ;;  %v9806_v43 = vld [vmem:[#allocation10 + $0x5f4] sm:$0xf0] }
 0x1cb   :  { %2620 = vmatpush.bf16.msrb.mxu2 %v6838_v6  ;;  %2642 = vmatpush.bf16.msra.mxu0 %v7478_v11  ;;  %v7539_v1 = vld [vmem:[#allocation10 + $0x670] sm:$0xf0]  ;;  %v7482_v52 = vor.u32 %v9806_v43, %v7481_v42  ;;  %v9854_v53 = vld [vmem:[#allocation10 + $0x774] sm:$0xf0]  ;;  %v9722_v43 = vld [vmem:[#allocation10 + $0x35c] sm:$0xf] }
 0x1cc   :  { %v9761_v6 = vld [vmem:[#allocation10 + $0x494] sm:$0xf]  ;;  %v7542_v11 = vor.u32 %v9817_v0, %v7539_v1  ;;  %v9638_v55 = vld [vmem:[#allocation10 + $0xb4] sm:$0xf0] }
 0x1cd   :  { %2635 = vmatpush.bf16.msrb.mxu3 %v7030_v16  ;;  %2657 = vmatpush.bf16.msra.mxu1 %v7670_v10  ;;  %v7315_v7 = vld [vmem:[#allocation10 + $0x4b0] sm:$0xf0]  ;;  %v9710_v16 = vld [vmem:[#allocation10 + $0x2f4] sm:$0xf0] }
 0x1ce   :  { %v9809_v12 = vld [vmem:[#allocation10 + $0x614] sm:$0xf]  ;;  %v7318_v14 = vor.u32 %v9761_v6, %v7315_v7  ;;  %v7737_v10 = vld [vmem:[#allocation10 + $0x7d8] sm:$0xf]  ;;  %v7098_v27 = vor.u32 %v9710_v16, %v7097_v15  ;;  %v7230_v16 = vor.u32 %v9738_v8, %v7227_v9 }
 0x1cf   :  { %2621 = vmatpush.bf16.msrb.mxu2 %v6806_v19  ;;  %2643 = vmatpush.bf16.msra.mxu0 %v7446_v24  ;;  %v7507_v4 = vld [vmem:[#allocation10 + $0x630] sm:$0xf0]  ;;  %v9870_v19 = vld [vmem:[#allocation10 + $0x7f4] sm:$0xf0] }
 0x1d0   :  { %v9753_v20 = vld [vmem:[#allocation10 + $0x454] sm:$0xf]  ;;  %v9654_v24 = vld [vmem:[#allocation10 + $0x134] sm:$0xf0]  ;;  %v7510_v25 = vor.u32 %v9809_v12, %v7507_v4  ;;  %v7738_v28 = vor.u32 %v9870_v19, %v7737_v10 }
 0x1d1   :  { %2636 = vmatpush.bf16.msrb.mxu3 %v6998_v32  ;;  %2658 = vmatpush.bf16.msra.mxu1 %v7638_v33  ;;  %v7283_v21 = vld [vmem:[#allocation10 + $0x470] sm:$0xf0]  ;;  %v10723_v32 = vld [vmem:[#allocation11] sm:$0xff]  ;;  %v7449_v57 = vld [vmem:[#allocation10 + $0x598] sm:$0xf] }
 0x1d2   :  { %v7286_v33 = vor.u32 %v9753_v20, %v7283_v21  ;;  %v1060_v41 = vperm.slane %v10723_v32, 0  ;;  %v9798_v58 = vld [vmem:[#allocation10 + $0x5b4] sm:$0xf0] }
 0x1d3   :  { %2622 = vmatpush.bf16.msrb.mxu2 %v6774_v37  ;;  %2644 = vmatpush.bf16.msra.mxu0 %v7414_v38  ;;  %v9745_v37 = vld [vmem:[#allocation10 + $0x414] sm:$0xf]  ;;  %v9686_v1 = vld [vmem:[#allocation10 + $0x234] sm:$0xf0]  ;;  %v7450_v7 = vor.u32 %v9798_v58, %v7449_v57  ;;  %v9714_v57 = vld [vmem:[#allocation10 + $0x31c] sm:$0xf] }
 0x1d4   :  { %2637 = vmatmul.bf16.vlgmr.msrb.gmra.mxu3 %v10691_v17  ;;  %v7251_v38 = vld [vmem:[#allocation10 + $0x430] sm:$0xf0]  ;;  %v7641_v2 = vld [vmem:[#allocation10 + $0x718] sm:$0xf] }
 0x1d5   :  { %2681 = vmatpush.bf16.msra.mxu3 %v7226_v34  ;;  %2659 = vmatpush.bf16.msra.mxu1 %v7606_v47  ;;  %v6874_v34 = vor.u32 %v9654_v24, %v6873_v22  ;;  %v7254_v46 = vor.u32 %v9745_v37, %v7251_v38  ;;  %v6842_v47 = vor.u32 %v9646_v40, %v6841_v39  ;;  %v9630_v12 = vld [vmem:[#allocation10 + $0x74] sm:$0xf0]  ;;  %v9730_v22 = vld [vmem:[#allocation10 + $0x39c] sm:$0xf] }
 0x1d6   :  { %v9838_v10 = vld [vmem:[#allocation10 + $0x6f4] sm:$0xf0]  ;;  %v7195_v24 = vld [vmem:[#allocation10 + $0x3b8] sm:$0xf0] }
 0x1d7   :  { %2623 = vmatpush.bf16.msrb.mxu2 %v6742_v49  ;;  %2645 = vmatpush.bf16.msra.mxu0 %v7382_v50  ;;  %v2378_v26 = vpop.f32.mrf.mxu3  ;;  %v9694_v49 = vld [vmem:[#allocation10 + $0x274] sm:$0xf0]  ;;  %v7198_v37 = vor.u32 %v9730_v22, %v7195_v24  ;;  %v9698_v24 = vld [vmem:[#allocation10 + $0x29c] sm:$0xf] }
 0x1d8   :  { %v7673_v50 = vld [vmem:[#allocation10 + $0x758] sm:$0xf] }
 0x1d9   :  { %2682 = vmatpush.bf16.msra.mxu3 %v7194_v48  ;;  %2660 = vmatpush.bf16.msra.mxu1 %v7574_v60  ;;  %v7033_v48 = vld [vmem:[#allocation10 + $0x258] sm:$0xf] }
 0x1da   :  { %2624 = vmatmul.bf16.vlgmr.msrb.gmra.mxu2 %v10695_v31  ;;  %v7034_v60 = vor.u32 %v9694_v49, %v7033_v48  ;;  %v9830_v42 = vld [vmem:[#allocation10 + $0x6b4] sm:$0xf0]  ;;  %v9666_v49 = vld [vmem:[#allocation10 + $0x19c] sm:$0xf] }
 0x1db   :  { %2668 = vmatpush.bf16.msra.mxu2 %v6970_v54  ;;  %2646 = vmatpush.bf16.msra.mxu0 %v7350_v63  ;;  %v6809_v54 = vld [vmem:[#allocation10 + $0x98] sm:$0xf]  ;;  %v7674_v63 = vor.u32 %v9854_v53, %v7673_v50  ;;  %v6939_v50 = vld [vmem:[#allocation10 + $0x1b8] sm:$0xf0] }
 0x1dc   :  { %v6810_v0 = vor.u32 %v9638_v55, %v6809_v54  ;;  %v9774_v48 = vld [vmem:[#allocation10 + $0x4f4] sm:$0xf0]  ;;  %v6942_v58 = vor.u32 %v9666_v49, %v6939_v50  ;;  %v9850_v49 = vld [vmem:[#allocation10 + $0x75c] sm:$0xf] }
 0x1dd   :  { %2683 = vmatpush.bf16.msra.mxu3 %v7162_v62  ;;  %2661 = vmatpush.bf16.msra.mxu1 %v7542_v11  ;;  %v2365_v51 = vpop.f32.mrf.mxu2  ;;  %v7001_v62 = vld [vmem:[#allocation10 + $0x218] sm:$0xf] }
 0x1de   :  { %v2366_v56 = vadd.f32 %v2365_v51, %v1060_v41  ;;  %v6777_v11 = vld [vmem:[#allocation10 + $0x58] sm:$0xf]  ;;  %v7002_v4 = vor.u32 %v9686_v1, %v7001_v62  ;;  %v9658_v1 = vld [vmem:[#allocation10 + $0x15c] sm:$0xf] }
 0x1df   :  { %2669 = vmatpush.bf16.msra.mxu2 %v6938_v3  ;;  %2647 = vmatpush.bf16.msra.mxu0 %v7318_v14  ;;  %v2380_v59 = vpop.f32.mrf.mxu3  ;;  %v9846_v3 = vld [vmem:[#allocation10 + $0x734] sm:$0xf0]  ;;  %v6778_v20 = vor.u32 %v9630_v12, %v6777_v11  ;;  %v9706_v11 = vld [vmem:[#allocation10 + $0x2dc] sm:$0xf] }
 0x1e0   :  { %v2379_v5 = vadd.f32 %v2378_v26, %v2366_v56  ;;  %v9790_v14 = vld [vmem:[#allocation10 + $0x574] sm:$0xf0]  ;;  %v7642_v15 = vor.u32 %v9846_v3, %v7641_v2  ;;  %v7131_v59 = vld [vmem:[#allocation10 + $0x338] sm:$0xf0] }
 0x1e1   :  { %2684 = vmatpush.bf16.msra.mxu3 %v7130_v13  ;;  %2662 = vmatpush.bf16.msra.mxu1 %v7510_v25  ;;  %v2404_v6 = vpop.f32.mrf.mxu1  ;;  %v7417_v13 = vld [vmem:[#allocation10 + $0x558] sm:$0xf]  ;;  %v6907_v2 = vld [vmem:[#allocation10 + $0x178] sm:$0xf0] }
 0x1e2   :  { %v7418_v21 = vor.u32 %v9790_v14, %v7417_v13  ;;  %v6745_v25 = vld [vmem:[#allocation10 + $0x18] sm:$0xf]  ;;  %v7099_v12 = vld [vmem:[#allocation10 + $0x2f8] sm:$0xf0]  ;;  %v6910_v13 = vor.u32 %v9658_v1, %v6907_v2 }
 0x1e3   :  { %2670 = vmatpush.bf16.msra.mxu2 %v6906_v18  ;;  %2648 = vmatpush.bf16.msra.mxu0 %v7286_v33  ;;  %v7609_v18 = vld [vmem:[#allocation10 + $0x6d8] sm:$0xf]  ;;  %v9674_v33 = vld [vmem:[#allocation10 + $0x1dc] sm:$0xf] }
 0x1e4   :  { %2663 = vmatmul.bf16.vlgmr.msra.gmra.mxu1 %v10699_v61  ;;  %v9622_v26 = vld [vmem:[#allocation10 + $0x34] sm:$0xf0]  ;;  %v7610_v36 = vor.u32 %v9838_v10, %v7609_v18  ;;  %v9866_v14 = vld [vmem:[#allocation10 + $0x7dc] sm:$0xf] }
 0x1e5   :  { %2685 = vmatpush.bf16.msra.mxu3 %v7098_v27  ;;  %2707 = vmatpush.bf16.msrb.mxu1 %v7738_v28  ;;  %v2367_v19 = vpop.f32.mrf.mxu2  ;;  %v7385_v27 = vld [vmem:[#allocation10 + $0x518] sm:$0xf]  ;;  %v6746_v39 = vor.u32 %v9622_v26, %v6745_v25  ;;  %v9650_v18 = vld [vmem:[#allocation10 + $0x11c] sm:$0xf] }
 0x1e6   :  { %v9782_v28 = vld [vmem:[#allocation10 + $0x534] sm:$0xf0]  ;;  %v6875_v10 = vld [vmem:[#allocation10 + $0x138] sm:$0xf0] }
 0x1e7   :  { %2671 = vmatpush.bf16.msra.mxu2 %v6874_v34  ;;  %2649 = vmatpush.bf16.msra.mxu0 %v7254_v46  ;;  %v2391_v29 = vpop.f32.mrf.mxu0  ;;  %v10728_v30 = vpop.f32.mrf.mxu3  ;;  %v6971_v34 = vld [vmem:[#allocation10 + $0x1f8] sm:$0xf0]  ;;  %v7386_v40 = vor.u32 %v9782_v28, %v7385_v27  ;;  %v7577_v41 = vld [vmem:[#allocation10 + $0x698] sm:$0xf]  ;;  %v6878_v27 = vor.u32 %v9650_v18, %v6875_v10 }
 0x1e8   :  { %v2392_v35 = vadd.f32 %v2391_v29, %v2379_v5  ;;  %v7163_v46 = vld [vmem:[#allocation10 + $0x378] sm:$0xf0]  ;;  %v7578_v51 = vor.u32 %v9830_v42, %v7577_v41  ;;  %v7545_v55 = vld [vmem:[#allocation10 + $0x658] sm:$0xf] }
 0x1e9   :  { %2686 = vmatpush.bf16.msra.mxu3 %v7066_v44  ;;  %2708 = vmatpush.bf16.msrb.mxu1 %v7706_v45  ;;  %v2406_v38 = vpop.f32.mrf.mxu1  ;;  %v6974_v45 = vor.u32 %v9674_v33, %v6971_v34  ;;  %v7166_v53 = vor.u32 %v9722_v43, %v7163_v46  ;;  %v9822_v56 = vld [vmem:[#allocation10 + $0x674] sm:$0xf0]  ;;  %v7067_v25 = vld [vmem:[#allocation10 + $0x2b8] sm:$0xf0] }
 0x1ea   :  { %2650 = vmatmul.bf16.vlgmr.msra.gmra.mxu0 %v10703_v23  ;;  %v10730_v44 = vadd.f32 %v2404_v6, %v2392_v35  ;;  %v9766_v62 = vld [vmem:[#allocation10 + $0x4b4] sm:$0xf0]  ;;  %v7546_v3 = vor.u32 %v9822_v56, %v7545_v55  ;;  %v9858_v28 = vld [vmem:[#allocation10 + $0x79c] sm:$0xf]  ;;  %v7070_v42 = vor.u32 %v9698_v24, %v7067_v25 }
 0x1eb   :  { %2672 = vmatpush.bf16.msra.mxu2 %v6842_v47  ;;  %2694 = vmatpush.bf16.msrb.mxu0 %v7482_v52  ;;  %v7353_v47 = vld [vmem:[#allocation10 + $0x4d8] sm:$0xf]  ;;  %v7707_v29 = vld [vmem:[#allocation10 + $0x7b8] sm:$0xf0] }
 0x1ec   :  { %v7354_v54 = vor.u32 %v9774_v48, %v7353_v47  ;;  %v7513_v5 = vld [vmem:[#allocation10 + $0x618] sm:$0xf]  ;;  %v6843_v38 = vld [vmem:[#allocation10 + $0xf8] sm:$0xf0]  ;;  %v7710_v43 = vor.u32 %v9858_v28, %v7707_v29  ;;  %v7941_v28 = vld [vmem:[#allocation13 + $0x188] sm:$0xf] }
 0x1ed   :  { %2687 = vmatpush.bf16.msra.mxu3 %v7034_v60  ;;  %2709 = vmatpush.bf16.msrb.mxu1 %v7674_v63  ;;  %v10733_v52 = vpop.f32.mrf.mxu2  ;;  %v7321_v60 = vld [vmem:[#allocation10 + $0x498] sm:$0xf]  ;;  %v9690_v47 = vld [vmem:[#allocation10 + $0x25c] sm:$0xf]  ;;  %v9923_v29 = vld [vmem:[#allocation13 + $0x1a0] sm:$0xf0] }
 0x1ee   :  { %v7322_v8 = vor.u32 %v9766_v62, %v7321_v60  ;;  %v9814_v9 = vld [vmem:[#allocation10 + $0x634] sm:$0xf0]  ;;  %v7035_v48 = vld [vmem:[#allocation10 + $0x278] sm:$0xf0]  ;;  %vm2772_vm7 = vcmp.ge.f32.partialorder %v10730_v44, 0.0 }
 0x1ef   :  { %2673 = vmatpush.bf16.msra.mxu2 %v6810_v0  ;;  %2695 = vmatpush.bf16.msrb.mxu0 %v7450_v7  ;;  %v2393_v63 = vpop.f32.mrf.mxu0  ;;  %v2432_v0 = vpop.f32.mrf.mxu3  ;;  %v7134_v7 = vor.u32 %v9714_v57, %v7131_v59  ;;  %v7514_v19 = vor.u32 %v9814_v9, %v7513_v5  ;;  %v7257_v33 = vld [vmem:[#allocation10 + $0x418] sm:$0xf]  ;;  %v9794_v55 = vld [vmem:[#allocation10 + $0x59c] sm:$0xf]  ;;  %v7038_v57 = vor.u32 %v9690_v47, %v7035_v48 }
 0x1f0   :  { %v7451_v56 = vld [vmem:[#allocation10 + $0x5b8] sm:$0xf0] }
 0x1f1   :  { %2688 = vmatpush.bf16.msra.mxu3 %v7002_v4  ;;  %2710 = vmatpush.bf16.msrb.mxu1 %v7642_v15  ;;  %v10736_v6 = vpop.f32.mrf.mxu1  ;;  %v7739_v4 = vld [vmem:[#allocation10 + $0x7f8] sm:$0xf0]  ;;  %v7289_v15 = vld [vmem:[#allocation10 + $0x458] sm:$0xf]  ;;  %v7454_v5 = vor.u32 %v9794_v55, %v7451_v56 }
 0x1f2   :  { %v7742_v22 = vor.u32 %v9866_v14, %v7739_v4  ;;  %v7003_v63 = vld [vmem:[#allocation10 + $0x238] sm:$0xf0] }
 0x1f3   :  { %2674 = vmatpush.bf16.msra.mxu2 %v6778_v20  ;;  %2696 = vmatpush.bf16.msrb.mxu0 %v7418_v21  ;;  %v7102_v21 = vor.u32 %v9706_v11, %v7099_v12  ;;  %v9842_v0 = vld [vmem:[#allocation10 + $0x71c] sm:$0xf] }
 0x1f4   :  { %2689 = vmatmul.bf16.vlgmr.msra.gmra.mxu3 %v10691_v17  ;;  %v7643_v1 = vld [vmem:[#allocation10 + $0x738] sm:$0xf0] }
 0x1f5   :  { %2733 = vmatpush.bf16.msrb.mxu3 %v7230_v16  ;;  %2711 = vmatpush.bf16.msrb.mxu1 %v7610_v36  ;;  %v9758_v16 = vld [vmem:[#allocation10 + $0x474] sm:$0xf0]  ;;  %v2419_v20 = vpop.f32.mrf.mxu2  ;;  %v9626_v9 = vld [vmem:[#allocation10 + $0x5c] sm:$0xf] }
 0x1f6   :  { %v7290_v26 = vor.u32 %v9758_v16, %v7289_v15  ;;  %v9750_v36 = vld [vmem:[#allocation10 + $0x434] sm:$0xf0]  ;;  %v6779_v11 = vld [vmem:[#allocation10 + $0x78] sm:$0xf0]  ;;  %v7646_v15 = vor.u32 %v9842_v0, %v7643_v1 }
 0x1f7   :  { %2675 = vmatpush.bf16.msra.mxu2 %v6746_v39  ;;  %2697 = vmatpush.bf16.msrb.mxu0 %v7386_v40  ;;  %v10738_v34 = vpop.f32.mrf.mxu0  ;;  %v10740_v35 = vpop.f32.mrf.mxu3  ;;  %v9802_v39 = vld [vmem:[#allocation10 + $0x5dc] sm:$0xf] }
 0x1f8   :  { %v7483_v40 = vld [vmem:[#allocation10 + $0x5f8] sm:$0xf0] }
 0x1f9   :  { %2734 = vmatpush.bf16.msrb.mxu3 %v7198_v37  ;;  %2712 = vmatpush.bf16.msrb.mxu1 %v7578_v51  ;;  %v9642_v37 = vld [vmem:[#allocation10 + $0xdc] sm:$0xf]  ;;  %v2458_v41 = vpop.f32.mrf.mxu1  ;;  %v7486_v50 = vor.u32 %v9802_v39, %v7483_v40 }
 0x1fa   :  { %2676 = vmatmul.bf16.vlgmr.msra.gmra.mxu2 %v10695_v31  ;;  %v6846_v46 = vor.u32 %v9642_v37, %v6843_v38  ;;  %v7675_v51 = vld [vmem:[#allocation10 + $0x778] sm:$0xf0] }
 0x1fb   :  { %2720 = vmatpush.bf16.msrb.mxu2 %v6974_v45  ;;  %2698 = vmatpush.bf16.msrb.mxu0 %v7354_v54  ;;  %v7258_v45 = vor.u32 %v9750_v36, %v7257_v33  ;;  %v6811_v54 = vld [vmem:[#allocation10 + $0xb8] sm:$0xf0]  ;;  %v7678_v60 = vor.u32 %v9850_v49, %v7675_v51  ;;  %v1061_v49 = vperm.slane %v10723_v32, 1  ;;  %v7913_v51 = vld [vmem:[#allocation13 + $0x150] sm:$0xf] }
 0x1fc   :  { %v9786_v12 = vld [vmem:[#allocation10 + $0x55c] sm:$0xf] }
 0x1fd   :  { %2735 = vmatpush.bf16.msrb.mxu3 %v7166_v53  ;;  %2713 = vmatpush.bf16.msrb.mxu1 %v7546_v3  ;;  %v9634_v53 = vld [vmem:[#allocation10 + $0x9c] sm:$0xf]  ;;  %v10743_v59 = vpop.f32.mrf.mxu2  ;;  %v2418_v1 = vadd.f32 %v10733_v52, %v1061_v49  ;;  %v7997_v49 = vld [vmem:[#allocation13 + $0x1f8] sm:$0xf] }
 0x1fe   :  { %v6814_v62 = vor.u32 %v9634_v53, %v6811_v54  ;;  %v9834_v18 = vld [vmem:[#allocation10 + $0x6dc] sm:$0xf]  ;;  %v9916_v53 = vld [vmem:[#allocation13 + $0x168] sm:$0xf0] }
 0x1ff   :  { %2721 = vmatpush.bf16.msrb.mxu2 %v6942_v58  ;;  %2699 = vmatpush.bf16.msrb.mxu0 %v7322_v8  ;;  %v9682_v58 = vld [vmem:[#allocation10 + $0x21c] sm:$0xf]  ;;  %v2445_v2 = vpop.f32.mrf.mxu0  ;;  %v2484_v3 = vpop.f32.mrf.mxu3  ;;  %v9979_v8 = vld [vmem:[#allocation13 + $0x360] sm:$0xf0] }
 0x200   :  { %v7006_v4 = vor.u32 %v9682_v58, %v7003_v63  ;;  %v7611_v10 = vld [vmem:[#allocation10 + $0x6f8] sm:$0xf0]  ;;  %v8081_v58 = vld [vmem:[#allocation13 + $0x2a0] sm:$0xf]  ;;  %v7885_v2 = vld [vmem:[#allocation13 + $0x118] sm:$0xf] }
 0x201   :  { %2736 = vmatpush.bf16.msrb.mxu3 %v7134_v7  ;;  %2714 = vmatpush.bf16.msrb.mxu1 %v7514_v19  ;;  %v8165_v7 = vld [vmem:[#allocation13 + $0x348] sm:$0xf]  ;;  %v10746_v14 = vpop.f32.mrf.mxu1  ;;  %v6782_v19 = vor.u32 %v9626_v9, %v6779_v11  ;;  %v9618_v24 = vld [vmem:[#allocation10 + $0x1c] sm:$0xf]  ;;  %v7614_v36 = vor.u32 %v9834_v18, %v7611_v10  ;;  %v10091_v18 = vld [vmem:[#allocation13 + $0x6e0] sm:$0xf0]  ;;  %v2431_v10 = vadd.f32 %v10728_v30, %v2418_v1 }
 0x202   :  { %v8166_v16 = vor.u32 %v9979_v8, %v8165_v7  ;;  %v6747_v25 = vld [vmem:[#allocation10 + $0x38] sm:$0xf0]  ;;  %v10084_v30 = vld [vmem:[#allocation13 + $0x6a8] sm:$0xf0] }
 0x203   :  { %2722 = vmatpush.bf16.msrb.mxu2 %v6910_v13  ;;  %2700 = vmatpush.bf16.msrb.mxu0 %v7290_v26  ;;  %v7419_v13 = vld [vmem:[#allocation10 + $0x578] sm:$0xf0]  ;;  %v6750_v38 = vor.u32 %v9618_v24, %v6747_v25 }
 0x204   :  { %2715 = vmatmul.bf16.vlgmr.msrb.gmra.mxu1 %v10699_v61  ;;  %v7422_v20 = vor.u32 %v9786_v12, %v7419_v13  ;;  %v9778_v26 = vld [vmem:[#allocation10 + $0x51c] sm:$0xf]  ;;  %v8053_v12 = vld [vmem:[#allocation13 + $0x268] sm:$0xf]  ;;  %v9951_v13 = vld [vmem:[#allocation13 + $0x280] sm:$0xf0] }
 0x205   :  { %2737 = vmatpush.bf16.msrb.mxu3 %v7102_v21  ;;  %2759 = vmatpush.bf16.msra.mxu1 %v7742_v22  ;;  %v8137_v21 = vld [vmem:[#allocation13 + $0x310] sm:$0xf]  ;;  %v9972_v22 = vld [vmem:[#allocation13 + $0x328] sm:$0xf0]  ;;  %v2471_v33 = vpop.f32.mrf.mxu2  ;;  %v9826_v40 = vld [vmem:[#allocation10 + $0x69c] sm:$0xf]  ;;  %v8054_v24 = vor.u32 %v9951_v13, %v8053_v12 }
 0x206   :  { %v8138_v37 = vor.u32 %v9972_v22, %v8137_v21  ;;  %v7579_v41 = vld [vmem:[#allocation10 + $0x6b8] sm:$0xf0]  ;;  %v2444_v22 = vadd.f32 %v10738_v34, %v2431_v10  ;;  %v10035_v34 = vld [vmem:[#allocation13 + $0x520] sm:$0xf0]  ;;  %v2780_v10 = vmul.f32 0.2, %v10730_v44 }
 0x207   :  { %2723 = vmatpush.bf16.msrb.mxu2 %v6878_v27  ;;  %2701 = vmatpush.bf16.msrb.mxu0 %v7258_v45  ;;  %v7387_v27 = vld [vmem:[#allocation10 + $0x538] sm:$0xf0]  ;;  %v7942_v45 = vor.u32 %v9923_v29, %v7941_v28  ;;  %v7582_v54 = vor.u32 %v9826_v40, %v7579_v41  ;;  %v9895_v40 = vld [vmem:[#allocation13 + $0xc0] sm:$0xf0]  ;;  %v8389_v41 = vld [vmem:[#allocation13 + $0x508] sm:$0xf] }
 0x208   :  { %v7390_v39 = vor.u32 %v9778_v26, %v7387_v27  ;;  %v9770_v47 = vld [vmem:[#allocation10 + $0x4dc] sm:$0xf]  ;;  %v8025_v26 = vld [vmem:[#allocation13 + $0x230] sm:$0xf]  ;;  %v9944_v27 = vld [vmem:[#allocation13 + $0x248] sm:$0xf0] }
 0x209   :  { %2738 = vmatpush.bf16.msrb.mxu3 %v7070_v42  ;;  %2760 = vmatpush.bf16.msra.mxu1 %v7710_v43  ;;  %v8109_v42 = vld [vmem:[#allocation13 + $0x2d8] sm:$0xf]  ;;  %v10749_v43 = vpop.f32.mrf.mxu0  ;;  %v7355_v48 = vld [vmem:[#allocation10 + $0x4f8] sm:$0xf0] }
 0x20a   :  { %2702 = vmatmul.bf16.vlgmr.msrb.gmra.mxu0 %v10703_v23  ;;  %v7358_v56 = vor.u32 %v9770_v47, %v7355_v48  ;;  %v9762_v63 = vld [vmem:[#allocation10 + $0x49c] sm:$0xf] }
 0x20b   :  { %2724 = vmatpush.bf16.msrb.mxu2 %v6846_v46  ;;  %2746 = vmatpush.bf16.msra.mxu0 %v7486_v50  ;;  %v9965_v46 = vld [vmem:[#allocation13 + $0x2f0] sm:$0xf0]  ;;  %v2510_v50 = vpop.f32.mrf.mxu1 }
 0x20c   :  { %v8110_v55 = vor.u32 %v9965_v46, %v8109_v42  ;;  %v7323_v0 = vld [vmem:[#allocation10 + $0x4b8] sm:$0xf0]  ;;  %v2457_v42 = vadd.f32 %v10736_v6, %v2444_v22  ;;  %v10028_v6 = vld [vmem:[#allocation13 + $0x4e8] sm:$0xf0]  ;;  %v10063_v22 = vld [vmem:[#allocation13 + $0x600] sm:$0xf0] }
 0x20d   :  { %2739 = vmatpush.bf16.msrb.mxu3 %v7038_v57  ;;  %2761 = vmatpush.bf16.msra.mxu1 %v7678_v60  ;;  %v9818_v57 = vld [vmem:[#allocation10 + $0x65c] sm:$0xf]  ;;  %v7914_v60 = vor.u32 %v9916_v53, %v7913_v51  ;;  %v7326_v9 = vor.u32 %v9762_v63, %v7323_v0  ;;  %v8557_v51 = vld [vmem:[#allocation13 + $0x658] sm:$0xf]  ;;  %v8390_v53 = vor.u32 %v10035_v34, %v8389_v41  ;;  %v7969_v63 = vld [vmem:[#allocation13 + $0x1c0] sm:$0xf] }
 0x20e   :  { %v9909_v3 = vld [vmem:[#allocation13 + $0x130] sm:$0xf0]  ;;  %vm2773_vm6 = vcmp.ge.f32.partialorder %v2457_v42, 0.0 }
 0x20f   :  { %2725 = vmatpush.bf16.msrb.mxu2 %v6814_v62  ;;  %2747 = vmatpush.bf16.msra.mxu0 %v7454_v5  ;;  %v9958_v62 = vld [vmem:[#allocation13 + $0x2b8] sm:$0xf0]  ;;  %v9810_v7 = vld [vmem:[#allocation10 + $0x61c] sm:$0xf] }
 0x210   :  { %v8082_v8 = vor.u32 %v9958_v62, %v8081_v58  ;;  %v7515_v11 = vld [vmem:[#allocation10 + $0x638] sm:$0xf0]  ;;  %v2781_v58 = vmul.f32 0.2, %v2457_v42 }
 0x211   :  { %2740 = vmatpush.bf16.msrb.mxu3 %v7006_v4  ;;  %2762 = vmatpush.bf16.msra.mxu1 %v7646_v15  ;;  %v2497_v4 = vpop.f32.mrf.mxu0  ;;  %v7886_v15 = vor.u32 %v9909_v3, %v7885_v2  ;;  %v9754_v52 = vld [vmem:[#allocation10 + $0x45c] sm:$0xf]  ;;  %v7518_v21 = vor.u32 %v9810_v7, %v7515_v11  ;;  %v9930_v2 = vld [vmem:[#allocation13 + $0x1d8] sm:$0xf0]  ;;  %v8529_v3 = vld [vmem:[#allocation13 + $0x620] sm:$0xf] }
 0x212   :  { %v9937_v50 = vld [vmem:[#allocation13 + $0x210] sm:$0xf0]  ;;  %v8333_v11 = vld [vmem:[#allocation13 + $0x498] sm:$0xf]  ;;  %v9061_v4 = vld [vmem:[#allocation13 + $0xa48] sm:$0xf] }
 0x213   :  { %2726 = vmatpush.bf16.msrb.mxu2 %v6782_v19  ;;  %2748 = vmatpush.bf16.msra.mxu0 %v7422_v20  ;;  %v7291_v19 = vld [vmem:[#allocation10 + $0x478] sm:$0xf0]  ;;  %v7857_v20 = vld [vmem:[#allocation13 + $0xe0] sm:$0xf]  ;;  %v7998_v62 = vor.u32 %v9937_v50, %v7997_v49  ;;  %v8473_v49 = vld [vmem:[#allocation13 + $0x5b0] sm:$0xf] }
 0x214   :  { %2741 = vmatmul.bf16.vlgmr.msrb.gmra.mxu3 %v10691_v17  ;;  %v7547_v17 = vld [vmem:[#allocation10 + $0x678] sm:$0xf0]  ;;  %v7294_v29 = vor.u32 %v9754_v52, %v7291_v19  ;;  %v7970_v52 = vor.u32 %v9930_v2, %v7969_v63  ;;  %v10056_v50 = vld [vmem:[#allocation13 + $0x5c8] sm:$0xf0] }
 0x215   :  { %5649 = vmatpush.bf16.msra.mxu3 %v8166_v16  ;;  %2763 = vmatpush.bf16.msra.mxu1 %v7614_v36  ;;  %v7550_v5 = vor.u32 %v9818_v57, %v7547_v17  ;;  %v8613_v16 = vld [vmem:[#allocation13 + $0x6c8] sm:$0xf]  ;;  %v8585_v36 = vld [vmem:[#allocation13 + $0x690] sm:$0xf]  ;;  %v10021_v13 = vld [vmem:[#allocation13 + $0x4b0] sm:$0xf0] }
 0x216   :  { %v8614_v25 = vor.u32 %v10091_v18, %v8613_v16  ;;  %v8586_v46 = vor.u32 %v10084_v30, %v8585_v36  ;;  %v8361_v17 = vld [vmem:[#allocation13 + $0x4d0] sm:$0xf]  ;;  %v2789_v16 = vsel %vm2773_vm6, %v2457_v42, %v2781_v58  ;;  %v1062_v18 = vperm.slane %v10723_v32, 2  ;;  %v10014_v36 = vld [vmem:[#allocation13 + $0x478] sm:$0xf0] }
 0x217   :  { %2727 = vmatpush.bf16.msrb.mxu2 %v6750_v38  ;;  %2749 = vmatpush.bf16.msra.mxu0 %v7390_v39  ;;  %v10756_v28 = vpop.f32.mrf.mxu3  ;;  %v7259_v38 = vld [vmem:[#allocation10 + $0x438] sm:$0xf0]  ;;  %v7829_v39 = vld [vmem:[#allocation13 + $0xa8] sm:$0xf]  ;;  %v8362_v7 = vor.u32 %v10028_v6, %v8361_v17  ;;  %v10147_v30 = vld [vmem:[#allocation13 + $0x8a0] sm:$0xf0]  ;;  %v8474_v58 = vor.u32 %v10056_v50, %v8473_v49 }
 0x218   :  { %v7830_v48 = vor.u32 %v9895_v40, %v7829_v39  ;;  %v9033_v39 = vld [vmem:[#allocation13 + $0xa10] sm:$0xf]  ;;  %v10196_v40 = vld [vmem:[#allocation13 + $0xa28] sm:$0xf0]  ;;  %v9005_v17 = vld [vmem:[#allocation13 + $0x9d8] sm:$0xf] }
 0x219   :  { %5650 = vmatpush.bf16.msra.mxu3 %v8138_v37  ;;  %2764 = vmatpush.bf16.msra.mxu1 %v7582_v54  ;;  %v9746_v37 = vld [vmem:[#allocation10 + $0x41c] sm:$0xf]  ;;  %v8893_v50 = vld [vmem:[#allocation13 + $0x8f8] sm:$0xf] }
 0x21a   :  { %2728 = vmatmul.bf16.vlgmr.msrb.gmra.mxu2 %v10695_v31  ;;  %v9902_v31 = vld [vmem:[#allocation13 + $0xf8] sm:$0xf0]  ;;  %v7262_v47 = vor.u32 %v9746_v37, %v7259_v38  ;;  %v10077_v54 = vld [vmem:[#allocation13 + $0x670] sm:$0xf0]  ;;  %v10768_v37 = vpack.c.bf16 %v2789_v16, %v2789_v16  ;;  %v2470_v38 = vadd.f32 %v10743_v59, %v1062_v18  ;;  %v8277_v59 = vld [vmem:[#allocation13 + $0x428] sm:$0xf] }
 0x21b   :  { %5636 = vmatpush.bf16.msra.mxu2 %v7942_v45  ;;  %2750 = vmatpush.bf16.msra.mxu0 %v7358_v56  ;;  %v7858_v33 = vor.u32 %v9902_v31, %v7857_v20  ;;  %v8026_v45 = vor.u32 %v9944_v27, %v8025_v26  ;;  %v9888_v56 = vld [vmem:[#allocation13 + $0x88] sm:$0xf0]  ;;  %v8558_v0 = vor.u32 %v10077_v54, %v8557_v51  ;;  %v9874_v26 = vld [vmem:[#allocation13 + $0x18] sm:$0xf0]  ;;  %v8305_v27 = vld [vmem:[#allocation13 + $0x460] sm:$0xf] }
 0x21c   :  { %v10007_v54 = vld [vmem:[#allocation13 + $0x440] sm:$0xf0]  ;;  %v10189_v6 = vld [vmem:[#allocation13 + $0x9f0] sm:$0xf0]  ;;  %v8221_v18 = vld [vmem:[#allocation13 + $0x3b8] sm:$0xf] }
 0x21d   :  { %5651 = vmatpush.bf16.msra.mxu3 %v8110_v55  ;;  %2765 = vmatpush.bf16.msra.mxu1 %v7550_v5  ;;  %v7801_v55 = vld [vmem:[#allocation13 + $0x70] sm:$0xf]  ;;  %v2521_v57 = vpop.f32.mrf.mxu2  ;;  %v10070_v5 = vld [vmem:[#allocation13 + $0x638] sm:$0xf0] }
 0x21e   :  { %v8530_v20 = vor.u32 %v10070_v5, %v8529_v3  ;;  %v10000_v3 = vld [vmem:[#allocation13 + $0x408] sm:$0xf0]  ;;  %v10133_v5 = vld [vmem:[#allocation13 + $0x830] sm:$0xf0] }
 0x21f   :  { %5637 = vmatpush.bf16.msra.mxu2 %v7914_v60  ;;  %2751 = vmatpush.bf16.msra.mxu0 %v7326_v9  ;;  %v1063_v60 = vperm.slane %v10723_v32, 3  ;;  %v2536_v1 = vpop.f32.mrf.mxu3  ;;  %v9881_v9 = vld [vmem:[#allocation13 + $0x50] sm:$0xf0] }
 0x220   :  { %v10049_v1 = vld [vmem:[#allocation13 + $0x590] sm:$0xf0] }
 0x221   :  { %5652 = vmatpush.bf16.msra.mxu3 %v8082_v8  ;;  %2766 = vmatpush.bf16.msra.mxu1 %v7518_v21  ;;  %v7773_v8 = vld [vmem:[#allocation13 + $0x38] sm:$0xf]  ;;  %v10761_v12 = vpop.f32.mrf.mxu1  ;;  %v2522_v19 = vadd.f32 %v2521_v57, %v1063_v60  ;;  %v8501_v21 = vld [vmem:[#allocation13 + $0x5e8] sm:$0xf]  ;;  %v2483_v57 = vadd.f32 %v10740_v35, %v2470_v38 }
 0x222   :  { %v7774_v31 = vor.u32 %v9881_v9, %v7773_v8  ;;  %v8502_v41 = vor.u32 %v10063_v22, %v8501_v21  ;;  %v8781_v35 = vld [vmem:[#allocation13 + $0x818] sm:$0xf]  ;;  %v8977_v8 = vld [vmem:[#allocation13 + $0x9a0] sm:$0xf]  ;;  %v10182_v9 = vld [vmem:[#allocation13 + $0x9b8] sm:$0xf0] }
 0x223   :  { %5638 = vmatpush.bf16.msra.mxu2 %v7886_v15  ;;  %2752 = vmatpush.bf16.msra.mxu0 %v7294_v29  ;;  %v10203_v15 = vld [vmem:[#allocation13 + $0xa60] sm:$0xf0]  ;;  %v2535_v34 = vadd.f32 %v10756_v28, %v2522_v19  ;;  %v10140_v28 = vld [vmem:[#allocation13 + $0x868] sm:$0xf0]  ;;  %v2496_v60 = vadd.f32 %v10749_v43, %v2483_v57  ;;  %v8782_v16 = vor.u32 %v10133_v5, %v8781_v35  ;;  %v8753_v19 = vld [vmem:[#allocation13 + $0x7e0] sm:$0xf] }
 0x224   :  { %2767 = vmatmul.bf16.vlgmr.msra.gmra.mxu1 %v10699_v61  ;;  %v7802_v61 = vor.u32 %v9888_v56, %v7801_v55  ;;  %v9062_v29 = vor.u32 %v10203_v15, %v9061_v4  ;;  %v8809_v55 = vld [vmem:[#allocation13 + $0x850] sm:$0xf]  ;;  %v9034_v56 = vor.u32 %v10196_v40, %v9033_v39  ;;  %v8949_v21 = vld [vmem:[#allocation13 + $0x968] sm:$0xf]  ;;  %v10175_v22 = vld [vmem:[#allocation13 + $0x980] sm:$0xf0] }
 0x225   :  { %5653 = vmatpush.bf16.msra.mxu3 %v8054_v24  ;;  %5675 = vmatpush.bf16.msrb.mxu1 %v8614_v25  ;;  %v8334_v24 = vor.u32 %v10021_v13, %v8333_v11  ;;  %v7745_v25 = vld [vmem:[#allocation13] sm:$0xf]  ;;  %v8810_v63 = vor.u32 %v10140_v28, %v8809_v55  ;;  %v2509_v4 = vadd.f32 %v10746_v14, %v2496_v60  ;;  %v8921_v39 = vld [vmem:[#allocation13 + $0x930] sm:$0xf]  ;;  %v10168_v40 = vld [vmem:[#allocation13 + $0x948] sm:$0xf0] }
 0x226   :  { %v8417_v13 = vld [vmem:[#allocation13 + $0x540] sm:$0xf]  ;;  %v8950_v38 = vor.u32 %v10175_v22, %v8949_v21  ;;  %v8922_v49 = vor.u32 %v10168_v40, %v8921_v39  ;;  %v9257_v55 = vld [vmem:[#allocation13 + $0xbd0] sm:$0xf]  ;;  %v10252_v28 = vld [vmem:[#allocation13 + $0xbe8] sm:$0xf0] }
 0x227   :  { %5639 = vmatpush.bf16.msra.mxu2 %v7858_v33  ;;  %2753 = vmatpush.bf16.msra.mxu0 %v7262_v47  ;;  %v2523_v33 = vpop.f32.mrf.mxu2  ;;  %v2547_v42 = vpop.f32.mrf.mxu0  ;;  %v8306_v47 = vor.u32 %v10014_v36, %v8305_v27  ;;  %vm2774_vm9 = vcmp.ge.f32.partialorder %v2509_v4, 0.0  ;;  %v10105_v60 = vld [vmem:[#allocation13 + $0x750] sm:$0xf0]  ;;  %v9976_v35 = vld [vmem:[#allocation13 + $0x34c] sm:$0xf] }
 0x228   :  { %v2548_v51 = vadd.f32 %v2547_v42, %v2535_v34  ;;  %v9986_v33 = vld [vmem:[#allocation13 + $0x398] sm:$0xf0]  ;;  %v10259_v34 = vld [vmem:[#allocation13 + $0xc20] sm:$0xf0]  ;;  %v8167_v5 = vld [vmem:[#allocation13 + $0x364] sm:$0xf0] }
 0x229   :  { %5654 = vmatpush.bf16.msra.mxu3 %v8026_v45  ;;  %5676 = vmatpush.bf16.msrb.mxu1 %v8586_v46  ;;  %v7746_v45 = vor.u32 %v9874_v26, %v7745_v25  ;;  %v2788_v46 = vsel %vm2772_vm7, %v10730_v44, %v2780_v10  ;;  %v2782_v25 = vmul.f32 0.2, %v2509_v4  ;;  %v9913_v22 = vld [vmem:[#allocation13 + $0x154] sm:$0xf]  ;;  %v9906_v39 = vld [vmem:[#allocation13 + $0x11c] sm:$0xf] }
 0x22a   :  { %2754 = vmatmul.bf16.vlgmr.msra.gmra.mxu0 %v10703_v23  ;;  %v8837_v23 = vld [vmem:[#allocation13 + $0x888] sm:$0xf]  ;;  %v10777_v44 = vpack.c.bf16 %v2788_v46, %v2788_v46  ;;  %v2561_v2 = vadd.f32 %v10761_v12, %v2548_v51  ;;  %v10042_v12 = vld [vmem:[#allocation13 + $0x558] sm:$0xf0]  ;;  %v7887_v40 = vld [vmem:[#allocation13 + $0x134] sm:$0xf0] }
 0x22b   :  { %5640 = vmatpush.bf16.msra.mxu2 %v7830_v48  ;;  %5662 = vmatpush.bf16.msrb.mxu0 %v8390_v53  ;;  %v8838_v48 = vor.u32 %v10147_v30, %v8837_v23  ;;  %v2562_v53 = vpop.f32.mrf.mxu1  ;;  %v8725_v23 = vld [vmem:[#allocation13 + $0x7a8] sm:$0xf]  ;;  %v10119_v30 = vld [vmem:[#allocation13 + $0x7c0] sm:$0xf0]  ;;  %v2790_v51 = vsel %vm2774_vm9, %v2509_v4, %v2782_v25 }
 0x22c   :  { %v2783_v10 = vmul.f32 0.2, %v2561_v2  ;;  %vm2775_vm8 = vcmp.ge.f32.partialorder %v2561_v2, 0.0  ;;  %v8726_v46 = vor.u32 %v10119_v30, %v8725_v23  ;;  %v9962_v23 = vld [vmem:[#allocation13 + $0x2dc] sm:$0xf] }
 0x22d   :  { %5655 = vmatpush.bf16.msra.mxu3 %v7998_v62  ;;  %5677 = vmatpush.bf16.msrb.mxu1 %v8558_v0  ;;  %v8278_v62 = vor.u32 %v10007_v54, %v8277_v59  ;;  %v8445_v0 = vld [vmem:[#allocation13 + $0x578] sm:$0xf]  ;;  %v10161_v54 = vld [vmem:[#allocation13 + $0x910] sm:$0xf0] }
 0x22e   :  { %v8446_v43 = vor.u32 %v10049_v1, %v8445_v0  ;;  %v2791_v36 = vsel %vm2775_vm8, %v2561_v2, %v2783_v10  ;;  %v9258_v0 = vor.u32 %v10252_v28, %v9257_v55  ;;  %v10154_v1 = vld [vmem:[#allocation13 + $0x8d8] sm:$0xf0]  ;;  %v10245_v2 = vld [vmem:[#allocation13 + $0xbb0] sm:$0xf0]  ;;  %v8139_v10 = vld [vmem:[#allocation13 + $0x32c] sm:$0xf0] }
 0x22f   :  { %5641 = vmatpush.bf16.msra.mxu2 %v7802_v61  ;;  %5663 = vmatpush.bf16.msrb.mxu0 %v8362_v7  ;;  %v8249_v61 = vld [vmem:[#allocation13 + $0x3f0] sm:$0xf]  ;;  %v9006_v7 = vor.u32 %v10189_v6, %v9005_v17  ;;  %v2549_v11 = vpop.f32.mrf.mxu0  ;;  %v10785_v42 = vpack.c.bf16 %v2791_v36, %v2791_v36  ;;  %v10789_v6 = vpack.c.bf16 %v2790_v51, %v2790_v51  ;;  %v8111_v30 = vld [vmem:[#allocation13 + $0x2f4] sm:$0xf0]  ;;  %v9509_v28 = vld [vmem:[#allocation13 + $0xdc8] sm:$0xf] }
 0x230   :  { %v8250_v15 = vor.u32 %v10000_v3, %v8249_v61  ;;  %v9229_v61 = vld [vmem:[#allocation13 + $0xb98] sm:$0xf] }
 0x231   :  { %5656 = vmatpush.bf16.msra.mxu3 %v7970_v52  ;;  %5678 = vmatpush.bf16.msrb.mxu1 %v8530_v20  ;;  %v9993_v52 = vld [vmem:[#allocation13 + $0x3d0] sm:$0xf0]  ;;  %v10126_v20 = vld [vmem:[#allocation13 + $0x7f8] sm:$0xf0] }
 0x232   :  { %v8222_v26 = vor.u32 %v9993_v52, %v8221_v18  ;;  %v8754_v27 = vor.u32 %v10126_v20, %v8753_v19  ;;  %v10238_v18 = vld [vmem:[#allocation13 + $0xb78] sm:$0xf0]  ;;  %v9969_v52 = vld [vmem:[#allocation13 + $0x314] sm:$0xf] }
 0x233   :  { %5642 = vmatpush.bf16.msra.mxu2 %v7774_v31  ;;  %5664 = vmatpush.bf16.msrb.mxu0 %v8334_v24  ;;  %v8978_v31 = vor.u32 %v10182_v9, %v8977_v8  ;;  %v8418_v24 = vor.u32 %v10042_v12, %v8417_v13  ;;  %v8641_v8 = vld [vmem:[#allocation13 + $0x700] sm:$0xf]  ;;  %v10098_v9 = vld [vmem:[#allocation13 + $0x718] sm:$0xf0]  ;;  %v9230_v13 = vor.u32 %v10245_v2, %v9229_v61  ;;  %v9481_v61 = vld [vmem:[#allocation13 + $0xd90] sm:$0xf] }
 0x234   :  { %5657 = vmatmul.bf16.vlgmr.msra.gmra.mxu3 %v10768_v37  ;;  %v9201_v12 = vld [vmem:[#allocation13 + $0xb60] sm:$0xf]  ;;  %v8642_v20 = vor.u32 %v10098_v9, %v8641_v8  ;;  %v10308_v2 = vld [vmem:[#allocation13 + $0xda8] sm:$0xf0] }
 0x235   :  { %5701 = vmatpush.bf16.msrb.mxu3 %v9062_v29  ;;  %5679 = vmatpush.bf16.msrb.mxu1 %v8502_v41  ;;  %v8193_v29 = vld [vmem:[#allocation13 + $0x380] sm:$0xf]  ;;  %v9285_v41 = vld [vmem:[#allocation13 + $0xc08] sm:$0xf]  ;;  %v9482_v8 = vor.u32 %v10308_v2, %v9481_v61  ;;  %v9369_v2 = vld [vmem:[#allocation13 + $0xcb0] sm:$0xf] }
 0x236   :  { %v9286_v59 = vor.u32 %v10259_v34, %v9285_v41  ;;  %v9145_v34 = vld [vmem:[#allocation13 + $0xaf0] sm:$0xf] }
 0x237   :  { %5643 = vmatpush.bf16.msra.mxu2 %v7746_v45  ;;  %5665 = vmatpush.bf16.msrb.mxu0 %v8306_v47  ;;  %v10783_v14 = vpop.f32.mrf.mxu3  ;;  %v8194_v45 = vor.u32 %v9986_v33, %v8193_v29  ;;  %v8697_v47 = vld [vmem:[#allocation13 + $0x770] sm:$0xf]  ;;  %v9173_v29 = vld [vmem:[#allocation13 + $0xb28] sm:$0xf]  ;;  %v10231_v33 = vld [vmem:[#allocation13 + $0xb40] sm:$0xf0] }
 0x238   :  { %v9174_v41 = vor.u32 %v10231_v33, %v9173_v29  ;;  %v9425_v29 = vld [vmem:[#allocation13 + $0xd20] sm:$0xf]  ;;  %v10294_v33 = vld [vmem:[#allocation13 + $0xd38] sm:$0xf0] }
 0x239   :  { %5702 = vmatpush.bf16.msrb.mxu3 %v9034_v56  ;;  %5680 = vmatpush.bf16.msrb.mxu1 %v8474_v58  ;;  %v1064_v56 = vperm.slane %v10723_v32, 4  ;;  %v8669_v58 = vld [vmem:[#allocation13 + $0x738] sm:$0xf] }
 0x23a   :  { %5644 = vmatmul.bf16.vlgmr.msra.gmra.mxu2 %v10777_v44 }
 0x23b   :  { %5688 = vmatpush.bf16.msrb.mxu2 %v8838_v48  ;;  %5666 = vmatpush.bf16.msrb.mxu0 %v8278_v62  ;;  %v10112_v48 = vld [vmem:[#allocation13 + $0x788] sm:$0xf0]  ;;  %v8894_v62 = vor.u32 %v10161_v54, %v8893_v50  ;;  %v9899_v54 = vld [vmem:[#allocation13 + $0xe4] sm:$0xf] }
 0x23c   :  { %v8698_v17 = vor.u32 %v10112_v48, %v8697_v47  ;;  %v10224_v47 = vld [vmem:[#allocation13 + $0xb08] sm:$0xf0]  ;;  %v9955_v48 = vld [vmem:[#allocation13 + $0x2a4] sm:$0xf] }
 0x23d   :  { %5703 = vmatpush.bf16.msrb.mxu3 %v9006_v7  ;;  %5681 = vmatpush.bf16.msrb.mxu1 %v8446_v43  ;;  %v2573_v53 = vpop.f32.mrf.mxu2  ;;  %v8670_v7 = vor.u32 %v10105_v60, %v8669_v58  ;;  %v9920_v43 = vld [vmem:[#allocation13 + $0x18c] sm:$0xf]  ;;  %v9146_v55 = vor.u32 %v10224_v47, %v9145_v34  ;;  %v9117_v58 = vld [vmem:[#allocation13 + $0xab8] sm:$0xf]  ;;  %v10217_v60 = vld [vmem:[#allocation13 + $0xad0] sm:$0xf0] }
 0x23e   :  { %v2574_v32 = vadd.f32 %v2573_v53, %v1064_v56  ;;  %v7890_v53 = vor.u32 %v9906_v39, %v7887_v40  ;;  %v10315_v56 = vld [vmem:[#allocation13 + $0xde0] sm:$0xf0]  ;;  %v9426_v39 = vor.u32 %v10294_v33, %v9425_v29  ;;  %v10018_v47 = vld [vmem:[#allocation13 + $0x49c] sm:$0xf] }
 0x23f   :  { %5689 = vmatpush.bf16.msrb.mxu2 %v8810_v63  ;;  %5667 = vmatpush.bf16.msrb.mxu0 %v8250_v15  ;;  %v2588_v57 = vpop.f32.mrf.mxu3  ;;  %v8865_v63 = vld [vmem:[#allocation13 + $0x8c0] sm:$0xf]  ;;  %v7943_v15 = vld [vmem:[#allocation13 + $0x1a4] sm:$0xf0]  ;;  %v9927_v34 = vld [vmem:[#allocation13 + $0x1c4] sm:$0xf] }
 0x240   :  { %v8866_v11 = vor.u32 %v10154_v1, %v8865_v63  ;;  %v2587_v19 = vadd.f32 %v10783_v14, %v2574_v32  ;;  %v7946_v21 = vor.u32 %v9920_v43, %v7943_v15  ;;  %v7859_v57 = vld [vmem:[#allocation13 + $0xfc] sm:$0xf0]  ;;  %v9948_v63 = vld [vmem:[#allocation13 + $0x26c] sm:$0xf]  ;;  %v8027_v32 = vld [vmem:[#allocation13 + $0x24c] sm:$0xf0] }
 0x241   :  { %5704 = vmatpush.bf16.msrb.mxu3 %v8978_v31  ;;  %5682 = vmatpush.bf16.msrb.mxu1 %v8418_v24  ;;  %v2612_v3 = vpop.f32.mrf.mxu1  ;;  %v9202_v24 = vor.u32 %v10238_v18, %v9201_v12  ;;  %v9892_v1 = vld [vmem:[#allocation13 + $0xac] sm:$0xf]  ;;  %v10301_v12 = vld [vmem:[#allocation13 + $0xd70] sm:$0xf0]  ;;  %v10266_v29 = vld [vmem:[#allocation13 + $0xc58] sm:$0xf0] }
 0x242   :  { %v10032_v15 = vld [vmem:[#allocation13 + $0x50c] sm:$0xf] }
 0x243   :  { %5690 = vmatpush.bf16.msrb.mxu2 %v8782_v16  ;;  %5668 = vmatpush.bf16.msrb.mxu0 %v8222_v26  ;;  %v8170_v16 = vor.u32 %v9976_v35, %v8167_v5  ;;  %v7915_v26 = vld [vmem:[#allocation13 + $0x16c] sm:$0xf0]  ;;  %v7831_v35 = vld [vmem:[#allocation13 + $0xc4] sm:$0xf0]  ;;  %v9941_v5 = vld [vmem:[#allocation13 + $0x234] sm:$0xf] }
 0x244   :  { %5683 = vmatmul.bf16.vlgmr.msrb.gmra.mxu1 %v10785_v42  ;;  %v7918_v14 = vor.u32 %v9913_v22, %v7915_v26  ;;  %v8363_v26 = vld [vmem:[#allocation13 + $0x4ec] sm:$0xf0] }
 0x245   :  { %5705 = vmatpush.bf16.msrb.mxu3 %v8950_v38  ;;  %v2575_v4 = vpop.f32.mrf.mxu2 }
 0x246   :  { %v9453_v4 = vld [vmem:[#allocation13 + $0xd58] sm:$0xf] }
 0x247   :  { %5691 = vmatpush.bf16.msrb.mxu2 %v8754_v27  ;;  %5669 = vmatpush.bf16.msrb.mxu0 %v8194_v45  ;;  %v2599_v31 = vpop.f32.mrf.mxu0  ;;  %v8142_v27 = vor.u32 %v9969_v52, %v8139_v10  ;;  %v9454_v18 = vor.u32 %v10301_v12, %v9453_v4  ;;  %v7834_v52 = vor.u32 %v9892_v1, %v7831_v35  ;;  %v9341_v12 = vld [vmem:[#allocation13 + $0xc78] sm:$0xf] }
 0x248   :  { %v2600_v25 = vadd.f32 %v2599_v31, %v2587_v19  ;;  %v9885_v19 = vld [vmem:[#allocation13 + $0x74] sm:$0xf]  ;;  %v8030_v31 = vor.u32 %v9941_v5, %v8027_v32  ;;  %v8811_v32 = vld [vmem:[#allocation13 + $0x86c] sm:$0xf0] }
 0x249   :  { %5706 = vmatpush.bf16.msrb.mxu3 %v8922_v49  ;;  %v2614_v36 = vpop.f32.mrf.mxu1  ;;  %v8083_v49 = vld [vmem:[#allocation13 + $0x2bc] sm:$0xf0]  ;;  %v10137_v5 = vld [vmem:[#allocation13 + $0x854] sm:$0xf] }
 0x24a   :  { %5670 = vmatmul.bf16.vlgmr.msrb.gmra.mxu0 %v10789_v6  ;;  %v2613_v38 = vadd.f32 %v2612_v3, %v2600_v25  ;;  %v7862_v3 = vor.u32 %v9899_v54, %v7859_v57  ;;  %v10025_v25 = vld [vmem:[#allocation13 + $0x4d4] sm:$0xf]  ;;  %v10798_v36 = vld [vmem:[#allocation11] sm:$0xff]  ;;  %v10144_v57 = vld [vmem:[#allocation13 + $0x88c] sm:$0xf] }
 0x24b   :  { %5692 = vmatpush.bf16.msrb.mxu2 %v8726_v46  ;;  %5714 = vmatpush.bf16.msra.mxu0 %v9286_v59  ;;  %v8114_v46 = vor.u32 %v9962_v23, %v8111_v30  ;;  %v1065_v23 = vperm.slane %v10798_v36, 5 }
 0x24c   :  { %vm2776_vm10 = vcmp.ge.f32.partialorder %v2613_v38, 0.0  ;;  %v2784_v45 = vmul.f32 0.2, %v2613_v38 }
 0x24d   :  { %5707 = vmatpush.bf16.msrb.mxu3 %v8894_v62  ;;  %v9510_v62 = vor.u32 %v10315_v56, %v9509_v28  ;;  %v7747_v56 = vld [vmem:[#allocation13 + $0x1c] sm:$0xf0] }
 0x24e   :  { %v2792_v50 = vsel %vm2776_vm10, %v2613_v38, %v2784_v45  ;;  %v9878_v38 = vld [vmem:[#allocation13 + $0x3c] sm:$0xf]  ;;  %v7971_v45 = vld [vmem:[#allocation13 + $0x1dc] sm:$0xf0] }
 0x24f   :  { %5693 = vmatpush.bf16.msrb.mxu2 %v8698_v17  ;;  %5715 = vmatpush.bf16.msra.mxu0 %v9258_v0  ;;  %v10793_v59 = vpack.c.bf16 %v2792_v50, %v2792_v50  ;;  %v2601_v51 = vpop.f32.mrf.mxu0  ;;  %v8086_v17 = vor.u32 %v9955_v48, %v8083_v49  ;;  %v8055_v0 = vld [vmem:[#allocation13 + $0x284] sm:$0xf0]  ;;  %v8335_v48 = vld [vmem:[#allocation13 + $0x4b4] sm:$0xf0]  ;;  %v10287_v50 = vld [vmem:[#allocation13 + $0xd00] sm:$0xf0] }
 0x250   :  { %5727 = vmatpush.bf16.msra.mxu1 %v9510_v62  ;;  %v8058_v43 = vor.u32 %v9948_v63, %v8055_v0  ;;  %v9397_v49 = vld [vmem:[#allocation13 + $0xce8] sm:$0xf]  ;;  %v10011_v62 = vld [vmem:[#allocation13 + $0x464] sm:$0xf]  ;;  %v8307_v63 = vld [vmem:[#allocation13 + $0x47c] sm:$0xf0] }
 0x251   :  { %5708 = vmatpush.bf16.msrb.mxu3 %v8866_v11  ;;  %v9089_v11 = vld [vmem:[#allocation13 + $0xa80] sm:$0xf]  ;;  %v9398_v51 = vor.u32 %v10287_v50, %v9397_v49  ;;  %v8223_v49 = vld [vmem:[#allocation13 + $0x3d4] sm:$0xf0] }
 0x253   :  { %5694 = vmatpush.bf16.msrb.mxu2 %v8670_v7  ;;  %5716 = vmatpush.bf16.msra.mxu0 %v9230_v13  ;;  %v9118_v7 = vor.u32 %v10217_v60, %v9117_v58  ;;  %v10210_v13 = vld [vmem:[#allocation13 + $0xa98] sm:$0xf0]  ;;  %v7974_v58 = vor.u32 %v9927_v34, %v7971_v45  ;;  %v8338_v60 = vor.u32 %v10018_v47, %v8335_v48  ;;  %v9035_v34 = vld [vmem:[#allocation13 + $0xa2c] sm:$0xf0]  ;;  %v8615_v47 = vld [vmem:[#allocation13 + $0x6e4] sm:$0xf0] }
 0x254   :  { %5728 = vmatpush.bf16.msra.mxu1 %v9482_v8  ;;  %v9090_v10 = vor.u32 %v10210_v13, %v9089_v11  ;;  %v10004_v11 = vld [vmem:[#allocation13 + $0x42c] sm:$0xf]  ;;  %v8279_v13 = vld [vmem:[#allocation13 + $0x444] sm:$0xf0]  ;;  %v9990_v48 = vld [vmem:[#allocation13 + $0x3bc] sm:$0xf] }
 0x255   :  { %5753 = vmatpush.bf16.msra.mxu3 %v8170_v16  ;;  %v8391_v16 = vld [vmem:[#allocation13 + $0x524] sm:$0xf0] }
 0x256   :  { %v8394_v22 = vor.u32 %v10032_v15, %v8391_v16  ;;  %v8814_v16 = vor.u32 %v10137_v5, %v8811_v32  ;;  %v8699_v5 = vld [vmem:[#allocation13 + $0x78c] sm:$0xf0]  ;;  %v10179_v32 = vld [vmem:[#allocation13 + $0x9a4] sm:$0xf] }
 0x257   :  { %5695 = vmatpush.bf16.msrb.mxu2 %v8642_v20  ;;  %5717 = vmatpush.bf16.msra.mxu0 %v9202_v24  ;;  %v10796_v9 = vpop.f32.mrf.mxu3  ;;  %v7803_v20 = vld [vmem:[#allocation13 + $0x8c] sm:$0xf0]  ;;  %v7999_v24 = vld [vmem:[#allocation13 + $0x214] sm:$0xf0] }
 0x258   :  { %5729 = vmatpush.bf16.msra.mxu1 %v9454_v18  ;;  %v7806_v30 = vor.u32 %v9885_v19, %v7803_v20  ;;  %v10273_v18 = vld [vmem:[#allocation13 + $0xc90] sm:$0xf0]  ;;  %v8282_v19 = vor.u32 %v10004_v11, %v8279_v13 }
 0x259   :  { %5754 = vmatpush.bf16.msra.mxu3 %v8142_v27  ;;  %v9342_v20 = vor.u32 %v10273_v18, %v9341_v12  ;;  %v8531_v12 = vld [vmem:[#allocation13 + $0x63c] sm:$0xf0]  ;;  %v8671_v18 = vld [vmem:[#allocation13 + $0x754] sm:$0xf0] }
 0x25a   :  { %5696 = vmatmul.bf16.vlgmr.msrb.gmra.mxu2 %v10793_v59 }
 0x25b   :  { %5740 = vmatpush.bf16.msra.mxu2 %v7946_v21  ;;  %5718 = vmatpush.bf16.msra.mxu0 %v9174_v41  ;;  %v9934_v21 = vld [vmem:[#allocation13 + $0x1fc] sm:$0xf] }
 0x25c   :  { %v8002_v41 = vor.u32 %v9934_v21, %v7999_v24  ;;  %5730 = vmatpush.bf16.msra.mxu1 %v9426_v39  ;;  %v9063_v21 = vld [vmem:[#allocation13 + $0xa64] sm:$0xf0] }
 0x25d   :  { %5755 = vmatpush.bf16.msra.mxu3 %v8114_v46  ;;  %v2625_v27 = vpop.f32.mrf.mxu2  ;;  %v8366_v46 = vor.u32 %v10025_v25, %v8363_v26  ;;  %v8251_v25 = vld [vmem:[#allocation13 + $0x40c] sm:$0xf0] }
 0x25e   :  { %v2626_v28 = vadd.f32 %v2625_v27, %v1065_v23  ;;  %v9313_v27 = vld [vmem:[#allocation13 + $0xc40] sm:$0xf] }
 0x25f   :  { %5741 = vmatpush.bf16.msra.mxu2 %v7918_v14  ;;  %5719 = vmatpush.bf16.msra.mxu0 %v9146_v55  ;;  %v7775_v14 = vld [vmem:[#allocation13 + $0x54] sm:$0xf0]  ;;  %v2640_v40 = vpop.f32.mrf.mxu3  ;;  %v9871_v55 = vld [vmem:[#allocation13 + $0x4] sm:$0xf]  ;;  %v9314_v39 = vor.u32 %v10266_v29, %v9313_v27  ;;  %v8643_v27 = vld [vmem:[#allocation13 + $0x71c] sm:$0xf0] }
 0x260   :  { %v7778_v54 = vor.u32 %v9878_v38, %v7775_v14  ;;  %5731 = vmatpush.bf16.msra.mxu1 %v9398_v51  ;;  %v7750_v1 = vor.u32 %v9871_v55, %v7747_v56  ;;  %v2639_v35 = vadd.f32 %v10796_v9, %v2626_v28  ;;  %v8783_v9 = vld [vmem:[#allocation13 + $0x834] sm:$0xf0]  ;;  %v8755_v38 = vld [vmem:[#allocation13 + $0x7fc] sm:$0xf0]  ;;  %v10193_v14 = vld [vmem:[#allocation13 + $0xa14] sm:$0xf] }
 0x261   :  { %5756 = vmatpush.bf16.msra.mxu3 %v8086_v17  ;;  %v8839_v17 = vld [vmem:[#allocation13 + $0x8a4] sm:$0xf0]  ;;  %v10081_v55 = vld [vmem:[#allocation13 + $0x694] sm:$0xf]  ;;  %v8587_v28 = vld [vmem:[#allocation13 + $0x6ac] sm:$0xf0] }
 0x262   :  { %v8842_v61 = vor.u32 %v10144_v57, %v8839_v17  ;;  %v8727_v56 = vld [vmem:[#allocation13 + $0x7c4] sm:$0xf0]  ;;  %v10186_v57 = vld [vmem:[#allocation13 + $0x9dc] sm:$0xf]  ;;  %v9007_v17 = vld [vmem:[#allocation13 + $0x9f4] sm:$0xf0] }
 0x263   :  { %5742 = vmatpush.bf16.msra.mxu2 %v7890_v53  ;;  %5720 = vmatpush.bf16.msra.mxu0 %v9118_v7  ;;  %v2664_v53 = vpop.f32.mrf.mxu1  ;;  %v8310_v7 = vor.u32 %v10011_v62, %v8307_v63  ;;  %v9983_v63 = vld [vmem:[#allocation13 + $0x384] sm:$0xf]  ;;  %v10165_v29 = vld [vmem:[#allocation13 + $0x934] sm:$0xf] }
 0x265   :  { %5757 = vmatpush.bf16.msra.mxu3 %v8058_v43  ;;  %v2627_v0 = vpop.f32.mrf.mxu2 }
 0x266   :  { %v8195_v0 = vld [vmem:[#allocation13 + $0x39c] sm:$0xf0] }
 0x267   :  { %5743 = vmatpush.bf16.msra.mxu2 %v7862_v3  ;;  %5721 = vmatpush.bf16.msra.mxu0 %v9090_v10  ;;  %v10280_v3 = vld [vmem:[#allocation13 + $0xcc8] sm:$0xf0]  ;;  %v2651_v43 = vpop.f32.mrf.mxu0  ;;  %v10130_v10 = vld [vmem:[#allocation13 + $0x81c] sm:$0xf] }
 0x268   :  { %v9370_v8 = vor.u32 %v10280_v3, %v9369_v2  ;;  %v2652_v4 = vadd.f32 %v2651_v43, %v2639_v35  ;;  %v8786_v26 = vor.u32 %v10130_v10, %v8783_v9  ;;  %v9010_v3 = vor.u32 %v10186_v57, %v9007_v17  ;;  %v10109_v35 = vld [vmem:[#allocation13 + $0x774] sm:$0xf]  ;;  %v8951_v10 = vld [vmem:[#allocation13 + $0x984] sm:$0xf0]  ;;  %v10046_v57 = vld [vmem:[#allocation13 + $0x57c] sm:$0xf] }
 0x269   :  { %5758 = vmatpush.bf16.msra.mxu3 %v8030_v31  ;;  %v10200_v31 = vld [vmem:[#allocation13 + $0xa4c] sm:$0xf]  ;;  %v8702_v13 = vor.u32 %v10109_v35, %v8699_v5  ;;  %v8447_v17 = vld [vmem:[#allocation13 + $0x594] sm:$0xf0]  ;;  %v9287_v35 = vld [vmem:[#allocation13 + $0xc24] sm:$0xf0] }
 0x26a   :  { %5732 = vmatpush.bf16.msra.mxu1 %v9370_v8  ;;  %v9066_v23 = vor.u32 %v10200_v31, %v9063_v21  ;;  %v8198_v8 = vor.u32 %v9983_v63, %v8195_v0  ;;  %v10151_v63 = vld [vmem:[#allocation13 + $0x8c4] sm:$0xf]  ;;  %v8867_v0 = vld [vmem:[#allocation13 + $0x8dc] sm:$0xf0]  ;;  %v8173_v5 = vld [vmem:[#allocation13 + $0x350] sm:$0xf] }
 0x26b   :  { %5744 = vmatpush.bf16.msra.mxu2 %v7834_v52  ;;  %5766 = vmatpush.bf16.msrb.mxu0 %v8394_v22  ;;  %v2666_v15 = vpop.f32.mrf.mxu1  ;;  %v2665_v52 = vadd.f32 %v2664_v53, %v2652_v4  ;;  %v9997_v22 = vld [vmem:[#allocation13 + $0x3f4] sm:$0xf]  ;;  %v9038_v53 = vor.u32 %v10193_v14, %v9035_v34  ;;  %v9924_v14 = vld [vmem:[#allocation13 + $0x1a8] sm:$0xf0] }
 0x26c   :  { %v8254_v45 = vor.u32 %v9997_v22, %v8251_v25  ;;  %v10102_v15 = vld [vmem:[#allocation13 + $0x73c] sm:$0xf]  ;;  %v10095_v22 = vld [vmem:[#allocation13 + $0x704] sm:$0xf]  ;;  %v8503_v25 = vld [vmem:[#allocation13 + $0x604] sm:$0xf0] }
 0x26d   :  { %5759 = vmatpush.bf16.msra.mxu3 %v8002_v41  ;;  %vm2777_vm11 = vcmp.ge.f32.partialorder %v2665_v52, 0.0  ;;  %v2785_v24 = vmul.f32 0.2, %v2665_v52  ;;  %v8674_v31 = vor.u32 %v10102_v15, %v8671_v18  ;;  %v7865_v18 = vld [vmem:[#allocation13 + $0xe8] sm:$0xf] }
 0x26e   :  { %5733 = vmatpush.bf16.msra.mxu1 %v9342_v20 }
 0x26f   :  { %5745 = vmatpush.bf16.msra.mxu2 %v7806_v30  ;;  %5767 = vmatpush.bf16.msrb.mxu0 %v8366_v46  ;;  %v2793_v33 = vsel %vm2777_vm11, %v2665_v52, %v2785_v24  ;;  %v10123_v30 = vld [vmem:[#allocation13 + $0x7e4] sm:$0xf]  ;;  %v2653_v41 = vpop.f32.mrf.mxu0  ;;  %v10088_v46 = vld [vmem:[#allocation13 + $0x6cc] sm:$0xf] }
 0x270   :  { %v10803_v40 = vpack.c.bf16 %v2793_v33, %v2793_v33  ;;  %v8618_v50 = vor.u32 %v10088_v46, %v8615_v47  ;;  %v8758_v51 = vor.u32 %v10123_v30, %v8755_v38  ;;  %v10172_v52 = vld [vmem:[#allocation13 + $0x96c] sm:$0xf]  ;;  %v8923_v33 = vld [vmem:[#allocation13 + $0x94c] sm:$0xf0]  ;;  %v8646_v41 = vor.u32 %v10095_v22, %v8643_v27 }
 0x271   :  { %5760 = vmatpush.bf16.msra.mxu3 %v7974_v58  ;;  %v8226_v58 = vor.u32 %v9990_v48, %v8223_v49  ;;  %v8954_v21 = vor.u32 %v10172_v52, %v8951_v10  ;;  %v10060_v24 = vld [vmem:[#allocation13 + $0x5ec] sm:$0xf]  ;;  %v7949_v38 = vld [vmem:[#allocation13 + $0x190] sm:$0xf]  ;;  %v8926_v34 = vor.u32 %v10165_v29, %v8923_v33  ;;  %v10158_v48 = vld [vmem:[#allocation13 + $0x8fc] sm:$0xf] }
 0x272   :  { %5734 = vmatpush.bf16.msra.mxu1 %v9314_v39  ;;  %5709 = vmatmul.bf16.vlgmr.msrb.gmra.mxu3 %v10803_v40  ;;  %v8475_v46 = vld [vmem:[#allocation13 + $0x5cc] sm:$0xf0]  ;;  %v7950_v47 = vor.u32 %v9924_v14, %v7949_v38  ;;  %v8895_v49 = vld [vmem:[#allocation13 + $0x914] sm:$0xf0]  ;;  %v9903_v52 = vld [vmem:[#allocation13 + $0x100] sm:$0xf0] }
 0x273   :  { %5746 = vmatpush.bf16.msra.mxu2 %v7778_v54  ;;  %5768 = vmatpush.bf16.msrb.mxu0 %v8338_v60  ;;  %v10116_v54 = vld [vmem:[#allocation13 + $0x7ac] sm:$0xf]  ;;  %v8590_v60 = vor.u32 %v10081_v55, %v8587_v28  ;;  %v7866_v22 = vor.u32 %v9903_v52, %v7865_v18  ;;  %v7837_v27 = vld [vmem:[#allocation13 + $0xb0] sm:$0xf]  ;;  %v9231_v33 = vld [vmem:[#allocation13 + $0xbb4] sm:$0xf0] }
 0x274   :  { %v8730_v2 = vor.u32 %v10116_v54, %v8727_v56  ;;  %v9917_v54 = vld [vmem:[#allocation13 + $0x170] sm:$0xf0]  ;;  %v8898_v56 = vor.u32 %v10158_v48, %v8895_v49  ;;  %v9896_v29 = vld [vmem:[#allocation13 + $0xc8] sm:$0xf0]  ;;  %v8089_v48 = vld [vmem:[#allocation13 + $0x2a8] sm:$0xf] }
 0x275   :  { %5805 = vmatpush.bf16.msrb.mxu3 %v9066_v23  ;;  %v8506_v23 = vor.u32 %v10060_v24, %v8503_v25  ;;  %v7838_v14 = vor.u32 %v9896_v29, %v7837_v27  ;;  %v9959_v49 = vld [vmem:[#allocation13 + $0x2c0] sm:$0xf0]  ;;  %v9119_v18 = vld [vmem:[#allocation13 + $0xad4] sm:$0xf0]  ;;  %v8005_v52 = vld [vmem:[#allocation13 + $0x200] sm:$0xf] }
 0x276   :  { %5779 = vmatpush.bf16.msrb.mxu1 %v8618_v50  ;;  %v9091_v27 = vld [vmem:[#allocation13 + $0xa9c] sm:$0xf0] }
 0x277   :  { %5747 = vmatpush.bf16.msra.mxu2 %v7750_v1  ;;  %5769 = vmatpush.bf16.msrb.mxu0 %v8310_v7  ;;  %v2690_v62 = vpop.f32.mrf.mxu3  ;;  %v10074_v1 = vld [vmem:[#allocation13 + $0x65c] sm:$0xf]  ;;  %v8979_v7 = vld [vmem:[#allocation13 + $0x9bc] sm:$0xf0] }
 0x278   :  { %v8982_v4 = vor.u32 %v10179_v32, %v8979_v7  ;;  %v9980_v32 = vld [vmem:[#allocation13 + $0x368] sm:$0xf0] }
 0x279   :  { %5806 = vmatpush.bf16.msrb.mxu3 %v9038_v53  ;;  %v7921_v53 = vld [vmem:[#allocation13 + $0x158] sm:$0xf] }
 0x27a   :  { %5748 = vmatmul.bf16.vlgmr.msra.gmra.mxu2 %v10777_v44  ;;  %5780 = vmatpush.bf16.msrb.mxu1 %v8590_v60  ;;  %v7922_v60 = vor.u32 %v9917_v54, %v7921_v53  ;;  %v8090_v54 = vor.u32 %v9959_v49, %v8089_v48 }
 0x27b   :  { %5792 = vmatpush.bf16.msrb.mxu2 %v8842_v61  ;;  %5770 = vmatpush.bf16.msrb.mxu0 %v8282_v19  ;;  %v8559_v61 = vld [vmem:[#allocation13 + $0x674] sm:$0xf0]  ;;  %v1066_v19 = vperm.slane %v10798_v36, 6 }
 0x27c   :  { %v8562_v43 = vor.u32 %v10074_v1, %v8559_v61  ;;  %v8450_v1 = vor.u32 %v10046_v57, %v8447_v17  ;;  %v9175_v57 = vld [vmem:[#allocation13 + $0xb44] sm:$0xf0]  ;;  %v8061_v17 = vld [vmem:[#allocation13 + $0x270] sm:$0xf] }
 0x27d   :  { %5807 = vmatpush.bf16.msrb.mxu3 %v9010_v3  ;;  %v2677_v11 = vpop.f32.mrf.mxu2  ;;  %v7893_v3 = vld [vmem:[#allocation13 + $0x120] sm:$0xf] }
 0x27e   :  { %5781 = vmatpush.bf16.msrb.mxu1 %v8562_v43  ;;  %v2678_v30 = vadd.f32 %v2677_v11, %v1066_v19  ;;  %v10039_v43 = vld [vmem:[#allocation13 + $0x544] sm:$0xf]  ;;  %v9259_v19 = vld [vmem:[#allocation13 + $0xbec] sm:$0xf0] }
 0x27f   :  { %5793 = vmatpush.bf16.msrb.mxu2 %v8814_v16  ;;  %5771 = vmatpush.bf16.msrb.mxu0 %v8254_v45  ;;  %v10067_v16 = vld [vmem:[#allocation13 + $0x624] sm:$0xf]  ;;  %v2692_v20 = vpop.f32.mrf.mxu3  ;;  %v10053_v45 = vld [vmem:[#allocation13 + $0x5b4] sm:$0xf] }
 0x280   :  { %v8534_v9 = vor.u32 %v10067_v16, %v8531_v12  ;;  %v8478_v50 = vor.u32 %v10053_v45, %v8475_v46  ;;  %v8174_v16 = vor.u32 %v9980_v32, %v8173_v5  ;;  %v10249_v12 = vld [vmem:[#allocation13 + $0xbd4] sm:$0xf]  ;;  %v8145_v20 = vld [vmem:[#allocation13 + $0x318] sm:$0xf]  ;;  %v9147_v5 = vld [vmem:[#allocation13 + $0xb0c] sm:$0xf0] }
 0x281   :  { %5808 = vmatpush.bf16.msrb.mxu3 %v8982_v4  ;;  %v9262_v24 = vor.u32 %v10249_v12, %v9259_v19  ;;  %v7809_v45 = vld [vmem:[#allocation13 + $0x78] sm:$0xf]  ;;  %v9889_v46 = vld [vmem:[#allocation13 + $0x90] sm:$0xf0] }
 0x282   :  { %5782 = vmatpush.bf16.msrb.mxu1 %v8534_v9  ;;  %5761 = vmatmul.bf16.vlgmr.msra.gmra.mxu3 %v10768_v37  ;;  %v8033_v32 = vld [vmem:[#allocation13 + $0x238] sm:$0xf] }
 0x283   :  { %5794 = vmatpush.bf16.msrb.mxu2 %v8786_v26  ;;  %5772 = vmatpush.bf16.msrb.mxu0 %v8226_v58  ;;  %v2716_v26 = vpop.f32.mrf.mxu1 }
 0x285   :  { %5809 = vmatpush.bf16.msrb.mxu3 %v8954_v21  ;;  %v2679_v39 = vpop.f32.mrf.mxu2 }
 0x286   :  { %5783 = vmatpush.bf16.msrb.mxu1 %v8506_v23  ;;  %v8117_v23 = vld [vmem:[#allocation13 + $0x2e0] sm:$0xf] }
 0x287   :  { %5795 = vmatpush.bf16.msrb.mxu2 %v8758_v51  ;;  %5773 = vmatpush.bf16.msrb.mxu0 %v8198_v8  ;;  %v2691_v51 = vadd.f32 %v2690_v62, %v2678_v30  ;;  %v2703_v55 = vpop.f32.mrf.mxu0  ;;  %v9910_v62 = vld [vmem:[#allocation13 + $0x138] sm:$0xf0]  ;;  %v8870_v8 = vor.u32 %v10151_v63, %v8867_v0 }
 0x288   :  { %v7894_v11 = vor.u32 %v9910_v62, %v7893_v3  ;;  %v9966_v30 = vld [vmem:[#allocation13 + $0x2f8] sm:$0xf0]  ;;  %v7753_v3 = vld [vmem:[#allocation13 + $0x8] sm:$0xf]  ;;  %v9875_v62 = vld [vmem:[#allocation13 + $0x20] sm:$0xf0] }
 0x289   :  { %v2704_v28 = vadd.f32 %v2703_v55, %v2691_v51  ;;  %5810 = vmatpush.bf16.msrb.mxu3 %v8926_v34  ;;  %v10235_v34 = vld [vmem:[#allocation13 + $0xb64] sm:$0xf]  ;;  %v10228_v55 = vld [vmem:[#allocation13 + $0xb2c] sm:$0xf] }
 0x28a   :  { %5784 = vmatpush.bf16.msrb.mxu1 %v8478_v50  ;;  %v7810_v50 = vor.u32 %v9889_v46, %v7809_v45  ;;  %v8789_v45 = vld [vmem:[#allocation13 + $0x820] sm:$0xf]  ;;  %v10134_v46 = vld [vmem:[#allocation13 + $0x838] sm:$0xf0] }
 0x28b   :  { %5796 = vmatpush.bf16.msrb.mxu2 %v8730_v2  ;;  %v2718_v58 = vpop.f32.mrf.mxu1  ;;  %v2717_v61 = vadd.f32 %v2716_v26, %v2704_v28  ;;  %v10256_v2 = vld [vmem:[#allocation13 + $0xc0c] sm:$0xf]  ;;  %v10242_v26 = vld [vmem:[#allocation13 + $0xb9c] sm:$0xf]  ;;  %v7781_v28 = vld [vmem:[#allocation13 + $0x40] sm:$0xf] }
 0x28c   :  { %v9290_v15 = vor.u32 %v10256_v2, %v9287_v35  ;;  %v9234_v39 = vor.u32 %v10242_v26, %v9231_v33  ;;  %v9952_v58 = vld [vmem:[#allocation13 + $0x288] sm:$0xf0]  ;;  %v10221_v2 = vld [vmem:[#allocation13 + $0xaf4] sm:$0xf]  ;;  %v10207_v26 = vld [vmem:[#allocation13 + $0xa84] sm:$0xf] }
 0x28d   :  { %vm2778_vm12 = vcmp.ge.f32.partialorder %v2717_v61, 0.0  ;;  %v2786_v7 = vmul.f32 0.2, %v2717_v61  ;;  %5811 = vmatpush.bf16.msrb.mxu3 %v8898_v56  ;;  %v9882_v56 = vld [vmem:[#allocation13 + $0x58] sm:$0xf0]  ;;  %v9094_v49 = vor.u32 %v10207_v26, %v9091_v27 }
 0x28e   :  { %5785 = vmatpush.bf16.msrb.mxu1 %v8450_v1  ;;  %v7782_v0 = vor.u32 %v9882_v56, %v7781_v28  ;;  %v9178_v1 = vor.u32 %v10228_v55, %v9175_v57  ;;  %v8790_v28 = vor.u32 %v10134_v46, %v8789_v45  ;;  %v10305_v56 = vld [vmem:[#allocation13 + $0xd94] sm:$0xf]  ;;  %v8369_v57 = vld [vmem:[#allocation13 + $0x4d8] sm:$0xf]  ;;  %v8985_v27 = vld [vmem:[#allocation13 + $0x9a8] sm:$0xf] }
 0x28f   :  { %5797 = vmatpush.bf16.msrb.mxu2 %v8702_v13  ;;  %v8419_v13 = vld [vmem:[#allocation13 + $0x55c] sm:$0xf0]  ;;  %v2794_v4 = vsel %vm2778_vm12, %v2717_v61, %v2786_v7  ;;  %v2705_v9 = vpop.f32.mrf.mxu0  ;;  %v8062_v61 = vor.u32 %v9952_v58, %v8061_v17  ;;  %v9945_v7 = vld [vmem:[#allocation13 + $0x250] sm:$0xf0]  ;;  %v9399_v46 = vld [vmem:[#allocation13 + $0xd04] sm:$0xf0] }
 0x290   :  { %v10809_v10 = vpack.c.bf16 %v2794_v4, %v2794_v4  ;;  %v8422_v21 = vor.u32 %v10039_v43, %v8419_v13  ;;  %v8845_v43 = vld [vmem:[#allocation13 + $0x890] sm:$0xf]  ;;  %v9150_v4 = vor.u32 %v10221_v2, %v9147_v5  ;;  %v9938_v9 = vld [vmem:[#allocation13 + $0x218] sm:$0xf0]  ;;  %v10029_v17 = vld [vmem:[#allocation13 + $0x4f0] sm:$0xf0] }
 0x291   :  { %5812 = vmatpush.bf16.msrb.mxu3 %v8870_v8  ;;  %v9041_v2 = vld [vmem:[#allocation13 + $0xa18] sm:$0xf]  ;;  %v10113_v26 = vld [vmem:[#allocation13 + $0x790] sm:$0xf0] }
 0x292   :  { %5722 = vmatmul.bf16.vlgmr.msra.gmra.mxu0 %v10809_v10  ;;  %5786 = vmatpush.bf16.msrb.mxu1 %v8422_v21 }
 0x293   :  { %5798 = vmatpush.bf16.msrb.mxu2 %v8674_v31  ;;  %v9973_v31 = vld [vmem:[#allocation13 + $0x330] sm:$0xf0]  ;;  %5818 = vmatpush.bf16.msra.mxu0 %v9290_v15  ;;  %v8034_v15 = vor.u32 %v9945_v7, %v8033_v32  ;;  %v8341_v7 = vld [vmem:[#allocation13 + $0x4a0] sm:$0xf] }
 0x294   :  { %v8146_v25 = vor.u32 %v9973_v31, %v8145_v20  ;;  %5813 = vmatmul.bf16.vlgmr.msrb.gmra.mxu3 %v10803_v40  ;;  %v8817_v20 = vld [vmem:[#allocation13 + $0x858] sm:$0xf]  ;;  %v10141_v31 = vld [vmem:[#allocation13 + $0x870] sm:$0xf0] }
 0x295   :  { %5857 = vmatpush.bf16.msra.mxu3 %v8174_v16  ;;  %v10214_v16 = vld [vmem:[#allocation13 + $0xabc] sm:$0xf]  ;;  %v8818_v33 = vor.u32 %v10141_v31, %v8817_v20  ;;  %v10291_v20 = vld [vmem:[#allocation13 + $0xd24] sm:$0xf]  ;;  %v8313_v31 = vld [vmem:[#allocation13 + $0x468] sm:$0xf] }
 0x297   :  { %5799 = vmatpush.bf16.msrb.mxu2 %v8646_v41  ;;  %v2742_v38 = vpop.f32.mrf.mxu3  ;;  %5819 = vmatpush.bf16.msra.mxu0 %v9262_v24  ;;  %v8118_v41 = vor.u32 %v9966_v30, %v8117_v23  ;;  %v9122_v24 = vor.u32 %v10214_v16, %v9119_v18  ;;  %v7977_v23 = vld [vmem:[#allocation13 + $0x1c8] sm:$0xf]  ;;  %v9931_v30 = vld [vmem:[#allocation13 + $0x1e0] sm:$0xf0]  ;;  %v9013_v16 = vld [vmem:[#allocation13 + $0x9e0] sm:$0xf] }
 0x299   :  { %5858 = vmatpush.bf16.msra.mxu3 %v8146_v25  ;;  %v8006_v25 = vor.u32 %v9938_v9, %v8005_v52 }
 0x29a   :  { %5800 = vmatmul.bf16.vlgmr.msrb.gmra.mxu2 %v10793_v59 }
 0x29b   :  { %5844 = vmatpush.bf16.msra.mxu2 %v7950_v47  ;;  %v9203_v47 = vld [vmem:[#allocation13 + $0xb7c] sm:$0xf0]  ;;  %5820 = vmatpush.bf16.msra.mxu0 %v9234_v39 }
 0x29c   :  { %v9206_v53 = vor.u32 %v10235_v34, %v9203_v47  ;;  %v10036_v34 = vld [vmem:[#allocation13 + $0x528] sm:$0xf0]  ;;  %v9069_v47 = vld [vmem:[#allocation13 + $0xa50] sm:$0xf] }
 0x29d   :  { %5859 = vmatpush.bf16.msra.mxu3 %v8118_v41  ;;  %v2729_v51 = vpop.f32.mrf.mxu2  ;;  %v8397_v41 = vld [vmem:[#allocation13 + $0x510] sm:$0xf] }
 0x29f   :  { %5845 = vmatpush.bf16.msra.mxu2 %v7922_v60  ;;  %v1067_v60 = vperm.slane %v10798_v36, 7  ;;  %v2744_v63 = vpop.f32.mrf.mxu3  ;;  %5821 = vmatpush.bf16.msra.mxu0 %v9206_v53  ;;  %v7754_v36 = vor.u32 %v9875_v62, %v7753_v3  ;;  %v8398_v53 = vor.u32 %v10036_v34, %v8397_v41  ;;  %v10197_v3 = vld [vmem:[#allocation13 + $0xa30] sm:$0xf0]  ;;  %v8370_v62 = vor.u32 %v10029_v17, %v8369_v57  ;;  %v8285_v41 = vld [vmem:[#allocation13 + $0x430] sm:$0xf] }
 0x2a0   :  { %v10008_v34 = vld [vmem:[#allocation13 + $0x448] sm:$0xf0]  ;;  %v9371_v57 = vld [vmem:[#allocation13 + $0xccc] sm:$0xf0]  ;;  %v8257_v17 = vld [vmem:[#allocation13 + $0x3f8] sm:$0xf] }
 0x2a1   :  { %5860 = vmatpush.bf16.msra.mxu3 %v8090_v54  ;;  %v2768_v35 = vpop.f32.mrf.mxu1  ;;  %v2730_v8 = vadd.f32 %v2729_v51, %v1067_v60  ;;  %v10204_v51 = vld [vmem:[#allocation13 + $0xa68] sm:$0xf0] }
 0x2a2   :  { %5774 = vmatmul.bf16.vlgmr.msrb.gmra.mxu0 %v10789_v6  ;;  %v9070_v63 = vor.u32 %v10204_v51, %v9069_v47  ;;  %v8677_v47 = vld [vmem:[#allocation13 + $0x740] sm:$0xf]  ;;  %v10176_v51 = vld [vmem:[#allocation13 + $0x988] sm:$0xf0] }
 0x2a3   :  { %5846 = vmatpush.bf16.msra.mxu2 %v7894_v11  ;;  %v10148_v11 = vld [vmem:[#allocation13 + $0x8a8] sm:$0xf0]  ;;  %5822 = vmatpush.bf16.msra.mxu0 %v9178_v1  ;;  %v2743_v19 = vadd.f32 %v2742_v38, %v2730_v8  ;;  %v9511_v38 = vld [vmem:[#allocation13 + $0xde4] sm:$0xf0]  ;;  %v10022_v8 = vld [vmem:[#allocation13 + $0x4b8] sm:$0xf0] }
 0x2a4   :  { %v8846_v12 = vor.u32 %v10148_v11, %v8845_v43  ;;  %v8761_v1 = vld [vmem:[#allocation13 + $0x7e8] sm:$0xf]  ;;  %v3316_v43 = vld [vmem:[#allocation14] sm:$0xff]  ;;  %v9042_v11 = vor.u32 %v10197_v3, %v9041_v2  ;;  %v8342_v18 = vor.u32 %v10022_v8, %v8341_v7  ;;  %v8929_v2 = vld [vmem:[#allocation13 + $0x938] sm:$0xf] }
 0x2a5   :  { %5861 = vmatpush.bf16.msra.mxu3 %v8062_v61  ;;  %v2731_v13 = vpop.f32.mrf.mxu2  ;;  %v10127_v61 = vld [vmem:[#allocation13 + $0x800] sm:$0xf0]  ;;  %v3318_v52 = vperm.slane %v3316_v43, 0  ;;  %v10169_v3 = vld [vmem:[#allocation13 + $0x950] sm:$0xf0] }
 0x2a6   :  { %v8762_v32 = vor.u32 %v10127_v61, %v8761_v1  ;;  %v8733_v13 = vld [vmem:[#allocation13 + $0x7b0] sm:$0xf]  ;;  %v8649_v1 = vld [vmem:[#allocation13 + $0x708] sm:$0xf]  ;;  %v10099_v61 = vld [vmem:[#allocation13 + $0x720] sm:$0xf0] }
 0x2a7   :  { %5847 = vmatpush.bf16.msra.mxu2 %v7866_v22  ;;  %v2755_v21 = vpop.f32.mrf.mxu0  ;;  %5823 = vmatpush.bf16.msra.mxu0 %v9150_v4  ;;  %v10120_v4 = vld [vmem:[#allocation13 + $0x7c8] sm:$0xf0]  ;;  %v8650_v8 = vor.u32 %v10099_v61, %v8649_v1  ;;  %v8229_v43 = vld [vmem:[#allocation13 + $0x3c0] sm:$0xf]  ;;  %v9970_v1 = vld [vmem:[#allocation13 + $0x31c] sm:$0xf] }
 0x2a8   :  { %v2756_v22 = vadd.f32 %v2755_v21, %v2743_v19  ;;  %v8734_v19 = vor.u32 %v10120_v4, %v8733_v13  ;;  %v10015_v21 = vld [vmem:[#allocation13 + $0x480] sm:$0xf0]  ;;  %v10270_v4 = vld [vmem:[#allocation13 + $0xc7c] sm:$0xf]  ;;  %v8147_v61 = vld [vmem:[#allocation13 + $0x334] sm:$0xf0] }
 0x2a9   :  { %5862 = vmatpush.bf16.msra.mxu3 %v8034_v15  ;;  %v2770_v29 = vpop.f32.mrf.mxu1 }
 0x2aa   :  { %v2769_v39 = vadd.f32 %v2768_v35, %v2756_v22  ;;  %v10298_v35 = vld [vmem:[#allocation13 + $0xd5c] sm:$0xf]  ;;  %v10183_v29 = vld [vmem:[#allocation13 + $0x9c0] sm:$0xf0] }
 0x2ab   :  { %5848 = vmatpush.bf16.msra.mxu2 %v7838_v14  ;;  %v10312_v14 = vld [vmem:[#allocation13 + $0xdcc] sm:$0xf]  ;;  %5824 = vmatpush.bf16.msra.mxu0 %v9122_v24  ;;  %v9427_v24 = vld [vmem:[#allocation13 + $0xd3c] sm:$0xf0]  ;;  %v8986_v45 = vor.u32 %v10183_v29, %v8985_v27 }
 0x2ac   :  { %vm2779_vm13 = vcmp.ge.f32.partialorder %v2769_v39, 0.0  ;;  %v2787_v48 = vmul.f32 0.2, %v2769_v39  ;;  %v9514_v55 = vor.u32 %v10312_v14, %v9511_v38  ;;  %v9430_v14 = vor.u32 %v10291_v20, %v9427_v24  ;;  %v10284_v38 = vld [vmem:[#allocation13 + $0xcec] sm:$0xf] }
 0x2ad   :  { %5863 = vmatpush.bf16.msra.mxu3 %v8006_v25  ;;  %v8705_v25 = vld [vmem:[#allocation13 + $0x778] sm:$0xf]  ;;  %v8201_v24 = vld [vmem:[#allocation13 + $0x388] sm:$0xf] }
 0x2ae   :  { %v2795_v54 = vsel %vm2779_vm13, %v2769_v39, %v2787_v48  ;;  %v8706_v39 = vor.u32 %v10113_v26, %v8705_v25  ;;  %v10106_v48 = vld [vmem:[#allocation13 + $0x758] sm:$0xf0]  ;;  %v9987_v25 = vld [vmem:[#allocation13 + $0x3a0] sm:$0xf0]  ;;  %v8873_v26 = vld [vmem:[#allocation13 + $0x8c8] sm:$0xf] }
 0x2af   :  { %5849 = vmatpush.bf16.msra.mxu2 %v7810_v50  ;;  %v7978_v50 = vor.u32 %v9931_v30, %v7977_v23  ;;  %v10816_v58 = vpack.c.bf16 %v2795_v54, %v2795_v54  ;;  %v2757_v60 = vpop.f32.mrf.mxu0  ;;  %5825 = vmatpush.bf16.msra.mxu0 %v9094_v49  ;;  %v8314_v23 = vor.u32 %v10015_v21, %v8313_v31  ;;  %v10263_v31 = vld [vmem:[#allocation13 + $0xc44] sm:$0xf]  ;;  %v9315_v21 = vld [vmem:[#allocation13 + $0xc5c] sm:$0xf0] }
 0x2b0   :  { %v8286_v54 = vor.u32 %v10008_v34, %v8285_v41  ;;  %v10001_v60 = vld [vmem:[#allocation13 + $0x410] sm:$0xf0]  ;;  %v10092_v41 = vld [vmem:[#allocation13 + $0x6e8] sm:$0xf0]  ;;  %v9907_v34 = vld [vmem:[#allocation13 + $0x124] sm:$0xf] }
 0x2b1   :  { %5864 = vmatpush.bf16.msra.mxu3 %v7978_v50  ;;  %5735 = vmatmul.bf16.vlgmr.msra.gmra.mxu1 %v10816_v58  ;;  %v8957_v50 = vld [vmem:[#allocation13 + $0x970] sm:$0xf] }
 0x2b2   :  { %5831 = vmatpush.bf16.msra.mxu1 %v9514_v55  ;;  %5826 = vmatmul.bf16.vlgmr.msra.gmra.mxu0 %v10809_v10  ;;  %v10277_v55 = vld [vmem:[#allocation13 + $0xcb4] sm:$0xf] }
 0x2b3   :  { %5850 = vmatpush.bf16.msra.mxu2 %v7782_v0  ;;  %v9483_v0 = vld [vmem:[#allocation13 + $0xdac] sm:$0xf0]  ;;  %5870 = vmatpush.bf16.msrb.mxu0 %v8398_v53  ;;  %v9374_v7 = vor.u32 %v10277_v55, %v9371_v57  ;;  %v10253_v55 = vld [vmem:[#allocation13 + $0xbf0] sm:$0xf0] }
 0x2b4   :  { %v9486_v5 = vor.u32 %v10305_v56, %v9483_v0  ;;  %5865 = vmatmul.bf16.vlgmr.msra.gmra.mxu3 %v10768_v37  ;;  %v8678_v56 = vor.u32 %v10106_v48, %v8677_v47  ;;  %v8958_v0 = vor.u32 %v10176_v51, %v8957_v50  ;;  %v9977_v47 = vld [vmem:[#allocation13 + $0x354] sm:$0xf]  ;;  %v8175_v48 = vld [vmem:[#allocation13 + $0x36c] sm:$0xf0] }
 0x2b5   :  { %5909 = vmatpush.bf16.msrb.mxu3 %v9070_v63  ;;  %v8178_v57 = vor.u32 %v9977_v47, %v8175_v48 }
 0x2b6   :  { %5832 = vmatpush.bf16.msra.mxu1 %v9486_v5 }
 0x2b7   :  { %5851 = vmatpush.bf16.msra.mxu2 %v7754_v36  ;;  %v9455_v36 = vld [vmem:[#allocation13 + $0xd74] sm:$0xf0]  ;;  %v5658_v15 = vpop.f32.mrf.mxu3  ;;  %5871 = vmatpush.bf16.msrb.mxu0 %v8370_v62  ;;  %v9921_v62 = vld [vmem:[#allocation13 + $0x194] sm:$0xf] }
 0x2b8   :  { %v9458_v9 = vor.u32 %v10298_v35, %v9455_v36  ;;  %v7951_v35 = vld [vmem:[#allocation13 + $0x1ac] sm:$0xf0]  ;;  %v8930_v36 = vor.u32 %v10169_v3, %v8929_v2 }
 0x2b9   :  { %5910 = vmatpush.bf16.msrb.mxu3 %v9042_v11  ;;  %v9994_v11 = vld [vmem:[#allocation13 + $0x3d8] sm:$0xf0]  ;;  %v7954_v13 = vor.u32 %v9921_v62, %v7951_v35  ;;  %v9237_v62 = vld [vmem:[#allocation13 + $0xba0] sm:$0xf] }
 0x2ba   :  { %5852 = vmatmul.bf16.vlgmr.msra.gmra.mxu2 %v10777_v44  ;;  %5833 = vmatpush.bf16.msra.mxu1 %v9458_v9  ;;  %v7923_v9 = vld [vmem:[#allocation13 + $0x174] sm:$0xf0]  ;;  %v8230_v20 = vor.u32 %v9994_v11, %v8229_v43  ;;  %v10246_v35 = vld [vmem:[#allocation13 + $0xbb8] sm:$0xf0]  ;;  %v9893_v43 = vld [vmem:[#allocation13 + $0xb4] sm:$0xf] }
 0x2bb   :  { %5896 = vmatpush.bf16.msrb.mxu2 %v8846_v12  ;;  %v10190_v12 = vld [vmem:[#allocation13 + $0x9f8] sm:$0xf0]  ;;  %5872 = vmatpush.bf16.msrb.mxu0 %v8342_v18  ;;  %v7839_v11 = vld [vmem:[#allocation13 + $0xcc] sm:$0xf0] }
 0x2bc   :  { %v9014_v22 = vor.u32 %v10190_v12, %v9013_v16  ;;  %v8901_v16 = vld [vmem:[#allocation13 + $0x900] sm:$0xf]  ;;  %v10162_v18 = vld [vmem:[#allocation13 + $0x918] sm:$0xf0] }
 0x2bd   :  { %v8902_v29 = vor.u32 %v10162_v18, %v8901_v16  ;;  %v9209_v16 = vld [vmem:[#allocation13 + $0xb68] sm:$0xf]  ;;  %v7842_v18 = vor.u32 %v9893_v43, %v7839_v11 }
 0x2be   :  { %5911 = vmatpush.bf16.msrb.mxu3 %v9014_v22  ;;  %5834 = vmatpush.bf16.msra.mxu1 %v9430_v14  ;;  %v10260_v14 = vld [vmem:[#allocation13 + $0xc28] sm:$0xf0] }
 0x2bf   :  { %5897 = vmatpush.bf16.msrb.mxu2 %v8818_v33  ;;  %v5645_v33 = vpop.f32.mrf.mxu2  ;;  %v5660_v49 = vpop.f32.mrf.mxu3  ;;  %5873 = vmatpush.bf16.msrb.mxu0 %v8314_v23  ;;  %v10155_v23 = vld [vmem:[#allocation13 + $0x8e0] sm:$0xf0] }
 0x2c0   :  { %v5646_v30 = vadd.f32 %v5645_v33, %v3318_v52  ;;  %v9914_v52 = vld [vmem:[#allocation13 + $0x15c] sm:$0xf]  ;;  %v9318_v49 = vor.u32 %v10263_v31, %v9315_v21  ;;  %v8874_v51 = vor.u32 %v10155_v23, %v8873_v26  ;;  %v7811_v31 = vld [vmem:[#allocation13 + $0x94] sm:$0xf0]  ;;  %v9956_v21 = vld [vmem:[#allocation13 + $0x2ac] sm:$0xf] }
 0x2c1   :  { %v5684_v63 = vpop.f32.mrf.mxu1  ;;  %5787 = vmatmul.bf16.vlgmr.msrb.gmra.mxu1 %v10785_v42  ;;  %v7926_v33 = vor.u32 %v9914_v52, %v7923_v9  ;;  %v8537_v9 = vld [vmem:[#allocation13 + $0x628] sm:$0xf]  ;;  %v9181_v26 = vld [vmem:[#allocation13 + $0xb30] sm:$0xf] }
 0x2c2   :  { %v5659_v53 = vadd.f32 %v5658_v15, %v5646_v30  ;;  %5912 = vmatpush.bf16.msrb.mxu3 %v8986_v45  ;;  %v9343_v15 = vld [vmem:[#allocation13 + $0xc94] sm:$0xf0]  ;;  %v9293_v30 = vld [vmem:[#allocation13 + $0xc10] sm:$0xf]  ;;  %v8202_v45 = vor.u32 %v9987_v25, %v8201_v24 }
 0x2c3   :  { %5898 = vmatpush.bf16.msrb.mxu2 %v8790_v28  ;;  %v9402_v28 = vor.u32 %v10284_v38, %v9399_v46  ;;  %5874 = vmatpush.bf16.msrb.mxu0 %v8286_v54  ;;  %v9346_v22 = vor.u32 %v10270_v4, %v9343_v15  ;;  %v8621_v38 = vld [vmem:[#allocation13 + $0x6d0] sm:$0xf]  ;;  %v7895_v46 = vld [vmem:[#allocation13 + $0x13c] sm:$0xf0]  ;;  %v9294_v50 = vor.u32 %v10260_v14, %v9293_v30  ;;  %v9265_v54 = vld [vmem:[#allocation13 + $0xbd8] sm:$0xf] }
 0x2c4   :  { %v9266_v2 = vor.u32 %v10253_v55, %v9265_v54  ;;  %v9238_v4 = vor.u32 %v10246_v35, %v9237_v62  ;;  %v8509_v23 = vld [vmem:[#allocation13 + $0x5f0] sm:$0xf]  ;;  %v10064_v30 = vld [vmem:[#allocation13 + $0x608] sm:$0xf0]  ;;  %v9879_v14 = vld [vmem:[#allocation13 + $0x44] sm:$0xf] }
 0x2c5   :  { %5835 = vmatpush.bf16.msra.mxu1 %v9402_v28  ;;  %v8510_v48 = vor.u32 %v10064_v30, %v8509_v23  ;;  %v8481_v54 = vld [vmem:[#allocation13 + $0x5b8] sm:$0xf]  ;;  %v10057_v55 = vld [vmem:[#allocation13 + $0x5d0] sm:$0xf0]  ;;  %v8453_v62 = vld [vmem:[#allocation13 + $0x580] sm:$0xf] }
 0x2c6   :  { %5913 = vmatpush.bf16.msrb.mxu3 %v8958_v0  ;;  %v7867_v0 = vld [vmem:[#allocation13 + $0x104] sm:$0xf0]  ;;  %v10050_v35 = vld [vmem:[#allocation13 + $0x598] sm:$0xf0] }
 0x2c7   :  { %5899 = vmatpush.bf16.msrb.mxu2 %v8762_v32  ;;  %v5647_v5 = vpop.f32.mrf.mxu2  ;;  %v8258_v32 = vor.u32 %v10001_v60, %v8257_v17  ;;  %v5671_v12 = vpop.f32.mrf.mxu0  ;;  %v8593_v17 = vld [vmem:[#allocation13 + $0x698] sm:$0xf]  ;;  %v10085_v60 = vld [vmem:[#allocation13 + $0x6b0] sm:$0xf0] }
 0x2c8   :  { %v8594_v3 = vor.u32 %v10085_v60, %v8593_v17  ;;  %v8035_v17 = vld [vmem:[#allocation13 + $0x254] sm:$0xf0] }
 0x2c9   :  { %5875 = vmatpush.bf16.msrb.mxu0 %v8258_v32  ;;  %5836 = vmatpush.bf16.msra.mxu1 %v9374_v7  ;;  %v5686_v27 = vpop.f32.mrf.mxu1  ;;  %v8150_v32 = vor.u32 %v9970_v1, %v8147_v61  ;;  %v8565_v7 = vld [vmem:[#allocation13 + $0x660] sm:$0xf]  ;;  %v10218_v61 = vld [vmem:[#allocation13 + $0xad8] sm:$0xf0] }
 0x2ca   :  { %5914 = vmatpush.bf16.msrb.mxu3 %v8930_v36  ;;  %v9963_v36 = vld [vmem:[#allocation13 + $0x2e4] sm:$0xf]  ;;  %v10232_v27 = vld [vmem:[#allocation13 + $0xb48] sm:$0xf0]  ;;  %v9125_v1 = vld [vmem:[#allocation13 + $0xac0] sm:$0xf] }
 0x2cb   :  { %5900 = vmatpush.bf16.msrb.mxu2 %v8734_v19  ;;  %v5672_v19 = vadd.f32 %v5671_v12, %v5659_v53  ;;  %v8622_v53 = vor.u32 %v10092_v41, %v8621_v38  ;;  %v10239_v12 = vld [vmem:[#allocation13 + $0xb80] sm:$0xf0]  ;;  %v7783_v38 = vld [vmem:[#allocation13 + $0x5c] sm:$0xf0]  ;;  %v9949_v41 = vld [vmem:[#allocation13 + $0x274] sm:$0xf]  ;;  %v9126_v11 = vor.u32 %v10218_v61, %v9125_v1 }
 0x2cc   :  { %v9210_v24 = vor.u32 %v10239_v12, %v9209_v16  ;;  %v9097_v16 = vld [vmem:[#allocation13 + $0xa88] sm:$0xf]  ;;  %v10211_v12 = vld [vmem:[#allocation13 + $0xaa0] sm:$0xf0]  ;;  %v9015_v61 = vld [vmem:[#allocation13 + $0x9fc] sm:$0xf0] }
 0x2cd   :  { %5876 = vmatpush.bf16.msrb.mxu0 %v8230_v20  ;;  %5837 = vmatpush.bf16.msra.mxu1 %v9346_v22  ;;  %v9886_v20 = vld [vmem:[#allocation13 + $0x7c] sm:$0xf]  ;;  %v8091_v22 = vld [vmem:[#allocation13 + $0x2c4] sm:$0xf0]  ;;  %v10187_v1 = vld [vmem:[#allocation13 + $0x9e4] sm:$0xf] }
 0x2ce   :  { %5915 = vmatpush.bf16.msrb.mxu3 %v8902_v29  ;;  %v7814_v29 = vor.u32 %v9886_v20, %v7811_v31  ;;  %v8399_v20 = vld [vmem:[#allocation13 + $0x52c] sm:$0xf0] }
 0x2cf   :  { %5901 = vmatpush.bf16.msrb.mxu2 %v8706_v39  ;;  %v10822_v39 = vadd.f32 %v5684_v63, %v5672_v19  ;;  %v5673_v28 = vpop.f32.mrf.mxu0  ;;  %v9900_v63 = vld [vmem:[#allocation13 + $0xec] sm:$0xf]  ;;  %v10071_v19 = vld [vmem:[#allocation13 + $0x640] sm:$0xf0] }
 0x2d0   :  { %v7870_v5 = vor.u32 %v9900_v63, %v7867_v0  ;;  %v8538_v25 = vor.u32 %v10071_v19, %v8537_v9  ;;  %v9872_v28 = vld [vmem:[#allocation13 + $0xc] sm:$0xf]  ;;  %v10145_v63 = vld [vmem:[#allocation13 + $0x894] sm:$0xf]  ;;  %v8847_v0 = vld [vmem:[#allocation13 + $0x8ac] sm:$0xf0] }
 0x2d1   :  { %5877 = vmatpush.bf16.msrb.mxu0 %v8202_v45  ;;  %5838 = vmatpush.bf16.msra.mxu1 %v9318_v49  ;;  %v9153_v49 = vld [vmem:[#allocation13 + $0xaf8] sm:$0xf]  ;;  %v7979_v9 = vld [vmem:[#allocation13 + $0x1e4] sm:$0xf0]  ;;  %v10033_v19 = vld [vmem:[#allocation13 + $0x514] sm:$0xf] }
 0x2d2   :  { %5916 = vmatpush.bf16.msrb.mxu3 %v8874_v51  ;;  %v7786_v51 = vor.u32 %v9879_v14, %v7783_v38  ;;  %v8402_v23 = vor.u32 %v10033_v19, %v8399_v20  ;;  %v10026_v38 = vld [vmem:[#allocation13 + $0x4dc] sm:$0xf]  ;;  %v9405_v19 = vld [vmem:[#allocation13 + $0xcf0] sm:$0xf]  ;;  %v10288_v20 = vld [vmem:[#allocation13 + $0xd08] sm:$0xf0] }
 0x2d3   :  { %5902 = vmatpush.bf16.msrb.mxu2 %v8678_v56  ;;  %v7898_v56 = vor.u32 %v9907_v34, %v7895_v46  ;;  %v8063_v34 = vld [vmem:[#allocation13 + $0x28c] sm:$0xf0]  ;;  %v9182_v46 = vor.u32 %v10232_v27, %v9181_v26  ;;  %v8791_v26 = vld [vmem:[#allocation13 + $0x83c] sm:$0xf0]  ;;  %v10201_v27 = vld [vmem:[#allocation13 + $0xa54] sm:$0xf] }
 0x2d4   :  { %5878 = vmatmul.bf16.vlgmr.msrb.gmra.mxu0 %v10789_v6  ;;  %5839 = vmatmul.bf16.vlgmr.msra.gmra.mxu1 %v10816_v58 }
 0x2d5   :  { %5922 = vmatpush.bf16.msra.mxu0 %v9294_v50  ;;  %5883 = vmatpush.bf16.msrb.mxu1 %v8622_v53  ;;  %v10225_v50 = vld [vmem:[#allocation13 + $0xb10] sm:$0xf0]  ;;  %v8066_v53 = vor.u32 %v9949_v41, %v8063_v34  ;;  %v8371_v41 = vld [vmem:[#allocation13 + $0x4f4] sm:$0xf0] }
 0x2d6   :  { %5961 = vmatpush.bf16.msra.mxu3 %v8178_v57  ;;  %v9942_v57 = vld [vmem:[#allocation13 + $0x23c] sm:$0xf]  ;;  %v9154_v60 = vor.u32 %v10225_v50, %v9153_v49  ;;  %v10124_v49 = vld [vmem:[#allocation13 + $0x7ec] sm:$0xf]  ;;  %v8763_v50 = vld [vmem:[#allocation13 + $0x804] sm:$0xf0] }
 0x2d7   :  { %5903 = vmatpush.bf16.msrb.mxu2 %v8650_v8  ;;  %v10078_v8 = vld [vmem:[#allocation13 + $0x678] sm:$0xf0]  ;;  %5917 = vmatmul.bf16.vlgmr.msrb.gmra.mxu3 %v10803_v40 }
 0x2d8   :  { %v8566_v15 = vor.u32 %v10078_v8, %v8565_v7  ;;  %v8007_v7 = vld [vmem:[#allocation13 + $0x21c] sm:$0xf0]  ;;  %v10138_v8 = vld [vmem:[#allocation13 + $0x85c] sm:$0xf] }
 0x2d9   :  { %5923 = vmatpush.bf16.msra.mxu0 %v9266_v2  ;;  %5884 = vmatpush.bf16.msrb.mxu1 %v8594_v3  ;;  %v8038_v3 = vor.u32 %v9942_v57, %v8035_v17  ;;  %v8766_v57 = vor.u32 %v10124_v49, %v8763_v50  ;;  %v7957_v50 = vld [vmem:[#allocation13 + $0x198] sm:$0xf] }
 0x2da   :  { %5904 = vmatmul.bf16.vlgmr.msrb.gmra.mxu2 %v10793_v59  ;;  %5962 = vmatpush.bf16.msra.mxu3 %v8150_v32  ;;  %v9935_v32 = vld [vmem:[#allocation13 + $0x204] sm:$0xf] }
 0x2db   :  { %5948 = vmatpush.bf16.msra.mxu2 %v7954_v13  ;;  %v8119_v13 = vld [vmem:[#allocation13 + $0x2fc] sm:$0xf0] }
 0x2dc   :  { %v8122_v52 = vor.u32 %v9963_v36, %v8119_v13  ;;  %v8819_v36 = vld [vmem:[#allocation13 + $0x874] sm:$0xf0]  ;;  %v8425_v13 = vld [vmem:[#allocation13 + $0x548] sm:$0xf] }
 0x2dd   :  { %5924 = vmatpush.bf16.msra.mxu0 %v9238_v4  ;;  %5885 = vmatpush.bf16.msrb.mxu1 %v8566_v15  ;;  %v5697_v45 = vpop.f32.mrf.mxu2  ;;  %v10043_v4 = vld [vmem:[#allocation13 + $0x560] sm:$0xf0]  ;;  %v8454_v15 = vor.u32 %v10050_v35, %v8453_v62  ;;  %v8822_v31 = vor.u32 %v10138_v8, %v8819_v36  ;;  %v10012_v62 = vld [vmem:[#allocation13 + $0x46c] sm:$0xf]  ;;  %v8315_v35 = vld [vmem:[#allocation13 + $0x484] sm:$0xf0] }
 0x2de   :  { %5963 = vmatpush.bf16.msra.mxu3 %v8122_v52  ;;  %v10829_v47 = vadd.f32 %v5697_v45, %v10822_v39  ;;  %v8482_v39 = vor.u32 %v10057_v55, %v8481_v54  ;;  %v8010_v52 = vor.u32 %v9935_v32, %v8007_v7  ;;  %v8374_v54 = vor.u32 %v10026_v38, %v8371_v41  ;;  %v9433_v7 = vld [vmem:[#allocation13 + $0xd28] sm:$0xf]  ;;  %v10295_v8 = vld [vmem:[#allocation13 + $0xd40] sm:$0xf0]  ;;  %v10180_v36 = vld [vmem:[#allocation13 + $0x9ac] sm:$0xf] }
 0x2df   :  { %5949 = vmatpush.bf16.msra.mxu2 %v7926_v33  ;;  %v8094_v33 = vor.u32 %v9956_v21, %v8091_v22  ;;  %v9517_v21 = vld [vmem:[#allocation13 + $0xdd0] sm:$0xf]  ;;  %v10316_v22 = vld [vmem:[#allocation13 + $0xde8] sm:$0xf0]  ;;  %v9018_v32 = vor.u32 %v10187_v1, %v9015_v61  ;;  %v10281_v38 = vld [vmem:[#allocation13 + $0xcd0] sm:$0xf0] }
 0x2e0   :  { %v9518_v14 = vor.u32 %v10316_v22, %v9517_v21  ;;  %v8679_v21 = vld [vmem:[#allocation13 + $0x75c] sm:$0xf0]  ;;  %v10173_v22 = vld [vmem:[#allocation13 + $0x974] sm:$0xf]  ;;  %v10096_v41 = vld [vmem:[#allocation13 + $0x70c] sm:$0xf] }
 0x2e1   :  { %5925 = vmatpush.bf16.msra.mxu0 %v9210_v24  ;;  %5886 = vmatpush.bf16.msrb.mxu1 %v8538_v25  ;;  %v10131_v24 = vld [vmem:[#allocation13 + $0x824] sm:$0xf]  ;;  %v9098_v25 = vor.u32 %v10211_v12, %v9097_v16  ;;  %v9434_v16 = vor.u32 %v10295_v8, %v9433_v7  ;;  %v10005_v12 = vld [vmem:[#allocation13 + $0x434] sm:$0xf]  ;;  %v9918_v61 = vld [vmem:[#allocation13 + $0x178] sm:$0xf0] }
 0x2e2   :  { %5964 = vmatpush.bf16.msra.mxu3 %v8094_v33  ;;  %v8426_v33 = vor.u32 %v10043_v4, %v8425_v13  ;;  %v8794_v34 = vor.u32 %v10131_v24, %v8791_v26  ;;  %v8987_v13 = vld [vmem:[#allocation13 + $0x9c4] sm:$0xf0]  ;;  %v8959_v24 = vld [vmem:[#allocation13 + $0x98c] sm:$0xf0]  ;;  %v10152_v7 = vld [vmem:[#allocation13 + $0x8cc] sm:$0xf] }
 0x2e3   :  { %5950 = vmatpush.bf16.msra.mxu2 %v7898_v56  ;;  %v7755_v56 = vld [vmem:[#allocation13 + $0x24] sm:$0xf0] }
 0x2e4   :  { %v7758_v2 = vor.u32 %v9872_v28, %v7755_v56  ;;  %v10019_v28 = vld [vmem:[#allocation13 + $0x4a4] sm:$0xf]  ;;  %v8343_v56 = vld [vmem:[#allocation13 + $0x4bc] sm:$0xf0] }
 0x2e5   :  { %5926 = vmatpush.bf16.msra.mxu0 %v9182_v46  ;;  %5887 = vmatpush.bf16.msrb.mxu1 %v8510_v48  ;;  %v5699_v43 = vpop.f32.mrf.mxu2  ;;  %v9489_v46 = vld [vmem:[#allocation13 + $0xd98] sm:$0xf]  ;;  %v10309_v48 = vld [vmem:[#allocation13 + $0xdb0] sm:$0xf0] }
 0x2e6   :  { %5965 = vmatpush.bf16.msra.mxu3 %v8066_v53  ;;  %v9043_v53 = vld [vmem:[#allocation13 + $0xa34] sm:$0xf0]  ;;  %v9490_v55 = vor.u32 %v10309_v48, %v9489_v46  ;;  %v10110_v43 = vld [vmem:[#allocation13 + $0x77c] sm:$0xf] }
 0x2e7   :  { %5951 = vmatpush.bf16.msra.mxu2 %v7870_v5  ;;  %v8850_v5 = vor.u32 %v10145_v63, %v8847_v0  ;;  %v10302_v63 = vld [vmem:[#allocation13 + $0xd78] sm:$0xf0]  ;;  %v10117_v0 = vld [vmem:[#allocation13 + $0x7b4] sm:$0xf]  ;;  %v8931_v46 = vld [vmem:[#allocation13 + $0x954] sm:$0xf0] }
 0x2e9   :  { %5927 = vmatpush.bf16.msra.mxu0 %v9154_v60  ;;  %5888 = vmatpush.bf16.msrb.mxu1 %v8482_v39  ;;  %v9461_v60 = vld [vmem:[#allocation13 + $0xd60] sm:$0xf]  ;;  %v8735_v39 = vld [vmem:[#allocation13 + $0x7cc] sm:$0xf0] }
 0x2ea   :  { %5966 = vmatpush.bf16.msra.mxu3 %v8038_v3  ;;  %v9462_v3 = vor.u32 %v10302_v63, %v9461_v60  ;;  %v10159_v63 = vld [vmem:[#allocation13 + $0x904] sm:$0xf] }
 0x2eb   :  { %5952 = vmatpush.bf16.msra.mxu2 %v7842_v18  ;;  %v9928_v18 = vld [vmem:[#allocation13 + $0x1cc] sm:$0xf] }
 0x2ec   :  { %v7982_v30 = vor.u32 %v9928_v18, %v7979_v9  ;;  %v8287_v18 = vld [vmem:[#allocation13 + $0x44c] sm:$0xf0]  ;;  %v8990_v9 = vor.u32 %v10180_v36, %v8987_v13 }
 0x2ed   :  { %5928 = vmatpush.bf16.msra.mxu0 %v9126_v11  ;;  %5889 = vmatpush.bf16.msrb.mxu1 %v8454_v15  ;;  %v8707_v11 = vld [vmem:[#allocation13 + $0x794] sm:$0xf0]  ;;  %v8318_v15 = vor.u32 %v10012_v62, %v8315_v35  ;;  %v9295_v36 = vld [vmem:[#allocation13 + $0xc2c] sm:$0xf0] }
 0x2ee   :  { %5967 = vmatpush.bf16.msra.mxu3 %v8010_v52  ;;  %v8710_v52 = vor.u32 %v10110_v43, %v8707_v11  ;;  %v8875_v43 = vld [vmem:[#allocation13 + $0x8e4] sm:$0xf0]  ;;  %v10257_v11 = vld [vmem:[#allocation13 + $0xc14] sm:$0xf] }
 0x2ef   :  { %5953 = vmatpush.bf16.msra.mxu2 %v7814_v29  ;;  %v9071_v29 = vld [vmem:[#allocation13 + $0xa6c] sm:$0xf0] }
 0x2f0   :  { %v9074_v45 = vor.u32 %v10201_v27, %v9071_v29  ;;  %v9406_v27 = vor.u32 %v10288_v20, %v9405_v19  ;;  %v9998_v29 = vld [vmem:[#allocation13 + $0x3fc] sm:$0xf]  ;;  %v9981_v19 = vld [vmem:[#allocation13 + $0x370] sm:$0xf0] }
 0x2f1   :  { %5929 = vmatpush.bf16.msra.mxu0 %v9098_v25  ;;  %5890 = vmatpush.bf16.msrb.mxu1 %v8426_v33  ;;  %v8290_v25 = vor.u32 %v10005_v12, %v8287_v18  ;;  %v8259_v33 = vld [vmem:[#allocation13 + $0x414] sm:$0xf0]  ;;  %v7901_v12 = vld [vmem:[#allocation13 + $0x128] sm:$0xf] }
 0x2f2   :  { %5968 = vmatpush.bf16.msra.mxu3 %v7982_v30  ;;  %v8962_v30 = vor.u32 %v10173_v22, %v8959_v24  ;;  %v8262_v49 = vor.u32 %v9998_v29, %v8259_v33  ;;  %v10250_v24 = vld [vmem:[#allocation13 + $0xbdc] sm:$0xf] }
 0x2f3   :  { %5954 = vmatpush.bf16.msra.mxu2 %v7786_v51  ;;  %v10194_v51 = vld [vmem:[#allocation13 + $0xa1c] sm:$0xf] }
 0x2f4   :  { %v9046_v17 = vor.u32 %v10194_v51, %v9043_v53  ;;  %5891 = vmatmul.bf16.vlgmr.msrb.gmra.mxu1 %v10785_v42  ;;  %5930 = vmatmul.bf16.vlgmr.msra.gmra.mxu0 %v10809_v10  ;;  %v9925_v51 = vld [vmem:[#allocation13 + $0x1b0] sm:$0xf0]  ;;  %v10082_v33 = vld [vmem:[#allocation13 + $0x69c] sm:$0xf] }
 0x2f5   :  { %5974 = vmatpush.bf16.msrb.mxu0 %v8402_v23  ;;  %5935 = vmatpush.bf16.msra.mxu1 %v9518_v14  ;;  %v10837_v26 = vpop.f32.mrf.mxu3  ;;  %v9377_v14 = vld [vmem:[#allocation13 + $0xcb8] sm:$0xf]  ;;  %v7958_v60 = vor.u32 %v9925_v51, %v7957_v50 }
 0x2f6   :  { %6013 = vmatpush.bf16.msrb.mxu3 %v9074_v45  ;;  %v10166_v45 = vld [vmem:[#allocation13 + $0x93c] sm:$0xf]  ;;  %v9378_v53 = vor.u32 %v10281_v38, %v9377_v14  ;;  %v9904_v14 = vld [vmem:[#allocation13 + $0x108] sm:$0xf0]  ;;  %v8153_v38 = vld [vmem:[#allocation13 + $0x320] sm:$0xf] }
 0x2f7   :  { %5955 = vmatpush.bf16.msra.mxu2 %v7758_v2  ;;  %5969 = vmatmul.bf16.vlgmr.msra.gmra.mxu3 %v10768_v37  ;;  %v8346_v2 = vor.u32 %v10019_v28, %v8343_v56  ;;  %v8934_v56 = vor.u32 %v10166_v45, %v8931_v46 }
 0x2f9   :  { %5975 = vmatpush.bf16.msrb.mxu0 %v8374_v54  ;;  %5936 = vmatpush.bf16.msra.mxu1 %v9490_v55  ;;  %v9991_v54 = vld [vmem:[#allocation13 + $0x3c4] sm:$0xf]  ;;  %v8231_v55 = vld [vmem:[#allocation13 + $0x3dc] sm:$0xf0] }
 0x2fa   :  { %5956 = vmatmul.bf16.vlgmr.msra.gmra.mxu2 %v10777_v44  ;;  %6014 = vmatpush.bf16.msrb.mxu3 %v9046_v17  ;;  %v10274_v17 = vld [vmem:[#allocation13 + $0xc98] sm:$0xf0]  ;;  %v8234_v1 = vor.u32 %v9991_v54, %v8231_v55  ;;  %v8567_v54 = vld [vmem:[#allocation13 + $0x67c] sm:$0xf0]  ;;  %v7845_v55 = vld [vmem:[#allocation13 + $0xb8] sm:$0xf] }
 0x2fb   :  { %6000 = vmatpush.bf16.msrb.mxu2 %v8850_v5  ;;  %v8738_v5 = vor.u32 %v10117_v0, %v8735_v39  ;;  %v8903_v0 = vld [vmem:[#allocation13 + $0x91c] sm:$0xf0] }
 0x2fc   :  { %v7929_v39 = vld [vmem:[#allocation13 + $0x160] sm:$0xf]  ;;  %v8906_v8 = vor.u32 %v10159_v63, %v8903_v0  ;;  %v10236_v63 = vld [vmem:[#allocation13 + $0xb6c] sm:$0xf]  ;;  %v9211_v0 = vld [vmem:[#allocation13 + $0xb84] sm:$0xf0] }
 0x2fd   :  { %5976 = vmatpush.bf16.msrb.mxu0 %v8346_v2  ;;  %v10835_v4 = vpop.f32.mrf.mxu2  ;;  %5937 = vmatpush.bf16.msra.mxu1 %v9462_v3  ;;  %v9321_v2 = vld [vmem:[#allocation13 + $0xc48] sm:$0xf]  ;;  %v10267_v3 = vld [vmem:[#allocation13 + $0xc60] sm:$0xf0]  ;;  %v5712_v62 = vpop.f32.mrf.mxu3  ;;  %v7930_v13 = vor.u32 %v9918_v61, %v7929_v39  ;;  %v10068_v61 = vld [vmem:[#allocation13 + $0x62c] sm:$0xf] }
 0x2fe   :  { %6015 = vmatpush.bf16.msrb.mxu3 %v9018_v32  ;;  %v8203_v32 = vld [vmem:[#allocation13 + $0x3a4] sm:$0xf0]  ;;  %v9322_v20 = vor.u32 %v10267_v3, %v9321_v2  ;;  %v7817_v3 = vld [vmem:[#allocation13 + $0x80] sm:$0xf]  ;;  %v9890_v62 = vld [vmem:[#allocation13 + $0x98] sm:$0xf0] }
 0x2ff   :  { %6001 = vmatpush.bf16.msrb.mxu2 %v8822_v31  ;;  %v10103_v31 = vld [vmem:[#allocation13 + $0x744] sm:$0xf]  ;;  %v8539_v2 = vld [vmem:[#allocation13 + $0x644] sm:$0xf0] }
 0x300   :  { %v8682_v23 = vor.u32 %v10103_v31, %v8679_v21  ;;  %v9298_v31 = vor.u32 %v10257_v11, %v9295_v36  ;;  %v8878_v21 = vor.u32 %v10152_v7, %v8875_v43  ;;  %v8542_v11 = vor.u32 %v10068_v61, %v8539_v2  ;;  %v10229_v36 = vld [vmem:[#allocation13 + $0xb34] sm:$0xf]  ;;  %v10040_v61 = vld [vmem:[#allocation13 + $0x54c] sm:$0xf]  ;;  %v8427_v2 = vld [vmem:[#allocation13 + $0x564] sm:$0xf0] }
 0x301   :  { %5977 = vmatpush.bf16.msrb.mxu0 %v8318_v15  ;;  %5938 = vmatpush.bf16.msra.mxu1 %v9434_v16  ;;  %v10089_v15 = vld [vmem:[#allocation13 + $0x6d4] sm:$0xf]  ;;  %v8623_v16 = vld [vmem:[#allocation13 + $0x6ec] sm:$0xf0] }
 0x302   :  { %6016 = vmatpush.bf16.msrb.mxu3 %v8990_v9  ;;  %v8181_v9 = vld [vmem:[#allocation13 + $0x358] sm:$0xf]  ;;  %v8626_v22 = vor.u32 %v10089_v15, %v8623_v16  ;;  %v7818_v15 = vor.u32 %v9890_v62, %v7817_v3  ;;  %v10208_v62 = vld [vmem:[#allocation13 + $0xa8c] sm:$0xf] }
 0x303   :  { %6002 = vmatpush.bf16.msrb.mxu2 %v8794_v34  ;;  %v8651_v34 = vld [vmem:[#allocation13 + $0x724] sm:$0xf0]  ;;  %v8182_v29 = vor.u32 %v9981_v19, %v8181_v9  ;;  %v9883_v9 = vld [vmem:[#allocation13 + $0x60] sm:$0xf0]  ;;  %v8069_v19 = vld [vmem:[#allocation13 + $0x278] sm:$0xf] }
 0x304   :  { %v8654_v28 = vor.u32 %v10096_v41, %v8651_v34  ;;  %v9974_v41 = vld [vmem:[#allocation13 + $0x338] sm:$0xf0] }
 0x305   :  { %5978 = vmatpush.bf16.msrb.mxu0 %v8290_v25  ;;  %v5751_v48 = vpop.f32.mrf.mxu2  ;;  %5939 = vmatpush.bf16.msra.mxu1 %v9406_v27  ;;  %v9267_v25 = vld [vmem:[#allocation13 + $0xbf4] sm:$0xf0]  ;;  %v10840_v34 = vpop.f32.mrf.mxu3  ;;  %v8154_v51 = vor.u32 %v9974_v41, %v8153_v38  ;;  %v9946_v38 = vld [vmem:[#allocation13 + $0x258] sm:$0xf0] }
 0x306   :  { %6017 = vmatpush.bf16.msrb.mxu3 %v8962_v30  ;;  %v7873_v30 = vld [vmem:[#allocation13 + $0xf0] sm:$0xf]  ;;  %v9270_v45 = vor.u32 %v10250_v24, %v9267_v25  ;;  %v10243_v48 = vld [vmem:[#allocation13 + $0xba4] sm:$0xf]  ;;  %v9155_v24 = vld [vmem:[#allocation13 + $0xb14] sm:$0xf0] }
 0x307   :  { %6003 = vmatpush.bf16.msrb.mxu2 %v8766_v57  ;;  %v9349_v57 = vld [vmem:[#allocation13 + $0xc80] sm:$0xf]  ;;  %v7874_v50 = vor.u32 %v9904_v14, %v7873_v30  ;;  %v9876_v30 = vld [vmem:[#allocation13 + $0x28] sm:$0xf0] }
 0x308   :  { %v9350_v35 = vor.u32 %v10274_v17, %v9349_v57  ;;  %v9967_v57 = vld [vmem:[#allocation13 + $0x300] sm:$0xf0]  ;;  %v8041_v14 = vld [vmem:[#allocation13 + $0x240] sm:$0xf] }
 0x309   :  { %5979 = vmatpush.bf16.msrb.mxu0 %v8262_v49  ;;  %5940 = vmatpush.bf16.msra.mxu1 %v9378_v53  ;;  %v9239_v49 = vld [vmem:[#allocation13 + $0xbbc] sm:$0xf0]  ;;  %v10075_v53 = vld [vmem:[#allocation13 + $0x664] sm:$0xf] }
 0x30a   :  { %6018 = vmatpush.bf16.msrb.mxu3 %v8934_v56  ;;  %v8125_v56 = vld [vmem:[#allocation13 + $0x2e8] sm:$0xf]  ;;  %v9242_v17 = vor.u32 %v10243_v48, %v9239_v49  ;;  %v8853_v48 = vld [vmem:[#allocation13 + $0x898] sm:$0xf]  ;;  %v10149_v49 = vld [vmem:[#allocation13 + $0x8b0] sm:$0xf0] }
 0x30b   :  { %6004 = vmatpush.bf16.msrb.mxu2 %v8738_v5  ;;  %v9984_v5 = vld [vmem:[#allocation13 + $0x38c] sm:$0xf] }
 0x30c   :  { %v8206_v18 = vor.u32 %v9984_v5, %v8203_v32  ;;  %v9960_v5 = vld [vmem:[#allocation13 + $0x2c8] sm:$0xf0] }
 0x30d   :  { %5980 = vmatpush.bf16.msrb.mxu0 %v8234_v1  ;;  %5941 = vmatpush.bf16.msra.mxu1 %v9350_v35  ;;  %v8126_v1 = vor.u32 %v9967_v57, %v8125_v56  ;;  %v8097_v35 = vld [vmem:[#allocation13 + $0x2b0] sm:$0xf]  ;;  %v5764_v43 = vpop.f32.mrf.mxu3  ;;  %v10047_v56 = vld [vmem:[#allocation13 + $0x584] sm:$0xf]  ;;  %v8455_v57 = vld [vmem:[#allocation13 + $0x59c] sm:$0xf0] }
 0x30e   :  { %6019 = vmatpush.bf16.msrb.mxu3 %v8906_v8  ;;  %v9214_v8 = vor.u32 %v10236_v63, %v9211_v0  ;;  %v8098_v16 = vor.u32 %v9960_v5, %v8097_v35  ;;  %v9939_v63 = vld [vmem:[#allocation13 + $0x220] sm:$0xf0]  ;;  %v8825_v0 = vld [vmem:[#allocation13 + $0x860] sm:$0xf]  ;;  %v8458_v3 = vor.u32 %v10047_v56, %v8455_v57  ;;  %v9099_v35 = vld [vmem:[#allocation13 + $0xaa4] sm:$0xf0] }
 0x30f   :  { %6005 = vmatpush.bf16.msrb.mxu2 %v8710_v52  ;;  %v9911_v52 = vld [vmem:[#allocation13 + $0x140] sm:$0xf0]  ;;  %v10845_v32 = vpop.f32.mrf.mxu0  ;;  %v7985_v5 = vld [vmem:[#allocation13 + $0x1d0] sm:$0xf]  ;;  %v9932_v43 = vld [vmem:[#allocation13 + $0x1e8] sm:$0xf0] }
 0x310   :  { %v7902_v27 = vor.u32 %v9911_v52, %v7901_v12  ;;  %v10061_v12 = vld [vmem:[#allocation13 + $0x5f4] sm:$0xf]  ;;  %v7789_v52 = vld [vmem:[#allocation13 + $0x48] sm:$0xf]  ;;  %v9463_v56 = vld [vmem:[#allocation13 + $0xd7c] sm:$0xf0] }
 0x311   :  { %5981 = vmatpush.bf16.msrb.mxu0 %v8206_v18  ;;  %5942 = vmatpush.bf16.msra.mxu1 %v9322_v20  ;;  %v8511_v18 = vld [vmem:[#allocation13 + $0x60c] sm:$0xf0]  ;;  %v9953_v20 = vld [vmem:[#allocation13 + $0x290] sm:$0xf0]  ;;  %v7790_v25 = vor.u32 %v9883_v9, %v7789_v52  ;;  %v9102_v52 = vor.u32 %v10208_v62, %v9099_v35  ;;  %v10135_v9 = vld [vmem:[#allocation13 + $0x840] sm:$0xf0] }
 0x312   :  { %6020 = vmatpush.bf16.msrb.mxu3 %v8878_v21  ;;  %v8514_v21 = vor.u32 %v10061_v12, %v8511_v18  ;;  %v8797_v12 = vld [vmem:[#allocation13 + $0x828] sm:$0xf]  ;;  %v8741_v57 = vld [vmem:[#allocation13 + $0x7b8] sm:$0xf] }
 0x313   :  { %6006 = vmatpush.bf16.msrb.mxu2 %v8682_v23  ;;  %v8595_v23 = vld [vmem:[#allocation13 + $0x6b4] sm:$0xf0] }
 0x314   :  { %v8598_v46 = vor.u32 %v10082_v33, %v8595_v23  ;;  %5943 = vmatmul.bf16.vlgmr.msra.gmra.mxu1 %v10816_v58  ;;  %5982 = vmatmul.bf16.vlgmr.msrb.gmra.mxu0 %v10789_v6  ;;  %v8483_v33 = vld [vmem:[#allocation13 + $0x5d4] sm:$0xf0]  ;;  %v7761_v23 = vld [vmem:[#allocation13 + $0x10] sm:$0xf] }
 0x315   :  { %6026 = vmatpush.bf16.msra.mxu0 %v9298_v31  ;;  %5987 = vmatpush.bf16.msrb.mxu1 %v8626_v22  ;;  %v10222_v22 = vld [vmem:[#allocation13 + $0xafc] sm:$0xf] }
 0x316   :  { %6065 = vmatpush.bf16.msra.mxu3 %v8182_v29  ;;  %v10054_v29 = vld [vmem:[#allocation13 + $0x5bc] sm:$0xf] }
 0x317   :  { %6007 = vmatpush.bf16.msrb.mxu2 %v8654_v28  ;;  %v9897_v28 = vld [vmem:[#allocation13 + $0xd0] sm:$0xf0]  ;;  %6021 = vmatmul.bf16.vlgmr.msrb.gmra.mxu3 %v10803_v40  ;;  %v5725_v41 = vpop.f32.mrf.mxu0 }
 0x318   :  { %v7846_v39 = vor.u32 %v9897_v28, %v7845_v55  ;;  %v7762_v55 = vor.u32 %v9876_v30, %v7761_v23  ;;  %v8042_v28 = vor.u32 %v9946_v38, %v8041_v14  ;;  %v10306_v30 = vld [vmem:[#allocation13 + $0xd9c] sm:$0xf]  ;;  %v9491_v14 = vld [vmem:[#allocation13 + $0xdb4] sm:$0xf0]  ;;  %v8769_v38 = vld [vmem:[#allocation13 + $0x7f0] sm:$0xf] }
 0x319   :  { %6027 = vmatpush.bf16.msra.mxu0 %v9270_v45  ;;  %5988 = vmatpush.bf16.msrb.mxu1 %v8598_v46  ;;  %v9158_v46 = vor.u32 %v10222_v22, %v9155_v24  ;;  %v7986_v24 = vor.u32 %v9932_v43, %v7985_v5  ;;  %v10128_v41 = vld [vmem:[#allocation13 + $0x808] sm:$0xf0]  ;;  %v8713_v43 = vld [vmem:[#allocation13 + $0x780] sm:$0xf] }
 0x31a   :  { %6008 = vmatmul.bf16.vlgmr.msrb.gmra.mxu2 %v10793_v59  ;;  %6066 = vmatpush.bf16.msra.mxu3 %v8154_v51  ;;  %v8486_v51 = vor.u32 %v10054_v29, %v8483_v33  ;;  %v10030_v29 = vld [vmem:[#allocation13 + $0x4f8] sm:$0xf0]  ;;  %v8798_v33 = vor.u32 %v10135_v9, %v8797_v12  ;;  %v10292_v5 = vld [vmem:[#allocation13 + $0xd2c] sm:$0xf] }
 0x31b   :  { %6052 = vmatpush.bf16.msra.mxu2 %v7958_v60  ;;  %v8570_v60 = vor.u32 %v10075_v53, %v8567_v54  ;;  %v10215_v53 = vld [vmem:[#allocation13 + $0xac4] sm:$0xf]  ;;  %v9127_v54 = vld [vmem:[#allocation13 + $0xadc] sm:$0xf0] }
 0x31d   :  { %6028 = vmatpush.bf16.msra.mxu0 %v9242_v17  ;;  %v10847_v7 = vpop.f32.mrf.mxu2  ;;  %5989 = vmatpush.bf16.msrb.mxu1 %v8570_v60  ;;  %v8854_v17 = vor.u32 %v10149_v49, %v8853_v48  ;;  %v8013_v60 = vld [vmem:[#allocation13 + $0x208] sm:$0xf]  ;;  %v9494_v49 = vor.u32 %v10306_v30, %v9491_v14 }
 0x31e   :  { %6067 = vmatpush.bf16.msra.mxu3 %v8126_v1  ;;  %v10142_v1 = vld [vmem:[#allocation13 + $0x878] sm:$0xf0] }
 0x31f   :  { %6053 = vmatpush.bf16.msra.mxu2 %v7930_v13  ;;  %v9183_v13 = vld [vmem:[#allocation13 + $0xb4c] sm:$0xf0]  ;;  %v10851_v18 = vpop.f32.mrf.mxu0 }
 0x320   :  { %v9186_v31 = vor.u32 %v10229_v36, %v9183_v13  ;;  %v10037_v36 = vld [vmem:[#allocation13 + $0x530] sm:$0xf0]  ;;  %v8826_v13 = vor.u32 %v10142_v1, %v8825_v0  ;;  %v10191_v0 = vld [vmem:[#allocation13 + $0xa00] sm:$0xf0] }
 0x321   :  { %6029 = vmatpush.bf16.msra.mxu0 %v9214_v8  ;;  %5990 = vmatpush.bf16.msrb.mxu1 %v8542_v11  ;;  %v8014_v8 = vor.u32 %v9939_v63, %v8013_v60  ;;  %v8405_v11 = vld [vmem:[#allocation13 + $0x518] sm:$0xf]  ;;  %v10121_v60 = vld [vmem:[#allocation13 + $0x7d0] sm:$0xf0]  ;;  %v9021_v63 = vld [vmem:[#allocation13 + $0x9e8] sm:$0xf] }
 0x322   :  { %6068 = vmatpush.bf16.msra.mxu3 %v8098_v16  ;;  %v9519_v16 = vld [vmem:[#allocation13 + $0xdec] sm:$0xf0]  ;;  %v8406_v22 = vor.u32 %v10037_v36, %v8405_v11  ;;  %v8742_v62 = vor.u32 %v10121_v60, %v8741_v57  ;;  %v9022_v35 = vor.u32 %v10191_v0, %v9021_v63  ;;  %v10114_v11 = vld [vmem:[#allocation13 + $0x798] sm:$0xf0] }
 0x323   :  { %6054 = vmatpush.bf16.msra.mxu2 %v7902_v27  ;;  %v8070_v27 = vor.u32 %v9953_v20, %v8069_v19  ;;  %v9077_v19 = vld [vmem:[#allocation13 + $0xa58] sm:$0xf]  ;;  %v10205_v20 = vld [vmem:[#allocation13 + $0xa70] sm:$0xf0]  ;;  %v8993_v36 = vld [vmem:[#allocation13 + $0x9b0] sm:$0xf] }
 0x324   :  { %v9078_v23 = vor.u32 %v10205_v20, %v9077_v19  ;;  %v8293_v19 = vld [vmem:[#allocation13 + $0x438] sm:$0xf]  ;;  %v8714_v20 = vor.u32 %v10114_v11, %v8713_v43  ;;  %v9922_v57 = vld [vmem:[#allocation13 + $0x19c] sm:$0xf]  ;;  %v8909_v43 = vld [vmem:[#allocation13 + $0x908] sm:$0xf] }
 0x325   :  { %6030 = vmatpush.bf16.msra.mxu0 %v9186_v31  ;;  %v5803_v45 = vpop.f32.mrf.mxu2  ;;  %5991 = vmatpush.bf16.msrb.mxu1 %v8514_v21  ;;  %v8430_v21 = vor.u32 %v10040_v61, %v8427_v2  ;;  %v8321_v61 = vld [vmem:[#allocation13 + $0x470] sm:$0xf]  ;;  %v10016_v2 = vld [vmem:[#allocation13 + $0x488] sm:$0xf0] }
 0x326   :  { %6069 = vmatpush.bf16.msra.mxu3 %v8070_v27  ;;  %v8377_v27 = vld [vmem:[#allocation13 + $0x4e0] sm:$0xf]  ;;  %v8322_v12 = vor.u32 %v10016_v2, %v8321_v61  ;;  %v9995_v61 = vld [vmem:[#allocation13 + $0x3e0] sm:$0xf0] }
 0x327   :  { %6055 = vmatpush.bf16.msra.mxu2 %v7874_v50  ;;  %v10849_v50 = vpop.f32.mrf.mxu3  ;;  %v9049_v45 = vld [vmem:[#allocation13 + $0xa20] sm:$0xf]  ;;  %v8378_v48 = vor.u32 %v10030_v29, %v8377_v27  ;;  %v10107_v27 = vld [vmem:[#allocation13 + $0x760] sm:$0xf0]  ;;  %v10177_v29 = vld [vmem:[#allocation13 + $0x990] sm:$0xf0] }
 0x329   :  { %6031 = vmatpush.bf16.msra.mxu0 %v9158_v46  ;;  %5992 = vmatpush.bf16.msrb.mxu1 %v8486_v51  ;;  %v10198_v46 = vld [vmem:[#allocation13 + $0xa38] sm:$0xf0]  ;;  %v8349_v51 = vld [vmem:[#allocation13 + $0x4a8] sm:$0xf] }
 0x32a   :  { %6070 = vmatpush.bf16.msra.mxu3 %v8042_v28  ;;  %v10299_v28 = vld [vmem:[#allocation13 + $0xd64] sm:$0xf] }
 0x32b   :  { %6056 = vmatpush.bf16.msra.mxu2 %v7846_v39  ;;  %v9130_v39 = vor.u32 %v10215_v53, %v9127_v54  ;;  %v10023_v53 = vld [vmem:[#allocation13 + $0x4c0] sm:$0xf0]  ;;  %v8770_v54 = vor.u32 %v10128_v41, %v8769_v38  ;;  %v9466_v1 = vor.u32 %v10299_v28, %v9463_v56  ;;  %v8265_v38 = vld [vmem:[#allocation13 + $0x400] sm:$0xf]  ;;  %v10002_v41 = vld [vmem:[#allocation13 + $0x418] sm:$0xf0] }
 0x32c   :  { %v8266_v56 = vor.u32 %v10002_v41, %v8265_v38 }
 0x32d   :  { %6032 = vmatpush.bf16.msra.mxu0 %v9130_v39  ;;  %5993 = vmatpush.bf16.msrb.mxu1 %v8458_v3  ;;  %v8350_v39 = vor.u32 %v10023_v53, %v8349_v51  ;;  %v5711_v3 = vadd.f32 %v10837_v26, %v10829_v47  ;;  %v10009_v47 = vld [vmem:[#allocation13 + $0x450] sm:$0xf0]  ;;  %v8657_v51 = vld [vmem:[#allocation13 + $0x710] sm:$0xf]  ;;  %v10100_v53 = vld [vmem:[#allocation13 + $0x728] sm:$0xf0] }
 0x32e   :  { %6071 = vmatpush.bf16.msra.mxu3 %v8014_v8  ;;  %v9435_v8 = vld [vmem:[#allocation13 + $0xd44] sm:$0xf0] }
 0x32f   :  { %6057 = vmatpush.bf16.msra.mxu2 %v7818_v15  ;;  %v10313_v15 = vld [vmem:[#allocation13 + $0xdd4] sm:$0xf]  ;;  %v5816_v31 = vpop.f32.mrf.mxu3  ;;  %v9438_v9 = vor.u32 %v10292_v5, %v9435_v8  ;;  %v10271_v5 = vld [vmem:[#allocation13 + $0xc84] sm:$0xf]  ;;  %v9351_v8 = vld [vmem:[#allocation13 + $0xc9c] sm:$0xf0] }
 0x331   :  { %6033 = vmatpush.bf16.msra.mxu0 %v9102_v52  ;;  %5994 = vmatpush.bf16.msrb.mxu1 %v8430_v21  ;;  %v5736_v52 = vpop.f32.mrf.mxu1  ;;  %v10285_v21 = vld [vmem:[#allocation13 + $0xcf4] sm:$0xf] }
 0x332   :  { %6072 = vmatpush.bf16.msra.mxu3 %v7986_v24  ;;  %v8685_v24 = vld [vmem:[#allocation13 + $0x748] sm:$0xf] }
 0x333   :  { %6058 = vmatpush.bf16.msra.mxu2 %v7790_v25  ;;  %v9522_v25 = vor.u32 %v10313_v15, %v9519_v16  ;;  %v5724_v15 = vadd.f32 %v10845_v32, %v5711_v3  ;;  %v8965_v32 = vld [vmem:[#allocation13 + $0x978] sm:$0xf] }
 0x334   :  { %5995 = vmatmul.bf16.vlgmr.msrb.gmra.mxu1 %v10785_v42  ;;  %6034 = vmatmul.bf16.vlgmr.msra.gmra.mxu0 %v10809_v10 }
 0x335   :  { %6078 = vmatpush.bf16.msrb.mxu0 %v8406_v22  ;;  %6039 = vmatpush.bf16.msra.mxu1 %v9522_v25  ;;  %v5737_v26 = vadd.f32 %v5736_v52, %v5724_v15  ;;  %v9407_v22 = vld [vmem:[#allocation13 + $0xd0c] sm:$0xf0]  ;;  %v10163_v15 = vld [vmem:[#allocation13 + $0x920] sm:$0xf0]  ;;  %v7931_v52 = vld [vmem:[#allocation13 + $0x17c] sm:$0xf0] }
 0x336   :  { %6117 = vmatpush.bf16.msrb.mxu3 %v9078_v23  ;;  %v10862_v23 = vld [vmem:[#allocation14] sm:$0xff]  ;;  %v9410_v14 = vor.u32 %v10285_v21, %v9407_v22  ;;  %v8910_v22 = vor.u32 %v10163_v15, %v8909_v43  ;;  %v8573_v43 = vld [vmem:[#allocation13 + $0x668] sm:$0xf] }
 0x337   :  { %6059 = vmatpush.bf16.msra.mxu2 %v7762_v55  ;;  %v9050_v55 = vor.u32 %v10198_v46, %v9049_v45  ;;  %6073 = vmatmul.bf16.vlgmr.msra.gmra.mxu3 %v10768_v37  ;;  %10336 = vtanh.f32 %v5737_v26  ;;  %v3320_v30 = vperm.slane %v10862_v23, 2  ;;  %v8686_v45 = vor.u32 %v10107_v27, %v8685_v24  ;;  %v5866_v3 = vpop.f32.mrf.mxu3  ;;  %v8209_v26 = vld [vmem:[#allocation13 + $0x390] sm:$0xf]  ;;  %v10156_v24 = vld [vmem:[#allocation13 + $0x8e8] sm:$0xf0] }
 0x338   :  { %v8966_v46 = vor.u32 %v10177_v29, %v8965_v32  ;;  %v3319_v60 = vperm.slane %v10862_v23, 1  ;;  %v9301_v27 = vld [vmem:[#allocation13 + $0xc18] sm:$0xf]  ;;  %v10261_v32 = vld [vmem:[#allocation13 + $0xc30] sm:$0xf0] }
 0x339   :  { %6079 = vmatpush.bf16.msrb.mxu0 %v8378_v48  ;;  %6040 = vmatpush.bf16.msra.mxu1 %v9494_v49  ;;  %v10278_v48 = vld [vmem:[#allocation13 + $0xcbc] sm:$0xf]  ;;  %v9379_v49 = vld [vmem:[#allocation13 + $0xcd4] sm:$0xf0]  ;;  %v5738_v0 = vpop.f32.mrf.mxu1 }
 0x33a   :  { %6060 = vmatmul.bf16.vlgmr.msra.gmra.mxu2 %v10777_v44  ;;  %6118 = vmatpush.bf16.msrb.mxu3 %v9050_v55  ;;  %v10170_v55 = vld [vmem:[#allocation13 + $0x958] sm:$0xf0]  ;;  %v5750_v21 = vadd.f32 %v10835_v4, %v3319_v60  ;;  %v8601_v60 = vld [vmem:[#allocation13 + $0x6a0] sm:$0xf]  ;;  %v9901_v0 = vld [vmem:[#allocation13 + $0xf4] sm:$0xf] }
 0x33b   :  { %6104 = vmatpush.bf16.msrb.mxu2 %v8854_v17  ;;  %v5777_v17 = vpop.f32.mrf.mxu0 }
 0x33c   :  { %v7959_v17 = vld [vmem:[#allocation13 + $0x1b4] sm:$0xf0]  ;;  %v5763_v38 = vadd.f32 %v10840_v34, %v5750_v21  ;;  %v8545_v21 = vld [vmem:[#allocation13 + $0x630] sm:$0xf] }
 0x33d   :  { %6080 = vmatpush.bf16.msrb.mxu0 %v8350_v39  ;;  %v5853_v16 = vpop.f32.mrf.mxu2  ;;  %6041 = vmatpush.bf16.msra.mxu1 %v9466_v1  ;;  %v9382_v39 = vor.u32 %v10278_v48, %v9379_v49  ;;  %v8237_v1 = vld [vmem:[#allocation13 + $0x3c8] sm:$0xf]  ;;  %v10337_v2 = vpop.eup %10336  ;;  %v8183_v48 = vld [vmem:[#allocation13 + $0x374] sm:$0xf0] }
 0x33e   :  { %6119 = vmatpush.bf16.msrb.mxu3 %v9022_v35  ;;  %v5854_v63 = vadd.f32 %v5853_v16, %v3320_v30  ;;  %6371 = vst [vmem:[#allocation16] sm:$0xff] %v10337_v2  ;;  %v9915_v16 = vld [vmem:[#allocation13 + $0x164] sm:$0xf]  ;;  %v10093_v30 = vld [vmem:[#allocation13 + $0x6f0] sm:$0xf0] }
 0x33f   :  { %6105 = vmatpush.bf16.msrb.mxu2 %v8826_v13  ;;  %v10184_v13 = vld [vmem:[#allocation13 + $0x9c8] sm:$0xf0]  ;;  %v7934_v29 = vor.u32 %v9915_v16, %v7931_v52  ;;  %v8155_v2 = vld [vmem:[#allocation13 + $0x33c] sm:$0xf0]  ;;  %v7847_v16 = vld [vmem:[#allocation13 + $0xd4] sm:$0xf0] }
 0x340   :  { %v8994_v31 = vor.u32 %v10184_v13, %v8993_v36  ;;  %v10866_v11 = vadd.f32 %v5866_v3, %v5854_v63  ;;  %v7962_v13 = vor.u32 %v9922_v57, %v7959_v17  ;;  %v10254_v57 = vld [vmem:[#allocation13 + $0xbf8] sm:$0xf0]  ;;  %v8127_v52 = vld [vmem:[#allocation13 + $0x304] sm:$0xf0] }
 0x341   :  { %6081 = vmatpush.bf16.msrb.mxu0 %v8322_v12  ;;  %6042 = vmatpush.bf16.msra.mxu1 %v9438_v9  ;;  %v8238_v12 = vor.u32 %v9995_v61, %v8237_v1  ;;  %v10264_v9 = vld [vmem:[#allocation13 + $0xc4c] sm:$0xf]  ;;  %v5788_v4 = vpop.f32.mrf.mxu1  ;;  %v10086_v63 = vld [vmem:[#allocation13 + $0x6b8] sm:$0xf0]  ;;  %v7875_v1 = vld [vmem:[#allocation13 + $0x10c] sm:$0xf0] }
 0x342   :  { %6120 = vmatpush.bf16.msrb.mxu3 %v8994_v31  ;;  %v8881_v31 = vld [vmem:[#allocation13 + $0x8d0] sm:$0xf]  ;;  %v9971_v61 = vld [vmem:[#allocation13 + $0x324] sm:$0xf]  ;;  %v8602_v3 = vor.u32 %v10086_v63, %v8601_v60  ;;  %v9161_v60 = vld [vmem:[#allocation13 + $0xb00] sm:$0xf] }
 0x343   :  { %6106 = vmatpush.bf16.msrb.mxu2 %v8798_v33  ;;  %v10860_v25 = vpop.f32.mrf.mxu0  ;;  %v8294_v33 = vor.u32 %v10009_v47, %v8293_v19  ;;  %v9323_v19 = vld [vmem:[#allocation13 + $0xc64] sm:$0xf0]  ;;  %v9354_v47 = vor.u32 %v10271_v5, %v9351_v8  ;;  %v7878_v5 = vor.u32 %v9901_v0, %v7875_v1  ;;  %v8158_v8 = vor.u32 %v9971_v61, %v8155_v2  ;;  %v10226_v63 = vld [vmem:[#allocation13 + $0xb18] sm:$0xf0]  ;;  %v8489_v1 = vld [vmem:[#allocation13 + $0x5c0] sm:$0xf] }
 0x344   :  { %v9326_v49 = vor.u32 %v10264_v9, %v9323_v19  ;;  %v10058_v61 = vld [vmem:[#allocation13 + $0x5d8] sm:$0xf0]  ;;  %v7763_v2 = vld [vmem:[#allocation13 + $0x2c] sm:$0xf0] }
 0x345   :  { %6082 = vmatpush.bf16.msrb.mxu0 %v8294_v33  ;;  %v5855_v28 = vpop.f32.mrf.mxu2  ;;  %6043 = vmatpush.bf16.msra.mxu1 %v9410_v14  ;;  %v8629_v33 = vld [vmem:[#allocation13 + $0x6d8] sm:$0xf]  ;;  %v9908_v14 = vld [vmem:[#allocation13 + $0x12c] sm:$0xf] }
 0x346   :  { %6121 = vmatpush.bf16.msrb.mxu3 %v8966_v46  ;;  %v9978_v46 = vld [vmem:[#allocation13 + $0x35c] sm:$0xf]  ;;  %v8630_v28 = vor.u32 %v10093_v30, %v8629_v33  ;;  %v8099_v33 = vld [vmem:[#allocation13 + $0x2cc] sm:$0xf0] }
 0x347   :  { %6107 = vmatpush.bf16.msrb.mxu2 %v8770_v54  ;;  %v8937_v54 = vld [vmem:[#allocation13 + $0x940] sm:$0xf]  ;;  %v8186_v17 = vor.u32 %v9978_v46, %v8183_v48 }
 0x348   :  { %v8938_v35 = vor.u32 %v10170_v55, %v8937_v54  ;;  %v5868_v54 = vpop.f32.mrf.mxu3  ;;  %v8882_v55 = vor.u32 %v10156_v24, %v8881_v31  ;;  %v9887_v24 = vld [vmem:[#allocation13 + $0x84] sm:$0xf] }
 0x349   :  { %6083 = vmatpush.bf16.msrb.mxu0 %v8266_v56  ;;  %6044 = vmatpush.bf16.msra.mxu1 %v9382_v39  ;;  %v9273_v56 = vld [vmem:[#allocation13 + $0xbe0] sm:$0xf]  ;;  %v5790_v9 = vpop.f32.mrf.mxu1  ;;  %v9950_v54 = vld [vmem:[#allocation13 + $0x27c] sm:$0xf] }
 0x34a   :  { %6122 = vmatpush.bf16.msrb.mxu3 %v8938_v35  ;;  %v10247_v35 = vld [vmem:[#allocation13 + $0xbc0] sm:$0xf0]  ;;  %v9936_v9 = vld [vmem:[#allocation13 + $0x20c] sm:$0xf] }
 0x34b   :  { %6108 = vmatpush.bf16.msrb.mxu2 %v8742_v62  ;;  %v8658_v62 = vor.u32 %v10100_v53, %v8657_v51  ;;  %v5829_v36 = vpop.f32.mrf.mxu0  ;;  %v9302_v51 = vor.u32 %v10261_v32, %v9301_v27  ;;  %v5776_v53 = vadd.f32 %v10851_v18, %v5763_v38  ;;  %v9274_v18 = vor.u32 %v10254_v57, %v9273_v56  ;;  %v7819_v32 = vld [vmem:[#allocation13 + $0x9c] sm:$0xf0]  ;;  %v9189_v38 = vld [vmem:[#allocation13 + $0xb38] sm:$0xf] }
 0x34c   :  { %v10079_v36 = vld [vmem:[#allocation13 + $0x680] sm:$0xf0]  ;;  %v7822_v46 = vor.u32 %v9887_v24, %v7819_v32  ;;  %v8433_v24 = vld [vmem:[#allocation13 + $0x550] sm:$0xf] }
 0x34d   :  { %6084 = vmatpush.bf16.msrb.mxu0 %v8238_v12  ;;  %6045 = vmatpush.bf16.msra.mxu1 %v9354_v47  ;;  %v5789_v39 = vadd.f32 %v5788_v4, %v5776_v53  ;;  %v9964_v12 = vld [vmem:[#allocation13 + $0x2ec] sm:$0xf]  ;;  %v8574_v47 = vor.u32 %v10079_v36, %v8573_v43  ;;  %v8517_v4 = vld [vmem:[#allocation13 + $0x5f8] sm:$0xf]  ;;  %v7791_v53 = vld [vmem:[#allocation13 + $0x64] sm:$0xf0] }
 0x34e   :  { %6123 = vmatpush.bf16.msrb.mxu3 %v8910_v22  ;;  %v10072_v22 = vld [vmem:[#allocation13 + $0x648] sm:$0xf0]  ;;  %v9133_v43 = vld [vmem:[#allocation13 + $0xac8] sm:$0xf]  ;;  %v10219_v36 = vld [vmem:[#allocation13 + $0xae0] sm:$0xf0] }
 0x34f   :  { %6109 = vmatpush.bf16.msrb.mxu2 %v8714_v20  ;;  %v9988_v20 = vld [vmem:[#allocation13 + $0x3a8] sm:$0xf0]  ;;  %v5802_v15 = vadd.f32 %v10847_v7, %v5789_v39  ;;  %v8130_v7 = vor.u32 %v9964_v12, %v8127_v52  ;;  %v8461_v12 = vld [vmem:[#allocation13 + $0x588] sm:$0xf]  ;;  %v10051_v52 = vld [vmem:[#allocation13 + $0x5a0] sm:$0xf0] }
 0x350   :  { %v8210_v41 = vor.u32 %v9988_v20, %v8209_v26  ;;  %v9217_v26 = vld [vmem:[#allocation13 + $0xb70] sm:$0xf]  ;;  %v10240_v20 = vld [vmem:[#allocation13 + $0xb88] sm:$0xf0] }
 0x351   :  { %6046 = vmatpush.bf16.msra.mxu1 %v9326_v49  ;;  %v5815_v27 = vadd.f32 %v10849_v50, %v5802_v15  ;;  %v9218_v30 = vor.u32 %v10240_v20, %v9217_v26  ;;  %v10065_v49 = vld [vmem:[#allocation13 + $0x610] sm:$0xf0]  ;;  %v5840_v56 = vpop.f32.mrf.mxu1  ;;  %v8015_v26 = vld [vmem:[#allocation13 + $0x224] sm:$0xf0]  ;;  %v10139_v20 = vld [vmem:[#allocation13 + $0x864] sm:$0xf] }
 0x352   :  { %6085 = vmatpush.bf16.msrb.mxu0 %v8210_v41  ;;  %6124 = vmatpush.bf16.msrb.mxu3 %v8882_v55  ;;  %v10233_v41 = vld [vmem:[#allocation13 + $0xb50] sm:$0xf0]  ;;  %v8071_v55 = vld [vmem:[#allocation13 + $0x294] sm:$0xf0]  ;;  %v9105_v32 = vld [vmem:[#allocation13 + $0xa90] sm:$0xf] }
 0x353   :  { %6110 = vmatpush.bf16.msrb.mxu2 %v8686_v45  ;;  %v7903_v45 = vld [vmem:[#allocation13 + $0x144] sm:$0xf0]  ;;  %v5828_v50 = vadd.f32 %v10860_v25, %v5815_v27  ;;  %v9190_v57 = vor.u32 %v10233_v41, %v9189_v38  ;;  %v8074_v39 = vor.u32 %v9950_v54, %v8071_v55  ;;  %v9873_v25 = vld [vmem:[#allocation13 + $0x14] sm:$0xf]  ;;  %v10044_v27 = vld [vmem:[#allocation13 + $0x568] sm:$0xf0]  ;;  %v8018_v41 = vor.u32 %v9936_v9, %v8015_v26 }
 0x354   :  { %v7906_v34 = vor.u32 %v9908_v14, %v7903_v45  ;;  %6047 = vmatmul.bf16.vlgmr.msra.gmra.mxu1 %v10816_v58  ;;  %v8546_v14 = vor.u32 %v10072_v22, %v8545_v21  ;;  %v7766_v15 = vor.u32 %v9873_v25, %v7763_v2  ;;  %v9134_v22 = vor.u32 %v10219_v36, %v9133_v43  ;;  %v7987_v38 = vld [vmem:[#allocation13 + $0x1ec] sm:$0xf0]  ;;  %v8799_v54 = vld [vmem:[#allocation13 + $0x844] sm:$0xf0]  ;;  %v10202_v55 = vld [vmem:[#allocation13 + $0xa5c] sm:$0xf] }
 0x355   :  { %6091 = vmatpush.bf16.msrb.mxu1 %v8630_v28  ;;  %6086 = vmatmul.bf16.vlgmr.msrb.gmra.mxu0 %v10789_v6  ;;  %v10880_v28 = vpop.f32.mrf.mxu0  ;;  %v9497_v25 = vld [vmem:[#allocation13 + $0xda0] sm:$0xf]  ;;  %v10310_v2 = vld [vmem:[#allocation13 + $0xdb8] sm:$0xf0]  ;;  %v10020_v43 = vld [vmem:[#allocation13 + $0x4ac] sm:$0xf] }
 0x356   :  { %6130 = vmatpush.bf16.msra.mxu0 %v9302_v51  ;;  %6169 = vmatpush.bf16.msra.mxu3 %v8186_v17  ;;  %v9880_v51 = vld [vmem:[#allocation13 + $0x4c] sm:$0xf]  ;;  %v8518_v17 = vor.u32 %v10065_v49, %v8517_v4  ;;  %v9525_v49 = vld [vmem:[#allocation13 + $0xdd8] sm:$0xf]  ;;  %v8351_v36 = vld [vmem:[#allocation13 + $0x4c4] sm:$0xf0] }
 0x357   :  { %6111 = vmatpush.bf16.msrb.mxu2 %v8658_v62  ;;  %v9245_v62 = vld [vmem:[#allocation13 + $0xba8] sm:$0xf]  ;;  %6125 = vmatmul.bf16.vlgmr.msrb.gmra.mxu3 %v10803_v40  ;;  %v7794_v0 = vor.u32 %v9880_v51, %v7791_v53  ;;  %v10317_v51 = vld [vmem:[#allocation13 + $0xdf0] sm:$0xf0]  ;;  %v8743_v9 = vld [vmem:[#allocation13 + $0x7d4] sm:$0xf0] }
 0x358   :  { %v9246_v19 = vor.u32 %v10247_v35, %v9245_v62  ;;  %v9162_v62 = vor.u32 %v10226_v63, %v9161_v60  ;;  %v10146_v35 = vld [vmem:[#allocation13 + $0x89c] sm:$0xf]  ;;  %v9526_v60 = vor.u32 %v10317_v51, %v9525_v49  ;;  %v10027_v63 = vld [vmem:[#allocation13 + $0x4e4] sm:$0xf]  ;;  %v9023_v26 = vld [vmem:[#allocation13 + $0xa04] sm:$0xf0] }
 0x359   :  { %6092 = vmatpush.bf16.msrb.mxu1 %v8602_v3  ;;  %v8043_v3 = vld [vmem:[#allocation13 + $0x25c] sm:$0xf0]  ;;  %v5842_v21 = vpop.f32.mrf.mxu1  ;;  %v9413_v51 = vld [vmem:[#allocation13 + $0xcf8] sm:$0xf] }
 0x35a   :  { %6112 = vmatmul.bf16.vlgmr.msrb.gmra.mxu2 %v10793_v59  ;;  %6131 = vmatpush.bf16.msra.mxu0 %v9274_v18  ;;  %v9943_v18 = vld [vmem:[#allocation13 + $0x244] sm:$0xf]  ;;  %v8323_v21 = vld [vmem:[#allocation13 + $0x48c] sm:$0xf0] }
 0x35b   :  { %6156 = vmatpush.bf16.msra.mxu2 %v7962_v13  ;;  %v9894_v13 = vld [vmem:[#allocation13 + $0xbc] sm:$0xf]  ;;  %6170 = vmatpush.bf16.msra.mxu3 %v8158_v8  ;;  %v8490_v8 = vor.u32 %v10058_v61, %v8489_v1 }
 0x35c   :  { %v7850_v31 = vor.u32 %v9894_v13, %v7847_v16  ;;  %v8046_v16 = vor.u32 %v9943_v18, %v8043_v3  ;;  %v10125_v18 = vld [vmem:[#allocation13 + $0x7f4] sm:$0xf]  ;;  %v8771_v3 = vld [vmem:[#allocation13 + $0x80c] sm:$0xf0] }
 0x35d   :  { %6093 = vmatpush.bf16.msrb.mxu1 %v8574_v47  ;;  %v10877_v45 = vpop.f32.mrf.mxu2 }
 0x35e   :  { %6132 = vmatpush.bf16.msra.mxu0 %v9246_v19  ;;  %v10882_v19 = vpop.f32.mrf.mxu3 }
 0x35f   :  { %6157 = vmatpush.bf16.msra.mxu2 %v7934_v29  ;;  %v9957_v29 = vld [vmem:[#allocation13 + $0x2b4] sm:$0xf]  ;;  %6171 = vmatpush.bf16.msra.mxu3 %v8130_v7  ;;  %v5881_v7 = vpop.f32.mrf.mxu0 }
 0x360   :  { %v8102_v48 = vor.u32 %v9957_v29, %v8099_v33  ;;  %v8462_v33 = vor.u32 %v10051_v52, %v8461_v12  ;;  %v10303_v12 = vld [vmem:[#allocation13 + $0xd80] sm:$0xf0]  ;;  %v10118_v52 = vld [vmem:[#allocation13 + $0x7bc] sm:$0xf]  ;;  %v10013_v7 = vld [vmem:[#allocation13 + $0x474] sm:$0xf] }
 0x361   :  { %6094 = vmatpush.bf16.msrb.mxu1 %v8546_v14  ;;  %v9929_v14 = vld [vmem:[#allocation13 + $0x1d4] sm:$0xf] }
 0x362   :  { %6133 = vmatpush.bf16.msra.mxu0 %v9218_v30  ;;  %v10212_v30 = vld [vmem:[#allocation13 + $0xaa8] sm:$0xf0] }
 0x363   :  { %6158 = vmatpush.bf16.msra.mxu2 %v7906_v34  ;;  %v5841_v34 = vadd.f32 %v5840_v56, %v5828_v50  ;;  %6172 = vmatpush.bf16.msra.mxu3 %v8102_v48  ;;  %v8407_v48 = vld [vmem:[#allocation13 + $0x534] sm:$0xf0]  ;;  %v10132_v50 = vld [vmem:[#allocation13 + $0x82c] sm:$0xf]  ;;  %v9106_v53 = vor.u32 %v10212_v30, %v9105_v32  ;;  %v10181_v30 = vld [vmem:[#allocation13 + $0x9b4] sm:$0xf] }
 0x364   :  { %v9079_v56 = vld [vmem:[#allocation13 + $0xa74] sm:$0xf0]  ;;  %v8802_v1 = vor.u32 %v10132_v50, %v8799_v54  ;;  %v10296_v32 = vld [vmem:[#allocation13 + $0xd48] sm:$0xf0]  ;;  %v10289_v50 = vld [vmem:[#allocation13 + $0xd10] sm:$0xf0] }
 0x365   :  { %10338 = vtanh.f32 %v5841_v34  ;;  %6095 = vmatpush.bf16.msrb.mxu1 %v8518_v17  ;;  %v5907_v13 = vpop.f32.mrf.mxu2  ;;  %v7990_v17 = vor.u32 %v9929_v14, %v7987_v38  ;;  %v9082_v61 = vor.u32 %v10202_v55, %v9079_v56  ;;  %v8995_v14 = vld [vmem:[#allocation13 + $0x9cc] sm:$0xf0]  ;;  %v8326_v38 = vor.u32 %v10013_v7, %v8323_v21  ;;  %v8687_v55 = vld [vmem:[#allocation13 + $0x764] sm:$0xf0]  ;;  %v10174_v56 = vld [vmem:[#allocation13 + $0x97c] sm:$0xf] }
 0x366   :  { %6134 = vmatpush.bf16.msra.mxu0 %v9190_v57  ;;  %v8434_v57 = vor.u32 %v10044_v27, %v8433_v24  ;;  %v8774_v13 = vor.u32 %v10125_v18, %v8771_v3  ;;  %v9441_v27 = vld [vmem:[#allocation13 + $0xd30] sm:$0xf]  ;;  %v8998_v49 = vor.u32 %v10181_v30, %v8995_v14  ;;  %v10282_v18 = vld [vmem:[#allocation13 + $0xcd8] sm:$0xf0]  ;;  %v10097_v3 = vld [vmem:[#allocation13 + $0x714] sm:$0xf] }
 0x367   :  { %6159 = vmatpush.bf16.msra.mxu2 %v7878_v5  ;;  %v8855_v5 = vld [vmem:[#allocation13 + $0x8b4] sm:$0xf0]  ;;  %6173 = vmatpush.bf16.msra.mxu3 %v8074_v39  ;;  %v5920_v39 = vpop.f32.mrf.mxu3  ;;  %v10160_v7 = vld [vmem:[#allocation13 + $0x90c] sm:$0xf]  ;;  %v8911_v21 = vld [vmem:[#allocation13 + $0x924] sm:$0xf0] }
 0x368   :  { %v8858_v47 = vor.u32 %v10146_v35, %v8855_v5  ;;  %v9051_v35 = vld [vmem:[#allocation13 + $0xa3c] sm:$0xf0]  ;;  %v9999_v39 = vld [vmem:[#allocation13 + $0x404] sm:$0xf]  ;;  %v9329_v30 = vld [vmem:[#allocation13 + $0xc50] sm:$0xf] }
 0x369   :  { %6096 = vmatpush.bf16.msrb.mxu1 %v8490_v8  ;;  %v9498_v8 = vor.u32 %v10310_v2, %v9497_v25  ;;  %v9385_v2 = vld [vmem:[#allocation13 + $0xcc0] sm:$0xf]  ;;  %v10268_v14 = vld [vmem:[#allocation13 + $0xc68] sm:$0xf0] }
 0x36a   :  { %6135 = vmatpush.bf16.msra.mxu0 %v9162_v62  ;;  %v10195_v62 = vld [vmem:[#allocation13 + $0xa24] sm:$0xf] }
 0x36b   :  { %6160 = vmatpush.bf16.msra.mxu2 %v7850_v31  ;;  %v8827_v31 = vld [vmem:[#allocation13 + $0x87c] sm:$0xf0]  ;;  %v10339_v29 = vpop.eup %10338  ;;  %6174 = vmatpush.bf16.msra.mxu3 %v8046_v16  ;;  %v9469_v16 = vld [vmem:[#allocation13 + $0xd68] sm:$0xf] }
 0x36c   :  { %6372 = vst [vmem:[#allocation16 + $0x8] sm:$0xff] %v10339_v29  ;;  %v8830_v4 = vor.u32 %v10139_v20, %v8827_v31  ;;  %v8354_v20 = vor.u32 %v10020_v43, %v8351_v36  ;;  %v9470_v31 = vor.u32 %v10303_v12, %v9469_v16  ;;  %v10111_v29 = vld [vmem:[#allocation13 + $0x784] sm:$0xf]  ;;  %v7965_v43 = vld [vmem:[#allocation13 + $0x1a0] sm:$0xf] }
 0x36d   :  { %6097 = vmatpush.bf16.msrb.mxu1 %v8462_v33  ;;  %v8715_v33 = vld [vmem:[#allocation13 + $0x79c] sm:$0xf0]  ;;  %v9926_v36 = vld [vmem:[#allocation13 + $0x1b8] sm:$0xf0] }
 0x36e   :  { %6136 = vmatpush.bf16.msra.mxu0 %v9134_v22  ;;  %v8746_v22 = vor.u32 %v10118_v52, %v8743_v9  ;;  %v9357_v9 = vld [vmem:[#allocation13 + $0xc88] sm:$0xf] }
 0x36f   :  { %6161 = vmatpush.bf16.msra.mxu2 %v7822_v46  ;;  %v10034_v46 = vld [vmem:[#allocation13 + $0x51c] sm:$0xf]  ;;  %6175 = vmatpush.bf16.msra.mxu3 %v8018_v41  ;;  %v9442_v41 = vor.u32 %v10296_v32, %v9441_v27 }
 0x370   :  { %v8410_v34 = vor.u32 %v10034_v46, %v8407_v48  ;;  %v10006_v46 = vld [vmem:[#allocation13 + $0x43c] sm:$0xf]  ;;  %v8295_v48 = vld [vmem:[#allocation13 + $0x454] sm:$0xf0] }
 0x371   :  { %6098 = vmatpush.bf16.msrb.mxu1 %v8434_v57  ;;  %v8967_v57 = vld [vmem:[#allocation13 + $0x994] sm:$0xf0] }
 0x372   :  { %6137 = vmatpush.bf16.msra.mxu0 %v9106_v53  ;;  %v10104_v53 = vld [vmem:[#allocation13 + $0x74c] sm:$0xf]  ;;  %v8970_v25 = vor.u32 %v10174_v56, %v8967_v57  ;;  %v7909_v56 = vld [vmem:[#allocation13 + $0x130] sm:$0xf] }
 0x373   :  { %6162 = vmatpush.bf16.msra.mxu2 %v7794_v0  ;;  %v8379_v0 = vld [vmem:[#allocation13 + $0x4fc] sm:$0xf0]  ;;  %6176 = vmatpush.bf16.msra.mxu3 %v7990_v17  ;;  %v10890_v17 = vpop.f32.mrf.mxu0 }
 0x374   :  { %v8382_v5 = vor.u32 %v10027_v63, %v8379_v0  ;;  %6099 = vmatmul.bf16.vlgmr.msrb.gmra.mxu1 %v10785_v42  ;;  %v3321_v63 = vperm.slane %v10862_v23, 3  ;;  %v9414_v0 = vor.u32 %v10289_v50, %v9413_v51  ;;  %v9386_v23 = vor.u32 %v10282_v18, %v9385_v2  ;;  %v10258_v51 = vld [vmem:[#allocation13 + $0xc1c] sm:$0xf]  ;;  %v9303_v50 = vld [vmem:[#allocation13 + $0xc34] sm:$0xf0] }
 0x375   :  { %6143 = vmatpush.bf16.msra.mxu1 %v9526_v60  ;;  %6138 = vmatmul.bf16.vlgmr.msra.gmra.mxu0 %v10809_v10  ;;  %v8298_v60 = vor.u32 %v10006_v46, %v8295_v48  ;;  %v8211_v46 = vld [vmem:[#allocation13 + $0x3ac] sm:$0xf0]  ;;  %v10153_v48 = vld [vmem:[#allocation13 + $0x8d4] sm:$0xf]  ;;  %v10251_v18 = vld [vmem:[#allocation13 + $0xbe4] sm:$0xf] }
 0x376   :  { %6182 = vmatpush.bf16.msrb.mxu0 %v8410_v34  ;;  %6177 = vmatmul.bf16.vlgmr.msra.gmra.mxu3 %v10768_v37  ;;  %v10888_v34 = vpop.f32.mrf.mxu1 }
 0x377   :  { %6163 = vmatpush.bf16.msra.mxu2 %v7766_v15  ;;  %6221 = vmatpush.bf16.msrb.mxu3 %v9082_v61  ;;  %v9054_v15 = vor.u32 %v10195_v62, %v9051_v35  ;;  %v8690_v61 = vor.u32 %v10104_v53, %v8687_v55  ;;  %v8659_v62 = vld [vmem:[#allocation13 + $0x72c] sm:$0xf0]  ;;  %v10167_v35 = vld [vmem:[#allocation13 + $0x944] sm:$0xf]  ;;  %v8631_v55 = vld [vmem:[#allocation13 + $0x6f4] sm:$0xf0] }
 0x378   :  { %v8662_v12 = vor.u32 %v10097_v3, %v8659_v62  ;;  %v9275_v3 = vld [vmem:[#allocation13 + $0xbfc] sm:$0xf0] }
 0x379   :  { %6144 = vmatpush.bf16.msra.mxu1 %v9498_v8 }
 0x37a   :  { %6164 = vmatmul.bf16.vlgmr.msra.gmra.mxu2 %v10777_v44  ;;  %6183 = vmatpush.bf16.msrb.mxu0 %v8382_v5  ;;  %v8939_v5 = vld [vmem:[#allocation13 + $0x95c] sm:$0xf0] }
 0x37b   :  { %6208 = vmatpush.bf16.msrb.mxu2 %v8858_v47  ;;  %v10188_v47 = vld [vmem:[#allocation13 + $0x9ec] sm:$0xf]  ;;  %6222 = vmatpush.bf16.msrb.mxu3 %v9054_v15  ;;  %v8239_v15 = vld [vmem:[#allocation13 + $0x3e4] sm:$0xf0]  ;;  %v8942_v52 = vor.u32 %v10167_v35, %v8939_v5  ;;  %v5933_v32 = vpop.f32.mrf.mxu0 }
 0x37c   :  { %v9026_v24 = vor.u32 %v10188_v47, %v9023_v26  ;;  %v10275_v47 = vld [vmem:[#allocation13 + $0xca0] sm:$0xf0] }
 0x37d   :  { %6145 = vmatpush.bf16.msra.mxu1 %v9470_v31  ;;  %v5957_v54 = vpop.f32.mrf.mxu2  ;;  %v7966_v31 = vor.u32 %v9926_v36, %v7965_v43  ;;  %v8603_v43 = vld [vmem:[#allocation13 + $0x6bc] sm:$0xf0]  ;;  %v7881_v36 = vld [vmem:[#allocation13 + $0xf8] sm:$0xf] }
 0x37e   :  { %6184 = vmatpush.bf16.msrb.mxu0 %v8354_v20  ;;  %v5958_v16 = vadd.f32 %v5957_v54, %v3321_v63  ;;  %v5970_v20 = vpop.f32.mrf.mxu3  ;;  %v5894_v27 = vpop.f32.mrf.mxu1  ;;  %v10090_v54 = vld [vmem:[#allocation13 + $0x6dc] sm:$0xf]  ;;  %v8189_v63 = vld [vmem:[#allocation13 + $0x360] sm:$0xf] }
 0x37f   :  { %6209 = vmatpush.bf16.msrb.mxu2 %v8830_v4  ;;  %6223 = vmatpush.bf16.msrb.mxu3 %v9026_v24  ;;  %v8718_v4 = vor.u32 %v10111_v29, %v8715_v33  ;;  %v9919_v33 = vld [vmem:[#allocation13 + $0x180] sm:$0xf0]  ;;  %v8634_v2 = vor.u32 %v10090_v54, %v8631_v55  ;;  %v9191_v54 = vld [vmem:[#allocation13 + $0xb54] sm:$0xf0] }
 0x380   :  { %v10893_v24 = vadd.f32 %v5970_v20, %v5958_v16  ;;  %v9975_v16 = vld [vmem:[#allocation13 + $0x340] sm:$0xf0]  ;;  %v8575_v20 = vld [vmem:[#allocation13 + $0x684] sm:$0xf0] }
 0x381   :  { %6146 = vmatpush.bf16.msra.mxu1 %v9442_v41  ;;  %v9985_v41 = vld [vmem:[#allocation13 + $0x394] sm:$0xf] }
 0x382   :  { %6185 = vmatpush.bf16.msrb.mxu0 %v8326_v38  ;;  %v9358_v38 = vor.u32 %v10275_v47, %v9357_v9  ;;  %v8214_v57 = vor.u32 %v9985_v41, %v8211_v46  ;;  %v7825_v41 = vld [vmem:[#allocation13 + $0x88] sm:$0xf] }
 0x383   :  { %6210 = vmatpush.bf16.msrb.mxu2 %v8802_v1  ;;  %v8267_v1 = vld [vmem:[#allocation13 + $0x41c] sm:$0xf0]  ;;  %6224 = vmatpush.bf16.msrb.mxu3 %v8998_v49  ;;  %v8883_v49 = vld [vmem:[#allocation13 + $0x8ec] sm:$0xf0] }
 0x384   :  { %v8270_v8 = vor.u32 %v9999_v39, %v8267_v1  ;;  %v9330_v39 = vor.u32 %v10268_v14, %v9329_v30  ;;  %v9306_v1 = vor.u32 %v10258_v51, %v9303_v50 }
 0x385   :  { %6147 = vmatpush.bf16.msra.mxu1 %v9414_v0  ;;  %v5959_v26 = vpop.f32.mrf.mxu2  ;;  %v9982_v0 = vld [vmem:[#allocation13 + $0x378] sm:$0xf0] }
 0x386   :  { %6186 = vmatpush.bf16.msrb.mxu0 %v8298_v60  ;;  %v9912_v60 = vld [vmem:[#allocation13 + $0x148] sm:$0xf0]  ;;  %v5972_v62 = vpop.f32.mrf.mxu3  ;;  %v8190_v5 = vor.u32 %v9982_v0, %v8189_v63  ;;  %v7797_v63 = vld [vmem:[#allocation13 + $0x50] sm:$0xf] }
 0x387   :  { %6211 = vmatpush.bf16.msrb.mxu2 %v8774_v13  ;;  %v9992_v13 = vld [vmem:[#allocation13 + $0x3cc] sm:$0xf]  ;;  %6225 = vmatpush.bf16.msrb.mxu3 %v8970_v25  ;;  %v8886_v25 = vor.u32 %v10153_v48, %v8883_v49  ;;  %v7910_v35 = vor.u32 %v9912_v60, %v7909_v56  ;;  %v9891_v48 = vld [vmem:[#allocation13 + $0xa0] sm:$0xf0]  ;;  %v9961_v49 = vld [vmem:[#allocation13 + $0x2d0] sm:$0xf0] }
 0x388   :  { %v8242_v29 = vor.u32 %v9992_v13, %v8239_v15  ;;  %v9905_v13 = vld [vmem:[#allocation13 + $0x110] sm:$0xf0]  ;;  %v8161_v15 = vld [vmem:[#allocation13 + $0x328] sm:$0xf]  ;;  %v10076_v26 = vld [vmem:[#allocation13 + $0x66c] sm:$0xf]  ;;  %v7826_v55 = vor.u32 %v9891_v48, %v7825_v41 }
 0x389   :  { %6148 = vmatpush.bf16.msra.mxu1 %v9386_v23  ;;  %v7882_v9 = vor.u32 %v9905_v13, %v7881_v36  ;;  %v8162_v47 = vor.u32 %v9975_v16, %v8161_v15  ;;  %v8578_v32 = vor.u32 %v10076_v26, %v8575_v20  ;;  %v8519_v60 = vld [vmem:[#allocation13 + $0x614] sm:$0xf0]  ;;  %v8491_v36 = vld [vmem:[#allocation13 + $0x5dc] sm:$0xf0]  ;;  %v9877_v13 = vld [vmem:[#allocation13 + $0x30] sm:$0xf0] }
 0x38a   :  { %6187 = vmatpush.bf16.msrb.mxu0 %v8270_v8  ;;  %v10083_v8 = vld [vmem:[#allocation13 + $0x6a4] sm:$0xf]  ;;  %v8049_v15 = vld [vmem:[#allocation13 + $0x248] sm:$0xf]  ;;  %v8435_v41 = vld [vmem:[#allocation13 + $0x56c] sm:$0xf0] }
 0x38b   :  { %6212 = vmatpush.bf16.msrb.mxu2 %v8746_v22  ;;  %v7937_v22 = vld [vmem:[#allocation13 + $0x168] sm:$0xf]  ;;  %6226 = vmatpush.bf16.msrb.mxu3 %v8942_v52  ;;  %v9947_v16 = vld [vmem:[#allocation13 + $0x260] sm:$0xf0] }
 0x38c   :  { %v7938_v53 = vor.u32 %v9919_v33, %v7937_v22  ;;  %v9247_v52 = vld [vmem:[#allocation13 + $0xbc4] sm:$0xf0]  ;;  %v9968_v22 = vld [vmem:[#allocation13 + $0x308] sm:$0xf0]  ;;  %v9219_v33 = vld [vmem:[#allocation13 + $0xb8c] sm:$0xf0]  ;;  %v8050_v20 = vor.u32 %v9947_v16, %v8049_v15 }
 0x38d   :  { %6149 = vmatpush.bf16.msra.mxu1 %v9358_v38  ;;  %v8547_v38 = vld [vmem:[#allocation13 + $0x64c] sm:$0xf0]  ;;  %v10129_v15 = vld [vmem:[#allocation13 + $0x810] sm:$0xf0]  ;;  %v9057_v16 = vld [vmem:[#allocation13 + $0xa28] sm:$0xf] }
 0x38e   :  { %6188 = vmatpush.bf16.msrb.mxu0 %v8242_v29  ;;  %v10237_v29 = vld [vmem:[#allocation13 + $0xb74] sm:$0xf] }
 0x38f   :  { %6213 = vmatpush.bf16.msrb.mxu2 %v8718_v4  ;;  %v8914_v4 = vor.u32 %v10160_v7, %v8911_v21  ;;  %v9898_v7 = vld [vmem:[#allocation13 + $0xd8] sm:$0xf0]  ;;  %v8133_v21 = vld [vmem:[#allocation13 + $0x2f0] sm:$0xf]  ;;  %v9222_v51 = vor.u32 %v10237_v29, %v9219_v33  ;;  %v8833_v29 = vld [vmem:[#allocation13 + $0x868] sm:$0xf] }
 0x390   :  { %v8134_v14 = vor.u32 %v9968_v22, %v8133_v21  ;;  %v10143_v33 = vld [vmem:[#allocation13 + $0x880] sm:$0xf0] }
 0x391   :  { %6227 = vmatpush.bf16.msrb.mxu3 %v8914_v4  ;;  %6150 = vmatpush.bf16.msra.mxu1 %v9330_v39  ;;  %v8105_v4 = vld [vmem:[#allocation13 + $0x2b8] sm:$0xf] }
 0x392   :  { %6189 = vmatpush.bf16.msrb.mxu0 %v8214_v57  ;;  %v8106_v56 = vor.u32 %v9961_v49, %v8105_v4  ;;  %v10062_v57 = vld [vmem:[#allocation13 + $0x5fc] sm:$0xf]  ;;  %v9107_v49 = vld [vmem:[#allocation13 + $0xaac] sm:$0xf0] }
 0x393   :  { %6214 = vmatpush.bf16.msrb.mxu2 %v8690_v61  ;;  %v5880_v61 = vadd.f32 %v10880_v28, %v10866_v11  ;;  %v9278_v11 = vor.u32 %v10251_v18, %v9275_v3  ;;  %v8606_v28 = vor.u32 %v10083_v8, %v8603_v43  ;;  %v8522_v62 = vor.u32 %v10062_v57, %v8519_v60  ;;  %v10314_v57 = vld [vmem:[#allocation13 + $0xddc] sm:$0xf]  ;;  %v9527_v60 = vld [vmem:[#allocation13 + $0xdf4] sm:$0xf0] }
 0x394   :  { %6151 = vmatmul.bf16.vlgmr.msra.gmra.mxu1 %v10816_v58 }
 0x395   :  { %v5893_v23 = vadd.f32 %v10888_v34, %v5880_v61  ;;  %6228 = vmatpush.bf16.msrb.mxu3 %v8886_v25  ;;  %6195 = vmatpush.bf16.msrb.mxu1 %v8634_v2  ;;  %v9954_v61 = vld [vmem:[#allocation13 + $0x298] sm:$0xf0]  ;;  %v5944_v25 = vpop.f32.mrf.mxu1  ;;  %v10907_v2 = vpop.f32.mrf.mxu0 }
 0x396   :  { %6234 = vmatpush.bf16.msra.mxu0 %v9306_v1  ;;  %v8077_v1 = vld [vmem:[#allocation13 + $0x280] sm:$0xf] }
 0x397   :  { %6215 = vmatpush.bf16.msrb.mxu2 %v8662_v12  ;;  %v10244_v12 = vld [vmem:[#allocation13 + $0xbac] sm:$0xf]  ;;  %v5906_v34 = vadd.f32 %v10877_v45, %v5893_v23  ;;  %6190 = vmatmul.bf16.vlgmr.msrb.gmra.mxu0 %v10789_v6  ;;  %v10069_v45 = vld [vmem:[#allocation13 + $0x634] sm:$0xf]  ;;  %v8078_v43 = vor.u32 %v9954_v61, %v8077_v1  ;;  %v7769_v23 = vld [vmem:[#allocation13 + $0x18] sm:$0xf] }
 0x398   :  { %6229 = vmatmul.bf16.vlgmr.msrb.gmra.mxu3 %v10803_v40  ;;  %v9250_v27 = vor.u32 %v10244_v12, %v9247_v52  ;;  %v8550_v50 = vor.u32 %v10069_v45, %v8547_v38  ;;  %v10150_v12 = vld [vmem:[#allocation13 + $0x8b8] sm:$0xf0]  ;;  %v7770_v26 = vor.u32 %v9877_v13, %v7769_v23  ;;  %v10041_v38 = vld [vmem:[#allocation13 + $0x554] sm:$0xf]  ;;  %v9085_v1 = vld [vmem:[#allocation13 + $0xa60] sm:$0xf] }
 0x399   :  { %6273 = vmatpush.bf16.msra.mxu3 %v8190_v5  ;;  %6196 = vmatpush.bf16.msrb.mxu1 %v8606_v28  ;;  %v5919_v46 = vadd.f32 %v10882_v19, %v5906_v34  ;;  %v9884_v19 = vld [vmem:[#allocation13 + $0x68] sm:$0xf0]  ;;  %v9163_v5 = vld [vmem:[#allocation13 + $0xb1c] sm:$0xf0]  ;;  %v8463_v34 = vld [vmem:[#allocation13 + $0x5a4] sm:$0xf0] }
 0x39a   :  { %6216 = vmatmul.bf16.vlgmr.msrb.gmra.mxu2 %v10793_v59  ;;  %6235 = vmatpush.bf16.msra.mxu0 %v9278_v11  ;;  %v7798_v8 = vor.u32 %v9884_v19, %v7797_v63  ;;  %v8861_v28 = vld [vmem:[#allocation13 + $0x8a0] sm:$0xf]  ;;  %v10909_v22 = vpop.f32.mrf.mxu3  ;;  %v8805_v63 = vld [vmem:[#allocation13 + $0x830] sm:$0xf]  ;;  %v10136_v19 = vld [vmem:[#allocation13 + $0x848] sm:$0xf0] }
 0x39b   :  { %6260 = vmatpush.bf16.msra.mxu2 %v7966_v31  ;;  %v7853_v31 = vld [vmem:[#allocation13 + $0xc0] sm:$0xf]  ;;  %v5932_v0 = vadd.f32 %v10890_v17, %v5919_v46  ;;  %v10055_v17 = vld [vmem:[#allocation13 + $0x5c4] sm:$0xf]  ;;  %v10209_v46 = vld [vmem:[#allocation13 + $0xa94] sm:$0xf] }
 0x39c   :  { %v7854_v30 = vor.u32 %v9898_v7, %v7853_v31  ;;  %v8494_v52 = vor.u32 %v10055_v17, %v8491_v36  ;;  %v10048_v31 = vld [vmem:[#allocation13 + $0x58c] sm:$0xf]  ;;  %v8021_v7 = vld [vmem:[#allocation13 + $0x210] sm:$0xf]  ;;  %v10206_v61 = vld [vmem:[#allocation13 + $0xa78] sm:$0xf0] }
 0x39d   :  { %6274 = vmatpush.bf16.msra.mxu3 %v8162_v47  ;;  %6197 = vmatpush.bf16.msrb.mxu1 %v8578_v32  ;;  %v10905_v39 = vpop.f32.mrf.mxu2  ;;  %v5945_v3 = vadd.f32 %v5944_v25, %v5932_v0  ;;  %v9135_v47 = vld [vmem:[#allocation13 + $0xae4] sm:$0xf0]  ;;  %v9940_v32 = vld [vmem:[#allocation13 + $0x228] sm:$0xf0]  ;;  %v8466_v4 = vor.u32 %v10048_v31, %v8463_v34  ;;  %v9110_v0 = vor.u32 %v10209_v46, %v9107_v49  ;;  %v10307_v36 = vld [vmem:[#allocation13 + $0xda4] sm:$0xf] }
 0x39e   :  { %6236 = vmatpush.bf16.msra.mxu0 %v9250_v27  ;;  %v8862_v27 = vor.u32 %v10150_v12, %v8861_v28  ;;  %v8438_v25 = vor.u32 %v10041_v38, %v8435_v41  ;;  %v9086_v17 = vor.u32 %v10206_v61, %v9085_v1  ;;  %v9499_v23 = vld [vmem:[#allocation13 + $0xdbc] sm:$0xf0]  ;;  %v8777_v13 = vld [vmem:[#allocation13 + $0x7f8] sm:$0xf]  ;;  %v8357_v12 = vld [vmem:[#allocation13 + $0x4b0] sm:$0xf] }
 0x39f   :  { %6261 = vmatpush.bf16.msra.mxu2 %v7938_v53  ;;  %v10230_v53 = vld [vmem:[#allocation13 + $0xb3c] sm:$0xf]  ;;  %10340 = vtanh.f32 %v5945_v3  ;;  %v9502_v28 = vor.u32 %v10307_v36, %v9499_v23  ;;  %v8749_v31 = vld [vmem:[#allocation13 + $0x7c0] sm:$0xf]  ;;  %v9443_v38 = vld [vmem:[#allocation13 + $0xd4c] sm:$0xf0] }
 0x3a0   :  { %v9194_v18 = vor.u32 %v10230_v53, %v9191_v54  ;;  %v8022_v53 = vor.u32 %v9940_v32, %v8021_v7  ;;  %v8413_v54 = vld [vmem:[#allocation13 + $0x520] sm:$0xf]  ;;  %v10122_v34 = vld [vmem:[#allocation13 + $0x7d8] sm:$0xf0]  ;;  %v9029_v7 = vld [vmem:[#allocation13 + $0x9f0] sm:$0xf] }
 0x3a1   :  { %6275 = vmatpush.bf16.msra.mxu3 %v8134_v14  ;;  %6198 = vmatpush.bf16.msrb.mxu1 %v8550_v50  ;;  %v5985_v14 = vpop.f32.mrf.mxu0  ;;  %v9933_v50 = vld [vmem:[#allocation13 + $0x1f0] sm:$0xf0]  ;;  %v8721_v41 = vld [vmem:[#allocation13 + $0x788] sm:$0xf]  ;;  %v10115_v46 = vld [vmem:[#allocation13 + $0x7a0] sm:$0xf0] }
 0x3a2   :  { %6237 = vmatpush.bf16.msra.mxu0 %v9222_v51  ;;  %v7993_v51 = vld [vmem:[#allocation13 + $0x1d8] sm:$0xf]  ;;  %v9387_v36 = vld [vmem:[#allocation13 + $0xcdc] sm:$0xf0] }
 0x3a3   :  { %6262 = vmatpush.bf16.msra.mxu2 %v7910_v35  ;;  %v10223_v35 = vld [vmem:[#allocation13 + $0xb04] sm:$0xf]  ;;  %v7994_v3 = vor.u32 %v9933_v50, %v7993_v51  ;;  %v8301_v51 = vld [vmem:[#allocation13 + $0x440] sm:$0xf]  ;;  %v10010_v50 = vld [vmem:[#allocation13 + $0x458] sm:$0xf0] }
 0x3a4   :  { %v9166_v11 = vor.u32 %v10223_v35, %v9163_v5  ;;  %v8385_v35 = vld [vmem:[#allocation13 + $0x4e8] sm:$0xf]  ;;  %v10031_v5 = vld [vmem:[#allocation13 + $0x500] sm:$0xf0]  ;;  %v8665_v23 = vld [vmem:[#allocation13 + $0x718] sm:$0xf] }
 0x3a5   :  { %6276 = vmatpush.bf16.msra.mxu3 %v8106_v56  ;;  %6199 = vmatpush.bf16.msrb.mxu1 %v8522_v62  ;;  %v6011_v21 = vpop.f32.mrf.mxu2  ;;  %v10341_v48 = vpop.eup %10340  ;;  %v8834_v56 = vor.u32 %v10143_v33, %v8833_v29  ;;  %v9530_v62 = vor.u32 %v10314_v57, %v9527_v60  ;;  %v8329_v29 = vld [vmem:[#allocation13 + $0x478] sm:$0xf]  ;;  %v10017_v33 = vld [vmem:[#allocation13 + $0x490] sm:$0xf0]  ;;  %v8693_v57 = vld [vmem:[#allocation13 + $0x750] sm:$0xf] }
 0x3a6   :  { %6238 = vmatpush.bf16.msra.mxu0 %v9194_v18  ;;  %6373 = vst [vmem:[#allocation16 + $0x10] sm:$0xff] %v10341_v48  ;;  %v10192_v21 = vld [vmem:[#allocation13 + $0xa08] sm:$0xf0]  ;;  %v9001_v48 = vld [vmem:[#allocation13 + $0x9b8] sm:$0xf]  ;;  %v8330_v49 = vor.u32 %v10017_v33, %v8329_v29 }
 0x3a7   :  { %6263 = vmatpush.bf16.msra.mxu2 %v7882_v9  ;;  %v10216_v9 = vld [vmem:[#allocation13 + $0xacc] sm:$0xf]  ;;  %v9030_v14 = vor.u32 %v10192_v21, %v9029_v7  ;;  %v8917_v7 = vld [vmem:[#allocation13 + $0x910] sm:$0xf] }
 0x3a8   :  { %v9138_v45 = vor.u32 %v10216_v9, %v9135_v47  ;;  %v8778_v9 = vor.u32 %v10129_v15, %v8777_v13  ;;  %v10101_v13 = vld [vmem:[#allocation13 + $0x730] sm:$0xf0]  ;;  %v8945_v15 = vld [vmem:[#allocation13 + $0x948] sm:$0xf]  ;;  %v10164_v21 = vld [vmem:[#allocation13 + $0x928] sm:$0xf0] }
 0x3a9   :  { %6277 = vmatpush.bf16.msra.mxu3 %v8078_v43  ;;  %6200 = vmatpush.bf16.msrb.mxu1 %v8494_v52  ;;  %v8806_v43 = vor.u32 %v10136_v19, %v8805_v63  ;;  %v10024_v52 = vld [vmem:[#allocation13 + $0x4c8] sm:$0xf0]  ;;  %v10178_v19 = vld [vmem:[#allocation13 + $0x998] sm:$0xf0] }
 0x3aa   :  { %6239 = vmatpush.bf16.msra.mxu0 %v9166_v11  ;;  %v10199_v11 = vld [vmem:[#allocation13 + $0xa40] sm:$0xf0]  ;;  %v10108_v63 = vld [vmem:[#allocation13 + $0x768] sm:$0xf0] }
 0x3ab   :  { %6264 = vmatpush.bf16.msra.mxu2 %v7854_v30  ;;  %v5946_v30 = vpop.f32.mrf.mxu1  ;;  %v9058_v47 = vor.u32 %v10199_v11, %v9057_v16  ;;  %v10171_v16 = vld [vmem:[#allocation13 + $0x960] sm:$0xf0] }
 0x3ac   :  { %v8750_v30 = vor.u32 %v10122_v34, %v8749_v31 }
 0x3ad   :  { %6278 = vmatpush.bf16.msra.mxu3 %v8050_v20  ;;  %6201 = vmatpush.bf16.msrb.mxu1 %v8466_v4  ;;  %v9471_v20 = vld [vmem:[#allocation13 + $0xd84] sm:$0xf0]  ;;  %v10185_v4 = vld [vmem:[#allocation13 + $0x9d0] sm:$0xf0] }
 0x3ae   :  { %6240 = vmatpush.bf16.msra.mxu0 %v9138_v45  ;;  %v10293_v45 = vld [vmem:[#allocation13 + $0xd34] sm:$0xf] }
 0x3af   :  { %6265 = vmatpush.bf16.msra.mxu2 %v7826_v55  ;;  %v10038_v55 = vld [vmem:[#allocation13 + $0x538] sm:$0xf0] }
 0x3b0   :  { %v8414_v18 = vor.u32 %v10038_v55, %v8413_v54  ;;  %v9002_v54 = vor.u32 %v10185_v4, %v9001_v48  ;;  %v10286_v55 = vld [vmem:[#allocation13 + $0xcfc] sm:$0xf]  ;;  %v8889_v48 = vld [vmem:[#allocation13 + $0x8d8] sm:$0xf]  ;;  %v9309_v4 = vld [vmem:[#allocation13 + $0xc20] sm:$0xf] }
 0x3b1   :  { %6279 = vmatpush.bf16.msra.mxu3 %v8022_v53  ;;  %6202 = vmatpush.bf16.msrb.mxu1 %v8438_v25  ;;  %v8722_v53 = vor.u32 %v10115_v46, %v8721_v41  ;;  %v10917_v61 = vpop.f32.mrf.mxu0  ;;  %v8302_v25 = vor.u32 %v10010_v50, %v8301_v51  ;;  %v9989_v41 = vld [vmem:[#allocation13 + $0x3b0] sm:$0xf0]  ;;  %v8918_v46 = vor.u32 %v10164_v21, %v8917_v7  ;;  %v8637_v51 = vld [vmem:[#allocation13 + $0x6e0] sm:$0xf]  ;;  %v10094_v50 = vld [vmem:[#allocation13 + $0x6f8] sm:$0xf0] }
 0x3b2   :  { %6241 = vmatpush.bf16.msra.mxu0 %v9110_v0  ;;  %v8973_v0 = vld [vmem:[#allocation13 + $0x980] sm:$0xf]  ;;  %v8497_v7 = vld [vmem:[#allocation13 + $0x5c8] sm:$0xf]  ;;  %v10059_v21 = vld [vmem:[#allocation13 + $0x5e0] sm:$0xf0] }
 0x3b3   :  { %6266 = vmatpush.bf16.msra.mxu2 %v7798_v8  ;;  %v6024_v8 = vpop.f32.mrf.mxu3  ;;  %v10915_v1 = vpop.f32.mrf.mxu1 }
 0x3b4   :  { %6203 = vmatmul.bf16.vlgmr.msrb.gmra.mxu1 %v10785_v42  ;;  %v8694_v8 = vor.u32 %v10108_v63, %v8693_v57  ;;  %v9281_v63 = vld [vmem:[#allocation13 + $0xbe8] sm:$0xf] }
 0x3b5   :  { %6280 = vmatpush.bf16.msra.mxu3 %v7994_v3  ;;  %6247 = vmatpush.bf16.msra.mxu1 %v9530_v62 }
 0x3b6   :  { %6286 = vmatpush.bf16.msrb.mxu0 %v8414_v18  ;;  %v10919_v18 = vld [vmem:[#allocation14] sm:$0xff] }
 0x3b7   :  { %6267 = vmatpush.bf16.msra.mxu2 %v7770_v26  ;;  %v10300_v26 = vld [vmem:[#allocation13 + $0xd6c] sm:$0xf]  ;;  %6242 = vmatmul.bf16.vlgmr.msra.gmra.mxu0 %v10809_v10  ;;  %v3322_v3 = vperm.slane %v10919_v18, 4 }
 0x3b8   :  { %6281 = vmatmul.bf16.vlgmr.msra.gmra.mxu3 %v10768_v37  ;;  %v9474_v32 = vor.u32 %v10300_v26, %v9471_v20  ;;  %v9446_v37 = vor.u32 %v10293_v45, %v9443_v38  ;;  %v10272_v26 = vld [vmem:[#allocation13 + $0xc8c] sm:$0xf]  ;;  %v9359_v20 = vld [vmem:[#allocation13 + $0xca4] sm:$0xf0]  ;;  %v9331_v45 = vld [vmem:[#allocation13 + $0xc6c] sm:$0xf0] }
 0x3b9   :  { %6325 = vmatpush.bf16.msrb.mxu3 %v9086_v17  ;;  %6248 = vmatpush.bf16.msra.mxu1 %v9502_v28  ;;  %v10279_v17 = vld [vmem:[#allocation13 + $0xcc4] sm:$0xf]  ;;  %v8245_v28 = vld [vmem:[#allocation13 + $0x3d0] sm:$0xf]  ;;  %v6037_v29 = vpop.f32.mrf.mxu0  ;;  %v8217_v38 = vld [vmem:[#allocation13 + $0x398] sm:$0xf] }
 0x3ba   :  { %6268 = vmatmul.bf16.vlgmr.msra.gmra.mxu2 %v10777_v44  ;;  %v8386_v44 = vor.u32 %v10031_v5, %v8385_v35  ;;  %v8273_v35 = vld [vmem:[#allocation13 + $0x408] sm:$0xf]  ;;  %v10003_v5 = vld [vmem:[#allocation13 + $0x420] sm:$0xf0]  ;;  %v8498_v29 = vor.u32 %v10059_v21, %v8497_v7 }
 0x3bb   :  { %6312 = vmatpush.bf16.msrb.mxu2 %v8862_v27  ;;  %v8358_v27 = vor.u32 %v10024_v52, %v8357_v12  ;;  %v8274_v11 = vor.u32 %v10003_v5, %v8273_v35  ;;  %v9996_v12 = vld [vmem:[#allocation13 + $0x3e8] sm:$0xf0]  ;;  %v6074_v34 = vpop.f32.mrf.mxu3  ;;  %v9253_v5 = vld [vmem:[#allocation13 + $0xbb0] sm:$0xf] }
 0x3bc   :  { %6287 = vmatpush.bf16.msrb.mxu0 %v8386_v44  ;;  %v9390_v44 = vor.u32 %v10279_v17, %v9387_v36  ;;  %v8246_v33 = vor.u32 %v9996_v12, %v8245_v28  ;;  %v9225_v36 = vld [vmem:[#allocation13 + $0xb78] sm:$0xf]  ;;  %v8525_v28 = vld [vmem:[#allocation13 + $0x600] sm:$0xf]  ;;  %v10066_v12 = vld [vmem:[#allocation13 + $0x618] sm:$0xf0] }
 0x3bd   :  { %6326 = vmatpush.bf16.msrb.mxu3 %v9058_v47  ;;  %6249 = vmatpush.bf16.msra.mxu1 %v9474_v32  ;;  %v6061_v60 = vpop.f32.mrf.mxu2  ;;  %v8946_v47 = vor.u32 %v10171_v16, %v8945_v15  ;;  %v5998_v32 = vpop.f32.mrf.mxu1  ;;  %v10073_v15 = vld [vmem:[#allocation13 + $0x650] sm:$0xf0] }
 0x3be   :  { %v6062_v52 = vadd.f32 %v6061_v60, %v3322_v3  ;;  %v8638_v60 = vor.u32 %v10094_v50, %v8637_v51  ;;  %v10087_v3 = vld [vmem:[#allocation13 + $0x6c0] sm:$0xf0]  ;;  %v10213_v51 = vld [vmem:[#allocation13 + $0xab0] sm:$0xf0]  ;;  %v8441_v50 = vld [vmem:[#allocation13 + $0x558] sm:$0xf] }
 0x3bf   :  { %6313 = vmatpush.bf16.msrb.mxu2 %v8834_v56  ;;  %v9415_v56 = vld [vmem:[#allocation13 + $0xd14] sm:$0xf0] }
 0x3c0   :  { %6288 = vmatpush.bf16.msrb.mxu0 %v8358_v27  ;;  %v9418_v62 = vor.u32 %v10286_v55, %v9415_v56  ;;  %v10922_v27 = vadd.f32 %v6074_v34, %v6062_v52  ;;  %v5984_v56 = vadd.f32 %v10907_v2, %v10893_v24  ;;  %v8581_v24 = vld [vmem:[#allocation13 + $0x670] sm:$0xf]  ;;  %v10080_v2 = vld [vmem:[#allocation13 + $0x688] sm:$0xf0]  ;;  %v10227_v34 = vld [vmem:[#allocation13 + $0xb20] sm:$0xf0] }
 0x3c1   :  { %6327 = vmatpush.bf16.msrb.mxu3 %v9030_v14  ;;  %6250 = vmatpush.bf16.msra.mxu1 %v9446_v37  ;;  %v9362_v14 = vor.u32 %v10272_v26, %v9359_v20  ;;  %v10157_v37 = vld [vmem:[#allocation13 + $0x8f0] sm:$0xf0]  ;;  %v8582_v17 = vor.u32 %v10080_v2, %v8581_v24  ;;  %v9421_v24 = vld [vmem:[#allocation13 + $0xd00] sm:$0xf]  ;;  %v10290_v2 = vld [vmem:[#allocation13 + $0xd18] sm:$0xf0] }
 0x3c2   :  { %v8890_v57 = vor.u32 %v10157_v37, %v8889_v48  ;;  %v9113_v37 = vld [vmem:[#allocation13 + $0xa98] sm:$0xf] }
 0x3c3   :  { %6314 = vmatpush.bf16.msrb.mxu2 %v8806_v43  ;;  %v8974_v43 = vor.u32 %v10178_v19, %v8973_v0  ;;  %v10255_v0 = vld [vmem:[#allocation13 + $0xc00] sm:$0xf0]  ;;  %v6076_v19 = vpop.f32.mrf.mxu3 }
 0x3c4   :  { %6289 = vmatpush.bf16.msrb.mxu0 %v8330_v49  ;;  %v10262_v49 = vld [vmem:[#allocation13 + $0xc38] sm:$0xf0]  ;;  %v10311_v19 = vld [vmem:[#allocation13 + $0xdc0] sm:$0xf0] }
 0x3c5   :  { %6328 = vmatpush.bf16.msrb.mxu3 %v9002_v54  ;;  %6251 = vmatpush.bf16.msra.mxu1 %v9418_v62  ;;  %v6063_v31 = vpop.f32.mrf.mxu2  ;;  %v9310_v55 = vor.u32 %v10262_v49, %v9309_v4  ;;  %v5997_v62 = vadd.f32 %v10915_v1, %v5984_v56  ;;  %v9114_v56 = vor.u32 %v10213_v51, %v9113_v37 }
 0x3c6   :  { %v9169_v31 = vld [vmem:[#allocation13 + $0xb08] sm:$0xf] }
 0x3c7   :  { %6315 = vmatpush.bf16.msrb.mxu2 %v8778_v9  ;;  %v8666_v9 = vor.u32 %v10101_v13, %v8665_v23  ;;  %v10241_v23 = vld [vmem:[#allocation13 + $0xb90] sm:$0xf0]  ;;  %v8553_v13 = vld [vmem:[#allocation13 + $0x638] sm:$0xf]  ;;  %v9170_v32 = vor.u32 %v10227_v34, %v9169_v31 }
 0x3c8   :  { %6290 = vmatpush.bf16.msrb.mxu0 %v8302_v25  ;;  %v8609_v25 = vld [vmem:[#allocation13 + $0x6a8] sm:$0xf] }
 0x3c9   :  { %6329 = vmatpush.bf16.msrb.mxu3 %v8974_v43  ;;  %6252 = vmatpush.bf16.msra.mxu1 %v9390_v44  ;;  %v8610_v35 = vor.u32 %v10087_v3, %v8609_v25  ;;  %v6010_v43 = vadd.f32 %v10905_v39, %v5997_v62  ;;  %v9197_v44 = vld [vmem:[#allocation13 + $0xb40] sm:$0xf]  ;;  %v10234_v39 = vld [vmem:[#allocation13 + $0xb58] sm:$0xf0]  ;;  %v9477_v3 = vld [vmem:[#allocation13 + $0xd70] sm:$0xf] }
 0x3ca   :  { %v9198_v26 = vor.u32 %v10234_v39, %v9197_v44  ;;  %v10304_v62 = vld [vmem:[#allocation13 + $0xd88] sm:$0xf0] }
 0x3cb   :  { %6316 = vmatpush.bf16.msrb.mxu2 %v8750_v30  ;;  %v10265_v30 = vld [vmem:[#allocation13 + $0xc54] sm:$0xf]  ;;  %v6023_v16 = vadd.f32 %v10909_v22, %v6010_v43  ;;  %v8526_v22 = vor.u32 %v10066_v12, %v8525_v28 }
 0x3cc   :  { %6291 = vmatpush.bf16.msrb.mxu0 %v8274_v11  ;;  %v9334_v54 = vor.u32 %v10265_v30, %v9331_v45  ;;  %v8554_v11 = vor.u32 %v10073_v15, %v8553_v13  ;;  %v8469_v30 = vld [vmem:[#allocation13 + $0x590] sm:$0xf]  ;;  %v10283_v13 = vld [vmem:[#allocation13 + $0xce0] sm:$0xf0] }
 0x3cd   :  { %6330 = vmatpush.bf16.msrb.mxu3 %v8946_v47  ;;  %6253 = vmatpush.bf16.msra.mxu1 %v9362_v14  ;;  %v10052_v14 = vld [vmem:[#allocation13 + $0x5a8] sm:$0xf0] }
 0x3ce   :  { %v8470_v49 = vor.u32 %v10052_v14, %v8469_v30 }
 0x3cf   :  { %6317 = vmatpush.bf16.msrb.mxu2 %v8722_v53  ;;  %v8218_v53 = vor.u32 %v9989_v41, %v8217_v38 }
 0x3d0   :  { %6292 = vmatpush.bf16.msrb.mxu0 %v8246_v33  ;;  %v10220_v33 = vld [vmem:[#allocation13 + $0xae8] sm:$0xf0] }
 0x3d1   :  { %6331 = vmatpush.bf16.msrb.mxu3 %v8918_v46  ;;  %6254 = vmatpush.bf16.msra.mxu1 %v9334_v54  ;;  %v9533_v54 = vld [vmem:[#allocation13 + $0xde0] sm:$0xf] }
 0x3d2   :  { %v10936_v47 = vpop.f32.mrf.mxu0 }
 0x3d3   :  { %6318 = vmatpush.bf16.msrb.mxu2 %v8694_v8  ;;  %v10248_v8 = vld [vmem:[#allocation13 + $0xbc8] sm:$0xf0] }
 0x3d4   :  { %6293 = vmatpush.bf16.msrb.mxu0 %v8218_v53  ;;  %6255 = vmatmul.bf16.vlgmr.msra.gmra.mxu1 %v10816_v58  ;;  %v9254_v1 = vor.u32 %v10248_v8, %v9253_v5  ;;  %v10045_v53 = vld [vmem:[#allocation13 + $0x570] sm:$0xf0] }
 0x3d5   :  { %6332 = vmatpush.bf16.msrb.mxu3 %v8890_v57  ;;  %6299 = vmatpush.bf16.msrb.mxu1 %v8638_v60  ;;  %v8442_v57 = vor.u32 %v10045_v53, %v8441_v50  ;;  %v10297_v5 = vld [vmem:[#allocation13 + $0xd50] sm:$0xf0] }
 0x3d7   :  { %6319 = vmatpush.bf16.msrb.mxu2 %v8666_v9  ;;  %6294 = vmatmul.bf16.vlgmr.msrb.gmra.mxu0 %v10789_v6  ;;  %v9226_v6 = vor.u32 %v10241_v23, %v9225_v36  ;;  %v6048_v9 = vpop.f32.mrf.mxu1  ;;  %v9422_v36 = vor.u32 %v10290_v2, %v9421_v24  ;;  %v3323_v23 = vperm.slane %v10919_v18, 5 }
 0x3d8   :  { %6338 = vmatpush.bf16.msra.mxu0 %v9310_v55  ;;  %6333 = vmatmul.bf16.vlgmr.msrb.gmra.mxu3 %v10803_v40  ;;  %v6036_v40 = vadd.f32 %v10917_v61, %v6023_v16  ;;  %v9141_v61 = vld [vmem:[#allocation13 + $0xad0] sm:$0xf]  ;;  %v10318_v55 = vld [vmem:[#allocation13 + $0xdf8] sm:$0xf0] }
 0x3d9   :  { %6300 = vmatpush.bf16.msrb.mxu1 %v8610_v35  ;;  %v9142_v48 = vor.u32 %v10220_v33, %v9141_v61  ;;  %v9534_v60 = vor.u32 %v10318_v55, %v9533_v54  ;;  %v9449_v35 = vld [vmem:[#allocation13 + $0xd38] sm:$0xf]  ;;  %v9365_v16 = vld [vmem:[#allocation13 + $0xc90] sm:$0xf] }
 0x3da   :  { %6320 = vmatmul.bf16.vlgmr.msrb.gmra.mxu2 %v10793_v59  ;;  %v9282_v59 = vor.u32 %v10255_v0, %v9281_v63  ;;  %v6049_v20 = vadd.f32 %v6048_v9, %v6036_v40  ;;  %v10938_v38 = vpop.f32.mrf.mxu3  ;;  %v6089_v46 = vpop.f32.mrf.mxu0  ;;  %v9505_v0 = vld [vmem:[#allocation13 + $0xda8] sm:$0xf]  ;;  %v9450_v8 = vor.u32 %v10297_v5, %v9449_v35  ;;  %v9337_v9 = vld [vmem:[#allocation13 + $0xc58] sm:$0xf] }
 0x3db   :  { %v9506_v25 = vor.u32 %v10311_v19, %v9505_v0 }
 0x3dc   :  { %6339 = vmatpush.bf16.msra.mxu0 %v9282_v59  ;;  %10342 = vtanh.f32 %v6049_v20  ;;  %v9478_v59 = vor.u32 %v10304_v62, %v9477_v3 }
 0x3dd   :  { %6301 = vmatpush.bf16.msrb.mxu1 %v8582_v17  ;;  %v10934_v52 = vpop.f32.mrf.mxu2 }
 0x3df   :  { %v6050_v41 = vpop.f32.mrf.mxu1 }
 0x3e0   :  { %6340 = vmatpush.bf16.msra.mxu0 %v9254_v1 }
 0x3e1   :  { %6302 = vmatpush.bf16.msrb.mxu1 %v8554_v11 }
 0x3e2   :  { %v10343_v4 = vpop.eup %10342  ;;  %v6128_v63 = vpop.f32.mrf.mxu3 }
 0x3e3   :  { %6374 = vst [vmem:[#allocation16 + $0x18] sm:$0xff] %v10343_v4 }
 0x3e4   :  { %6341 = vmatpush.bf16.msra.mxu0 %v9226_v6  ;;  %v10276_v6 = vld [vmem:[#allocation13 + $0xca8] sm:$0xf0] }
 0x3e5   :  { %6303 = vmatpush.bf16.msrb.mxu1 %v8526_v22  ;;  %v6115_v45 = vpop.f32.mrf.mxu2  ;;  %v9366_v40 = vor.u32 %v10276_v6, %v9365_v16  ;;  %v6088_v22 = vadd.f32 %v10936_v47, %v10922_v27 }
 0x3e8   :  { %6342 = vmatpush.bf16.msra.mxu0 %v9198_v26  ;;  %v10269_v26 = vld [vmem:[#allocation13 + $0xc70] sm:$0xf0] }
 0x3e9   :  { %6304 = vmatpush.bf16.msrb.mxu1 %v8498_v29  ;;  %v9338_v20 = vor.u32 %v10269_v26, %v9337_v9 }
 0x3ec   :  { %6343 = vmatpush.bf16.msra.mxu0 %v9170_v32 }
 0x3ed   :  { %6305 = vmatpush.bf16.msrb.mxu1 %v8470_v49 }
 0x3f0   :  { %6344 = vmatpush.bf16.msra.mxu0 %v9142_v48 }
 0x3f1   :  { %6306 = vmatpush.bf16.msrb.mxu1 %v8442_v57  ;;  %v6100_v1 = vpop.f32.mrf.mxu1 }
 0x3f2   :  { %v6139_v17 = vpop.f32.mrf.mxu0  ;;  %v6101_v34 = vadd.f32 %v6100_v1, %v6088_v22 }
 0x3f4   :  { %6345 = vmatpush.bf16.msra.mxu0 %v9114_v56  ;;  %6307 = vmatmul.bf16.vlgmr.msrb.gmra.mxu1 %v10785_v42  ;;  %v6114_v7 = vadd.f32 %v10934_v52, %v6101_v34 }
 0x3f5   :  { %6351 = vmatpush.bf16.msra.mxu1 %v9534_v60 }
 0x3f6   :  { %v6127_v21 = vadd.f32 %v10938_v38, %v6114_v7 }
 0x3f7   :  { %6346 = vmatmul.bf16.vlgmr.msra.gmra.mxu0 %v10809_v10  ;;  %v9393_v10 = vld [vmem:[#allocation13 + $0xcc8] sm:$0xf] }
 0x3f8   :  { %v9394_v15 = vor.u32 %v10283_v13, %v9393_v10  ;;  %v6140_v32 = vadd.f32 %v6139_v17, %v6127_v21 }
 0x3f9   :  { %6352 = vmatpush.bf16.msra.mxu1 %v9506_v25  ;;  %v6178_v44 = vpop.f32.mrf.mxu3  ;;  %v6102_v28 = vpop.f32.mrf.mxu1 }
 0x3fa   :  { %v6141_v12 = vpop.f32.mrf.mxu0 }
 0x3fd   :  { %6353 = vmatpush.bf16.msra.mxu1 %v9478_v59  ;;  %v6165_v43 = vpop.f32.mrf.mxu2 }
 0x3fe   :  { %v6166_v42 = vadd.f32 %v6165_v43, %v3323_v23 }
 0x400   :  { %v6179_v39 = vadd.f32 %v6178_v44, %v6166_v42 }
 0x401   :  { %6354 = vmatpush.bf16.msra.mxu1 %v9450_v8  ;;  %v6180_v31 = vpop.f32.mrf.mxu3 }
 0x405   :  { %6355 = vmatpush.bf16.msra.mxu1 %v9422_v36  ;;  %v6167_v11 = vpop.f32.mrf.mxu2 }
 0x409   :  { %6356 = vmatpush.bf16.msra.mxu1 %v9394_v15 }
 0x40d   :  { %6357 = vmatpush.bf16.msra.mxu1 %v9366_v40 }
 0x411   :  { %6358 = vmatpush.bf16.msra.mxu1 %v9338_v20  ;;  %v6152_v61 = vpop.f32.mrf.mxu1 }
 0x412   :  { %v6153_v30 = vadd.f32 %v6152_v61, %v6140_v32 }
 0x414   :  { %6359 = vmatmul.bf16.vlgmr.msra.gmra.mxu1 %v10816_v58  ;;  %v6191_v33 = vpop.f32.mrf.mxu0  ;;  %10344 = vtanh.f32 %v6153_v30  ;;  %v3324_v58 = vperm.slane %v10919_v18, 6 }
 0x415   :  { %v6192_v54 = vadd.f32 %v6191_v33, %v6179_v39 }
 0x419   :  { %v6154_v41 = vpop.f32.mrf.mxu1 }
 0x41a   :  { %v10345_v27 = vpop.eup %10344 }
 0x41b   :  { %v6230_v45 = vpop.f32.mrf.mxu3  ;;  %6375 = vst [vmem:[#allocation16 + $0x20] sm:$0xff] %v10345_v27 }
 0x41c   :  { %v6193_v46 = vpop.f32.mrf.mxu0 }
 0x41d   :  { %v6217_v29 = vpop.f32.mrf.mxu2 }
 0x423   :  { %v6232_v47 = vpop.f32.mrf.mxu3 }
 0x425   :  { %v6219_v14 = vpop.f32.mrf.mxu2 }
 0x431   :  { %v6204_v4 = vpop.f32.mrf.mxu1 }
 0x432   :  { %v6205_v56 = vadd.f32 %v6204_v4, %v6192_v54 }
 0x434   :  { %v6243_v52 = vpop.f32.mrf.mxu0  ;;  %v6218_v57 = vadd.f32 %v6217_v29, %v6205_v56 }
 0x436   :  { %v6231_v60 = vadd.f32 %v6230_v45, %v6218_v57 }
 0x438   :  { %v6244_v63 = vadd.f32 %v6243_v52, %v6231_v60 }
 0x439   :  { %v6206_v50 = vpop.f32.mrf.mxu1 }
 0x43b   :  { %v6282_v37 = vpop.f32.mrf.mxu3 }
 0x43c   :  { %v6245_v53 = vpop.f32.mrf.mxu0 }
 0x43d   :  { %v6269_v48 = vpop.f32.mrf.mxu2 }
 0x43e   :  { %v6270_v49 = vadd.f32 %v6269_v48, %v3324_v58 }
 0x440   :  { %v6283_v51 = vadd.f32 %v6282_v37, %v6270_v49 }
 0x443   :  { %v6284_v55 = vpop.f32.mrf.mxu3 }
 0x445   :  { %v6271_v38 = vpop.f32.mrf.mxu2 }
 0x451   :  { %v6256_v25 = vpop.f32.mrf.mxu1 }
 0x452   :  { %v6257_v3 = vadd.f32 %v6256_v25, %v6244_v63 }
 0x454   :  { %v6295_v19 = vpop.f32.mrf.mxu0  ;;  %10346 = vtanh.f32 %v6257_v3 }
 0x455   :  { %v6296_v17 = vadd.f32 %v6295_v19, %v6283_v51 }
 0x459   :  { %v6258_v18 = vpop.f32.mrf.mxu1 }
 0x45a   :  { %v10347_v5 = vpop.eup %10346 }
 0x45b   :  { %v6334_v59 = vpop.f32.mrf.mxu3  ;;  %6376 = vst [vmem:[#allocation16 + $0x28] sm:$0xff] %v10347_v5 }
 0x45c   :  { %v6297_v35 = vpop.f32.mrf.mxu0 }
 0x45d   :  { %v6321_v0 = vpop.f32.mrf.mxu2 }
 0x463   :  { %v6336_v8 = vpop.f32.mrf.mxu3 }
 0x465   :  { %v6323_v62 = vpop.f32.mrf.mxu2 }
 0x471   :  { %v6308_v2 = vpop.f32.mrf.mxu1 }
 0x472   :  { %v6309_v36 = vadd.f32 %v6308_v2, %v6296_v17 }
 0x474   :  { %v6347_v24 = vpop.f32.mrf.mxu0  ;;  %v6322_v23 = vadd.f32 %v6321_v0, %v6309_v36 }
 0x476   :  { %v6335_v10 = vadd.f32 %v6334_v59, %v6322_v23 }
 0x478   :  { %v6348_v13 = vadd.f32 %v6347_v24, %v6335_v10 }
 0x479   :  { %v6310_v1 = vpop.f32.mrf.mxu1 }
 0x47c   :  { %v6349_v43 = vpop.f32.mrf.mxu0 }
 0x491   :  { %v6360_v15 = vpop.f32.mrf.mxu1 }
 0x492   :  { %v6361_v42 = vadd.f32 %v6360_v15, %v6348_v13 }
 0x494   :  { %10348 = vtanh.f32 %v6361_v42 }
 0x499   :  { %v6362_v16 = vpop.f32.mrf.mxu1 }
 0x49a   :  { %v10349_v6 = vpop.eup %10348 }
 0x49b   :  { %6377 = vst [vmem:[#allocation16 + $0x30] sm:$0xff] %v10349_v6 }
 0x49c   :  { %6388 = dma.vmem_to_hbm [thread:$0]  %s6384_s28, 896, %s6386_s30, [#allocation4]  }
 0x49d   :  { %10579 = dma.done.wait [#allocation4], 896  }
 0x49e   :  { %10580 = vsyncadd [#allocation4], 4294966400 }
 0x49f   :  { %6393 = vsyncpa [#allocation3], 1 }
 0x4a0   :  { %6394 = vsyncpa [#allocation6], 1 }
 0x4a1   :  { %6395 = vsyncpa [#allocation9], 1 }
 0x4a2   :  { %6396 = vsyncpa [#allocation12], 1 }
 0x4a3   :  { %6397 = vsyncpa [#allocation15], 1 }
 0x4a4   :  { %6398 = vsyncpa [#allocation4], 1 }

</bundles_post_ra>
